<compile_context>
chip_gen: v6e
topology: v6e:2x2x1
jax: 0.10.0
libtpu: 0.0.40
codegen_flags: <defaults>
</compile_context>

<pallas_src>
import math
import jax
import jax.numpy as jnp
from jax.experimental import pallas as pl
from jax.experimental.pallas import tpu as pltpu

F32 = jnp.float32
BF16 = jnp.bfloat16
# <= physical VMEM on every generation (v7x: 64 MiB/TC); raises v5e's 16 MiB default.
VMEM_LIMIT = 32 * 1024 * 1024


def _round_up(v, m):
    return (v + m - 1) // m * m


# ---------------------------------------------------------------------------
# Pallas kernels
# ---------------------------------------------------------------------------
def _epilogue(acc, ss, res, relu, o_ref):
    """acc (f32) -> affine (+residual) (+ReLU) -> cast to o_ref dtype."""
    out = acc * ss[0:1, :] + ss[1:2, :]
    if res is not None:
        out = out + res.astype(jnp.float32)
    if relu:
        out = jnp.maximum(out, 0.0)
    o_ref[...] = out.astype(o_ref.dtype)


def _make_matmul_kernel_1step(relu, has_res):
    """grid = (M/tm, O/tn): single full-K dot, fused epilogue, no scratch."""
    if has_res:
        def kernel(x_ref, w_ref, ss_ref, res_ref, o_ref):
            acc = jnp.dot(x_ref[...], w_ref[...],
                          preferred_element_type=jnp.float32)
            _epilogue(acc, ss_ref[...], res_ref[...], relu, o_ref)
    else:
        def kernel(x_ref, w_ref, ss_ref, o_ref):
            acc = jnp.dot(x_ref[...], w_ref[...],
                          preferred_element_type=jnp.float32)
            _epilogue(acc, ss_ref[...], None, relu, o_ref)
    return kernel


def _make_matmul_kernel_ksteps(relu, has_res):
    """grid = (M/tm, O/tn, K/tk): f32 VMEM accumulator, init/finalize on k axis."""
    if has_res:
        def kernel(x_ref, w_ref, ss_ref, res_ref, o_ref, acc_ref):
            @pl.when(pl.program_id(2) == 0)
            def _init():
                acc_ref[...] = jnp.zeros_like(acc_ref)

            acc_ref[...] += jnp.dot(x_ref[...], w_ref[...],
                                    preferred_element_type=jnp.float32)

            @pl.when(pl.program_id(2) == pl.num_programs(2) - 1)
            def _fin():
                _epilogue(acc_ref[...], ss_ref[...], res_ref[...], relu, o_ref)
    else:
        def kernel(x_ref, w_ref, ss_ref, o_ref, acc_ref):
            @pl.when(pl.program_id(2) == 0)
            def _init():
                acc_ref[...] = jnp.zeros_like(acc_ref)

            acc_ref[...] += jnp.dot(x_ref[...], w_ref[...],
                                    preferred_element_type=jnp.float32)

            @pl.when(pl.program_id(2) == pl.num_programs(2) - 1)
            def _fin():
                _epilogue(acc_ref[...], ss_ref[...], None, relu, o_ref)
    return kernel


def _make_pool_kernel(C):
    """2x2/stride-2 max-pool over row pairs + folded BN affine + ReLU."""
    def kernel(x_ref, ss_ref, o_ref):
        x = x_ref[...].astype(jnp.float32)            # (tr, 2, Wo, 2*C)
        v = jnp.maximum(x[:, 0], x[:, 1])             # vertical max   -> (tr, Wo, 2*C)
        m = jnp.maximum(v[:, :, :C], v[:, :, C:])     # horizontal max -> (tr, Wo, C)
        ss = ss_ref[...].astype(jnp.float32)          # (2, C)
        out = m * ss[0] + ss[1]
        o_ref[...] = jnp.maximum(out, 0.0).astype(o_ref.dtype)
    return kernel


# ---------------------------------------------------------------------------
# Pallas wrappers
# ---------------------------------------------------------------------------
def matmul_affine(x, w, scale, shift, relu, residual=None, out_dtype=F32):
    """relu?( (x @ w) * scale + shift (+ residual) ) — fused bf16 MXU matmul."""
    M, K = x.shape
    O = w.shape[1]

    # N tiling: 256-wide output tiles whenever O > 128 (feeds v6e/v7x 256-wide
    # MXUs, larger unmasked stores); otherwise one lane-dense 128 tile.
    if O > 128:
        tn = 256
        Op = _round_up(O, 256)
    else:
        tn = 128
        Op = 128

    # M tiling: multiple of 16 (bf16 sublane packing), capped at 512.
    tm = min(_round_up(max(M, 1), 16), 512)
    Mp = _round_up(M, tm)

    # K: no 128-padding.  Single k-step covering the full (16-aligned) K whenever
    # it fits the tile budget (always true for ERFNet, K <= 576).
    Kp = _round_up(K, 16)
    if Kp <= 1024:
        tk = Kp
    else:
        Kr = _round_up(K, 128)
        nk_ = -(-Kr // 1024)
        tk = _round_up(-(-Kr // nk_), 128)
        Kp = nk_ * tk
    nk = Kp // tk

    xp = x.astype(BF16)
    if (Mp != M) or (Kp != K):
        xp = jnp.pad(xp, ((0, Mp - M), (0, Kp - K)))
    wp = w.astype(BF16)
    if (Kp != K) or (Op != O):
        wp = jnp.pad(wp, ((0, Kp - K), (0, Op - O)))
    ss = jnp.stack([scale.astype(F32), shift.astype(F32)], axis=0)   # (2, O)
    if Op != O:
        ss = jnp.pad(ss, ((0, 0), (0, Op - O)))

    args = [xp, wp, ss]
    has_res = residual is not None
    if has_res:
        rp = residual.astype(BF16)
        if (Mp != M) or (Op != O):
            rp = jnp.pad(rp, ((0, Mp - M), (0, Op - O)))
        args.append(rp)

    if nk == 1:
        in_specs = [pl.BlockSpec((tm, tk), lambda i, j: (i, 0)),
                    pl.BlockSpec((tk, tn), lambda i, j: (0, j)),
                    pl.BlockSpec((2, tn), lambda i, j: (0, j))]
        if has_res:
            in_specs.append(pl.BlockSpec((tm, tn), lambda i, j: (i, j)))
        out = pl.pallas_call(
            _make_matmul_kernel_1step(relu, has_res),
            out_shape=jax.ShapeDtypeStruct((Mp, Op), out_dtype),
            grid=(Mp // tm, Op // tn),
            in_specs=in_specs,
            out_specs=pl.BlockSpec((tm, tn), lambda i, j: (i, j)),
            compiler_params=pltpu.CompilerParams(
                dimension_semantics=("parallel", "parallel"),
                vmem_limit_bytes=VMEM_LIMIT),
        )(*args)
    else:
        in_specs = [pl.BlockSpec((tm, tk), lambda i, j, k: (i, k)),
                    pl.BlockSpec((tk, tn), lambda i, j, k: (k, j)),
                    pl.BlockSpec((2, tn), lambda i, j, k: (0, j))]
        if has_res:
            in_specs.append(pl.BlockSpec((tm, tn), lambda i, j, k: (i, j)))
        out = pl.pallas_call(
            _make_matmul_kernel_ksteps(relu, has_res),
            out_shape=jax.ShapeDtypeStruct((Mp, Op), out_dtype),
            grid=(Mp // tm, Op // tn, nk),
            in_specs=in_specs,
            out_specs=pl.BlockSpec((tm, tn), lambda i, j, k: (i, j)),
            scratch_shapes=[pltpu.VMEM((tm, tn), jnp.float32)],
            compiler_params=pltpu.CompilerParams(
                dimension_semantics=("parallel", "parallel", "arbitrary"),
                vmem_limit_bytes=VMEM_LIMIT),
        )(*args)

    if (Mp != M) or (Op != O):
        out = out[:M, :O]
    return out


def maxpool_bn_relu(x, scale, shift, out_dtype=BF16):
    """2x2/stride-2 max-pool with BatchNorm affine + ReLU fused in.

    The activation is read once, densely, as row pairs — no strided HBM slices."""
    N, H, W, C = x.shape
    Ho, Wo = H // 2, W // 2
    if (H != 2 * Ho) or (W != 2 * Wo):
        x = x[:, :2 * Ho, :2 * Wo, :]                # MaxPool2d floor semantics
    rows = N * Ho
    xv = x.reshape(rows, 2, Wo, 2 * C)               # free reshape (row pairs)
    tr = rows if rows <= 256 else 256
    rows_p = _round_up(rows, tr)
    if rows_p != rows:
        xv = jnp.pad(xv, ((0, rows_p - rows), (0, 0), (0, 0), (0, 0)))
    ss = jnp.stack([scale.astype(F32), shift.astype(F32)], axis=0)   # (2, C)

    out = pl.pallas_call(
        _make_pool_kernel(C),
        out_shape=jax.ShapeDtypeStruct((rows_p, Wo, C), out_dtype),
        grid=(rows_p // tr,),
        in_specs=[pl.BlockSpec((tr, 2, Wo, 2 * C), lambda i: (i, 0, 0, 0)),
                  pl.BlockSpec((2, C), lambda i: (0, 0))],
        out_specs=pl.BlockSpec((tr, Wo, C), lambda i: (i, 0, 0)),
        compiler_params=pltpu.CompilerParams(
            dimension_semantics=("parallel",), vmem_limit_bytes=VMEM_LIMIT),
    )(xv, ss)
    if rows_p != rows:
        out = out[:rows]
    return out.reshape(N, Ho, Wo, C)


# ---------------------------------------------------------------------------
# Convolution helpers (im2col glue in JAX, matmul in Pallas)
# ---------------------------------------------------------------------------
def _im2col(x, kh, kw, stride, dilation, pad):
    # Patches are built in bf16 (activations are already bf16 between layers).
    x = x.astype(BF16)
    N, H, W, C = x.shape
    sh, sw = stride
    dh, dw = dilation
    xp = jnp.pad(x, ((0, 0), pad[0], pad[1], (0, 0)))
    Hp = H + pad[0][0] + pad[0][1]
    Wp = W + pad[1][0] + pad[1][1]
    oh = (Hp - (dh * (kh - 1) + 1)) // sh + 1
    ow = (Wp - (dw * (kw - 1) + 1)) // sw + 1
    cols = []
    for i in range(kh):
        for j in range(kw):
            cols.append(xp[:, i * dh: i * dh + sh * (oh - 1) + 1: sh,
                           j * dw: j * dw + sw * (ow - 1) + 1: sw, :])
    patches = jnp.concatenate(cols, axis=-1)            # (N, oh, ow, kh*kw*C)
    return patches.reshape(N * oh * ow, kh * kw * C), (N, oh, ow)


def conv2d_fused(x, w, scale, shift, relu,
                 stride=(1, 1), pad=((0, 0), (0, 0)), dilation=(1, 1),
                 residual=None, out_dtype=F32):
    """x: NHWC, w: PyTorch (O, I, kh, kw). Affine/ReLU/residual fused in matmul."""
    O, I, kh, kw = w.shape
    if kh == 1 and kw == 1 and stride == (1, 1) and pad == ((0, 0), (0, 0)):
        N, H, W, _ = x.shape
        cols, oh, ow = x.reshape(N * H * W, I), H, W
    else:
        cols, (N, oh, ow) = _im2col(x, kh, kw, stride, dilation, pad)
    w_mat = jnp.transpose(w, (2, 3, 1, 0)).reshape(kh * kw * I, O)
    res2d = None if residual is None else residual.reshape(N * oh * ow, O)
    out = matmul_affine(cols, w_mat, scale, shift, relu,
                        residual=res2d, out_dtype=out_dtype)
    return out.reshape(N, oh, ow, O)


def bn_scale_shift(bn, bias=None):
    """Fold inference BatchNorm (eps=1e-3) + optional preceding conv bias."""
    scale = bn['gamma'] / jnp.sqrt(bn['var'] + 1e-3)
    shift = bn['beta'] - bn['mean'] * scale
    if bias is not None:
        shift = shift + bias * scale
    return scale, shift


def _upsampler_wmat(w):
    """ConvTranspose2d(ni,no,3,s=2,p=1,op=1) → sub-pixel (4*ni, 4*no) matrix.

    Row index = (py, px, ci) over the 2x2 input patch; column = (dy, dx, co)
    over the 4 output phases. Tap (py,px) feeds phase (dy,dx) through kernel
    position (ky,kx) = (dy+1-2*py, dx+1-2*px) when that index is in [0,2].
    """
    ni, no = w.shape[0], w.shape[1]
    wm = jnp.zeros((2, 2, ni, 2, 2, no), F32)
    for dy in range(2):
        for py in range(2):
            ky = dy + 1 - 2 * py
            if not 0 <= ky <= 2:
                continue
            for dx in range(2):
                for px in range(2):
                    kx = dx + 1 - 2 * px
                    if not 0 <= kx <= 2:
                        continue
                    wm = wm.at[py, px, :, dy, dx, :].set(w[:, :, ky, kx])
    return wm.reshape(4 * ni, 4 * no)


def _pixel_shuffle2(out_flat, N, H, W, no):
    out = out_flat.reshape(N, H, W, 2, 2, no)
    return jnp.transpose(out, (0, 1, 3, 2, 4, 5)).reshape(N, 2 * H, 2 * W, no)


# ---------------------------------------------------------------------------
# Parameter initialization (deterministic, synthetic)
# ---------------------------------------------------------------------------
class KeyGen:
    def __init__(self, key):
        self.key = key

    def __call__(self):
        self.key, sub = jax.random.split(self.key)
        return sub


def _conv_params(kg, o, i, kh, kw):
    fan_in = i * kh * kw
    w = jax.random.normal(kg(), (o, i, kh, kw), F32) / math.sqrt(fan_in)
    b = 0.05 * jax.random.normal(kg(), (o,), F32)
    return w, b


def _convT_params(kg, ni, no, kh, kw):
    w = jax.random.normal(kg(), (ni, no, kh, kw), F32) / math.sqrt(ni * kh * kw)
    b = 0.05 * jax.random.normal(kg(), (no,), F32)
    return w, b


def _bn_params(kg, c):
    return {'gamma': 1.0 + 0.1 * jax.random.normal(kg(), (c,), F32),
            'beta': 0.1 * jax.random.normal(kg(), (c,), F32),
            'mean': 0.1 * jax.random.normal(kg(), (c,), F32),
            'var': 1.0 + 0.1 * jnp.abs(jax.random.normal(kg(), (c,), F32))}


def init_downsampler(kg, ni, no):
    w, b = _conv_params(kg, no - ni, ni, 3, 3)
    return {'w': w, 'b': b, 'bn': _bn_params(kg, no)}


def init_bottleneck(kg, c):
    p = {}
    p['w3x1_1'], p['b3x1_1'] = _conv_params(kg, c, c, 3, 1)
    p['w1x3_1'], p['b1x3_1'] = _conv_params(kg, c, c, 1, 3)
    p['bn1'] = _bn_params(kg, c)
    p['w3x1_2'], p['b3x1_2'] = _conv_params(kg, c, c, 3, 1)
    p['w1x3_2'], p['b1x3_2'] = _conv_params(kg, c, c, 1, 3)
    p['bn2'] = _bn_params(kg, c)
    return p


def init_upsampler(kg, ni, no):
    w, b = _convT_params(kg, ni, no, 3, 3)
    return {'w': w, 'b': b, 'bn': _bn_params(kg, no)}


def init_erfnet(key, num_classes):
    kg = KeyGen(key)
    enc_layers = [('down', init_downsampler(kg, 16, 64), 1)]
    for _ in range(5):
        enc_layers.append(('bneck', init_bottleneck(kg, 64), 1))
    enc_layers.append(('down', init_downsampler(kg, 64, 128), 1))
    for _ in range(2):
        for d in (2, 4, 8, 16):
            enc_layers.append(('bneck', init_bottleneck(kg, 128), d))
    w_bd, b_bd = _conv_params(kg, 256, 128, 1, 1)

    dec_layers = [('up', init_upsampler(kg, 128, 64), 1),
                  ('bneck', init_bottleneck(kg, 64), 1),
                  ('bneck', init_bottleneck(kg, 64), 1),
                  ('up', init_upsampler(kg, 64, 16), 1),
                  ('bneck', init_bottleneck(kg, 16), 1),
                  ('bneck', init_bottleneck(kg, 16), 1)]
    w_out, b_out = _convT_params(kg, 16, num_classes, 2, 2)

    return {
        'enc': {'initial': init_downsampler(kg, 3, 16),
                'layers': enc_layers,
                'boundary': {'w': w_bd, 'b': b_bd}},
        'dec': {'layers': dec_layers,
                'output_conv': {'w': w_out, 'b': b_out}},
    }


# ---------------------------------------------------------------------------
# Block forwards
# ---------------------------------------------------------------------------
def downsampler_fwd(x, p):
    # BN + ReLU of the concatenated tensor are split & fused into the producers:
    # channels [0:Oc) get theirs inside the conv matmul, channels [Oc:) inside
    # the max-pool kernel.  The concat itself stays as JAX glue (bf16).
    Oc = p['w'].shape[0]
    scale, shift = bn_scale_shift(p['bn'])
    conv_out = conv2d_fused(x, p['w'], scale[:Oc], shift[:Oc] + p['b'] * scale[:Oc],
                            relu=True, stride=(2, 2), pad=((1, 1), (1, 1)),
                            out_dtype=BF16)
    pool_out = maxpool_bn_relu(x, scale[Oc:], shift[Oc:], out_dtype=BF16)
    return jnp.concatenate([conv_out, pool_out], axis=-1)


def bottleneck_fwd(x, p, d):
    C = x.shape[-1]
    ones = jnp.ones((C,), F32)
    out = conv2d_fused(x, p['w3x1_1'], ones, p['b3x1_1'], relu=True,
                       pad=((1, 1), (0, 0)), out_dtype=BF16)
    s, sh = bn_scale_shift(p['bn1'], p['b1x3_1'])
    out = conv2d_fused(out, p['w1x3_1'], s, sh, relu=True,
                       pad=((0, 0), (1, 1)), out_dtype=BF16)
    out = conv2d_fused(out, p['w3x1_2'], ones, p['b3x1_2'], relu=True,
                       pad=((d, d), (0, 0)), dilation=(d, 1), out_dtype=BF16)
    s, sh = bn_scale_shift(p['bn2'], p['b1x3_2'])
    # Residual add + final ReLU fused into the last matmul's epilogue.
    out = conv2d_fused(out, p['w1x3_2'], s, sh, relu=True,
                       pad=((0, 0), (d, d)), dilation=(1, d),
                       residual=x, out_dtype=BF16)
    # TODO(synk): Dropout2d is identity in eval mode; training-mode stochastic
    # channel dropout is intentionally not reproduced.
    return out


def upsampler_fwd(x, p):
    # ConvTranspose2d(ni, no, 3, stride=2, padding=1, output_padding=1) + BN + ReLU
    # via sub-pixel decomposition: one matmul on the UN-dilated input producing
    # 4*no phase channels, then pixel shuffle (no zero-multiplies on the MXU).
    ni, no = p['w'].shape[0], p['w'].shape[1]
    N, H, W, _ = x.shape
    w_mat = _upsampler_wmat(p['w'])                                # (4*ni, 4*no)
    s, sh = bn_scale_shift(p['bn'], p['b'])
    cols, _ = _im2col(x, 2, 2, (1, 1), (1, 1), ((0, 1), (0, 1)))   # K = 4*ni
    out = matmul_affine(cols, w_mat, jnp.tile(s, 4), jnp.tile(sh, 4),
                        relu=True, out_dtype=BF16)
    return _pixel_shuffle2(out, N, H, W, no)


def output_conv_fwd(x, p):
    # ConvTranspose2d(16, num_classes, 2, stride=2): each 2x2 output phase is a
    # 1x1 conv of the input → single (M,16)@(16,4*nc) matmul + pixel shuffle.
    ni, nc = p['w'].shape[0], p['w'].shape[1]
    N, H, W, _ = x.shape
    w_mat = jnp.transpose(p['w'], (0, 2, 3, 1)).reshape(ni, 4 * nc)
    out = matmul_affine(x.reshape(N * H * W, ni), w_mat,
                        jnp.ones((4 * nc,), F32), jnp.tile(p['b'], 4),
                        relu=False, out_dtype=F32)
    return _pixel_shuffle2(out, N, H, W, nc)


def erfnet_forward(params, x_nchw):
    x = jnp.transpose(x_nchw, (0, 2, 3, 1)).astype(F32)            # NHWC
    out = downsampler_fwd(x, params['enc']['initial'])
    for kind, p, d in params['enc']['layers']:
        out = downsampler_fwd(out, p) if kind == 'down' else bottleneck_fwd(out, p, d)
    bw = params['enc']['boundary']
    Ob = bw['w'].shape[0]
    boundary = conv2d_fused(out, bw['w'], jnp.ones((Ob,), F32), bw['b'],
                            relu=False, out_dtype=F32)

    dec = out
    for kind, p, d in params['dec']['layers']:
        dec = upsampler_fwd(dec, p) if kind == 'up' else bottleneck_fwd(dec, p, d)
    pred = output_conv_fwd(dec, params['dec']['output_conv'])

    # back to NCHW (PyTorch convention)
    return (jnp.transpose(pred, (0, 3, 1, 2)),
            jnp.transpose(boundary, (0, 3, 1, 2)))


# ---------------------------------------------------------------------------
if __name__ == "__main__":
    num_classes = 4
    key = jax.random.PRNGKey(0)
    k_param, k_input = jax.random.split(key)
    params = init_erfnet(k_param, num_classes)

    x = jax.random.normal(k_input, (2, 3, 16, 16), F32)            # NCHW input

    fwd = jax.jit(lambda inp: erfnet_forward(params, inp))
    prediction, latent = fwd(x)
    jax.block_until_ready((prediction, latent))

    assert prediction.shape == (2, num_classes, 16, 16)
    assert latent.shape == (2, 256, 2, 2)
    assert jnp.all(jnp.isfinite(prediction)) and jnp.all(jnp.isfinite(latent))
    print("KERNEL_OK")
</pallas_src>

<mosaic_0001>
module attributes {stable_mosaic.version = 11 : i64} {
  func.func @kernel(%arg0: i32, %arg1: memref<16x2x8x6xf32, #tpu.memory_space<vmem>>, %arg2: memref<2x3xf32, #tpu.memory_space<vmem>>, %arg3: memref<16x8x3xbf16, #tpu.memory_space<vmem>>) attributes {dimension_semantics = [#tpu.dimension_semantics<parallel>], iteration_bounds = array<i64: 1>, scalar_prefetch = 0 : i64, scratch_operands = 0 : i64, tpu.core_type = #tpu.core_type<tc>, window_params = [{transform_indices = @transform_0, window_bounds = array<i64: 16, 2, 8, 6>}, {pipeline_mode = #tpu.pipeline_mode<synchronous>, transform_indices = @transform_1, window_bounds = array<i64: 2, 3>}, {transform_indices = @transform_2, window_bounds = array<i64: 16, 8, 3>}]} {
    %c0 = arith.constant 0 : index
    %c0_0 = arith.constant 0 : index
    %c0_1 = arith.constant 0 : index
    %c0_2 = arith.constant 0 : index
    %0 = vector.load %arg1[%c0, %c0_0, %c0_1, %c0_2] : memref<16x2x8x6xf32, #tpu.memory_space<vmem>>, vector<16x2x8x6xf32>
    %1 = vector.extract_strided_slice %0 {offsets = [0, 0, 0, 0], sizes = [16, 1, 8, 6], strides = [1, 1, 1, 1]} : vector<16x2x8x6xf32> to vector<16x1x8x6xf32>
    %2 = vector.shape_cast %1 : vector<16x1x8x6xf32> to vector<16x8x6xf32>
    %3 = vector.extract_strided_slice %0 {offsets = [0, 1, 0, 0], sizes = [16, 1, 8, 6], strides = [1, 1, 1, 1]} : vector<16x2x8x6xf32> to vector<16x1x8x6xf32>
    %4 = vector.shape_cast %3 : vector<16x1x8x6xf32> to vector<16x8x6xf32>
    %5 = arith.maximumf %2, %4 : vector<16x8x6xf32>
    %6 = vector.extract_strided_slice %5 {offsets = [0, 0, 0], sizes = [16, 8, 3], strides = [1, 1, 1]} : vector<16x8x6xf32> to vector<16x8x3xf32>
    %7 = vector.extract_strided_slice %5 {offsets = [0, 0, 3], sizes = [16, 8, 3], strides = [1, 1, 1]} : vector<16x8x6xf32> to vector<16x8x3xf32>
    %8 = arith.maximumf %6, %7 : vector<16x8x3xf32>
    %c0_3 = arith.constant 0 : index
    %c0_4 = arith.constant 0 : index
    %9 = vector.load %arg2[%c0_3, %c0_4] : memref<2x3xf32, #tpu.memory_space<vmem>>, vector<2x3xf32>
    %10 = vector.extract_strided_slice %9 {offsets = [0, 0], sizes = [1, 3], strides = [1, 1]} : vector<2x3xf32> to vector<1x3xf32>
    %11 = vector.shape_cast %10 : vector<1x3xf32> to vector<3xf32>
    %12 = vector.shape_cast %11 : vector<3xf32> to vector<1x1x3xf32>
    %13 = vector.broadcast %12 : vector<1x1x3xf32> to vector<16x8x3xf32>
    %14 = arith.mulf %8, %13 : vector<16x8x3xf32>
    %15 = vector.extract_strided_slice %9 {offsets = [1, 0], sizes = [1, 3], strides = [1, 1]} : vector<2x3xf32> to vector<1x3xf32>
    %16 = vector.shape_cast %15 : vector<1x3xf32> to vector<3xf32>
    %17 = vector.shape_cast %16 : vector<3xf32> to vector<1x1x3xf32>
    %18 = vector.broadcast %17 : vector<1x1x3xf32> to vector<16x8x3xf32>
    %19 = arith.addf %14, %18 : vector<16x8x3xf32>
    %cst = arith.constant 0.000000e+00 : f32
    %20 = vector.broadcast %cst : f32 to vector<16x8x3xf32>
    %21 = arith.maximumf %19, %20 : vector<16x8x3xf32>
    %22 = arith.truncf %21 : vector<16x8x3xf32> to vector<16x8x3xbf16>
    %c0_5 = arith.constant 0 : index
    %c0_6 = arith.constant 0 : index
    %c0_7 = arith.constant 0 : index
    %23 = vector.load %arg3[%c0_5, %c0_6, %c0_7] : memref<16x8x3xbf16, #tpu.memory_space<vmem>>, vector<16x8x3xbf16>
    tpu.vector_store %arg3[%c0_5, %c0_6, %c0_7], %22 {strides = array<i32>} : memref<16x8x3xbf16, #tpu.memory_space<vmem>>, vector<16x8x3xbf16>,
    return
  }
  func.func @transform_0(%arg0: i32) -> (i32, i32, i32, i32) {
    %c0_i32 = arith.constant 0 : i32
    %c0_i32_0 = arith.constant 0 : i32
    %c0_i32_1 = arith.constant 0 : i32
    %c0_i32_2 = arith.constant 0 : i32
    return %arg0, %c0_i32, %c0_i32_0, %c0_i32_1 : i32, i32, i32, i32
  }
  func.func @transform_1(%arg0: i32) -> (i32, i32) {
    %c0_i32 = arith.constant 0 : i32
    %c0_i32_0 = arith.constant 0 : i32
    %c0_i32_1 = arith.constant 0 : i32
    return %c0_i32, %c0_i32_0 : i32, i32
  }
  func.func @transform_2(%arg0: i32) -> (i32, i32, i32) {
    %c0_i32 = arith.constant 0 : i32
    %c0_i32_0 = arith.constant 0 : i32
    %c0_i32_1 = arith.constant 0 : i32
    return %arg0, %c0_i32, %c0_i32_0 : i32, i32, i32
  }
}

module attributes {stable_mosaic.version = 11 : i64} {
  func.func @kernel(%arg0: i32, %arg1: i32, %arg2: memref<128x32xbf16, #tpu.memory_space<vmem>>, %arg3: memref<32x128xbf16, #tpu.memory_space<vmem>>, %arg4: memref<2x128xf32, #tpu.memory_space<vmem>>, %arg5: memref<128x128xbf16, #tpu.memory_space<vmem>>) attributes {dimension_semantics = [#tpu.dimension_semantics<parallel>, #tpu.dimension_semantics<parallel>], iteration_bounds = array<i64: 1, 1>, scalar_prefetch = 0 : i64, scratch_operands = 0 : i64, tpu.core_type = #tpu.core_type<tc>, window_params = [{transform_indices = @transform_0, window_bounds = array<i64: 128, 32>}, {transform_indices = @transform_1, window_bounds = array<i64: 32, 128>}, {transform_indices = @transform_2, window_bounds = array<i64: 2, 128>}, {transform_indices = @transform_3, window_bounds = array<i64: 128, 128>}]} {
    %c0 = arith.constant 0 : index
    %c0_0 = arith.constant 0 : index
    %0 = vector.load %arg2[%c0, %c0_0] : memref<128x32xbf16, #tpu.memory_space<vmem>>, vector<128x32xbf16>
    %c0_1 = arith.constant 0 : index
    %c0_2 = arith.constant 0 : index
    %1 = vector.load %arg3[%c0_1, %c0_2] : memref<32x128xbf16, #tpu.memory_space<vmem>>, vector<32x128xbf16>
    %cst = arith.constant dense<0.000000e+00> : vector<128x128xf32>
    %2 = tpu.matmul %0, %1, %cst {dimension_numbers = #tpu.dot_dimension_numbers<[1], [0], [0], [1], [0, 0, 1, 1], [], []>} : vector<128x32xbf16>, vector<32x128xbf16>, vector<128x128xf32> -> vector<128x128xf32>
    %c0_3 = arith.constant 0 : index
    %c0_4 = arith.constant 0 : index
    %3 = vector.load %arg4[%c0_3, %c0_4] : memref<2x128xf32, #tpu.memory_space<vmem>>, vector<2x128xf32>
    %4 = vector.extract_strided_slice %3 {offsets = [0, 0], sizes = [1, 128], strides = [1, 1]} : vector<2x128xf32> to vector<1x128xf32>
    %5 = vector.broadcast %4 : vector<1x128xf32> to vector<128x128xf32>
    %6 = arith.mulf %2, %5 : vector<128x128xf32>
    %7 = vector.extract_strided_slice %3 {offsets = [1, 0], sizes = [1, 128], strides = [1, 1]} : vector<2x128xf32> to vector<1x128xf32>
    %8 = vector.broadcast %7 : vector<1x128xf32> to vector<128x128xf32>
    %9 = arith.addf %6, %8 : vector<128x128xf32>
    %cst_5 = arith.constant 0.000000e+00 : f32
    %10 = vector.broadcast %cst_5 : f32 to vector<128x128xf32>
    %11 = arith.maximumf %9, %10 : vector<128x128xf32>
    %12 = arith.truncf %11 : vector<128x128xf32> to vector<128x128xbf16>
    %c0_6 = arith.constant 0 : index
    %c0_7 = arith.constant 0 : index
    %13 = vector.load %arg5[%c0_6, %c0_7] : memref<128x128xbf16, #tpu.memory_space<vmem>>, vector<128x128xbf16>
    tpu.vector_store %arg5[%c0_6, %c0_7], %12 {strides = array<i32>} : memref<128x128xbf16, #tpu.memory_space<vmem>>, vector<128x128xbf16>,
    return
  }
  func.func @transform_0(%arg0: i32, %arg1: i32) -> (i32, i32) {
    %c0_i32 = arith.constant 0 : i32
    %c0_i32_0 = arith.constant 0 : i32
    return %arg0, %c0_i32 : i32, i32
  }
  func.func @transform_1(%arg0: i32, %arg1: i32) -> (i32, i32) {
    %c0_i32 = arith.constant 0 : i32
    %c0_i32_0 = arith.constant 0 : i32
    return %c0_i32, %arg1 : i32, i32
  }
  func.func @transform_2(%arg0: i32, %arg1: i32) -> (i32, i32) {
    %c0_i32 = arith.constant 0 : i32
    %c0_i32_0 = arith.constant 0 : i32
    return %c0_i32, %arg1 : i32, i32
  }
  func.func @transform_3(%arg0: i32, %arg1: i32) -> (i32, i32) {
    %c0_i32 = arith.constant 0 : i32
    return %arg0, %arg1 : i32, i32
  }
}

module attributes {stable_mosaic.version = 11 : i64} {
  func.func @kernel(%arg0: i32, %arg1: memref<8x2x4x32xbf16, #tpu.memory_space<vmem>>, %arg2: memref<2x16xf32, #tpu.memory_space<vmem>>, %arg3: memref<8x4x16xbf16, #tpu.memory_space<vmem>>) attributes {dimension_semantics = [#tpu.dimension_semantics<parallel>], iteration_bounds = array<i64: 1>, scalar_prefetch = 0 : i64, scratch_operands = 0 : i64, tpu.core_type = #tpu.core_type<tc>, window_params = [{transform_indices = @transform_0, window_bounds = array<i64: 8, 2, 4, 32>}, {pipeline_mode = #tpu.pipeline_mode<synchronous>, transform_indices = @transform_1, window_bounds = array<i64: 2, 16>}, {transform_indices = @transform_2, window_bounds = array<i64: 8, 4, 16>}]} {
    %c0 = arith.constant 0 : index
    %c0_0 = arith.constant 0 : index
    %c0_1 = arith.constant 0 : index
    %c0_2 = arith.constant 0 : index
    %0 = vector.load %arg1[%c0, %c0_0, %c0_1, %c0_2] : memref<8x2x4x32xbf16, #tpu.memory_space<vmem>>, vector<8x2x4x32xbf16>
    %1 = arith.extf %0 : vector<8x2x4x32xbf16> to vector<8x2x4x32xf32>
    %2 = vector.extract_strided_slice %1 {offsets = [0, 0, 0, 0], sizes = [8, 1, 4, 32], strides = [1, 1, 1, 1]} : vector<8x2x4x32xf32> to vector<8x1x4x32xf32>
    %3 = vector.shape_cast %2 : vector<8x1x4x32xf32> to vector<8x4x32xf32>
    %4 = vector.extract_strided_slice %1 {offsets = [0, 1, 0, 0], sizes = [8, 1, 4, 32], strides = [1, 1, 1, 1]} : vector<8x2x4x32xf32> to vector<8x1x4x32xf32>
    %5 = vector.shape_cast %4 : vector<8x1x4x32xf32> to vector<8x4x32xf32>
    %6 = arith.maximumf %3, %5 : vector<8x4x32xf32>
    %7 = vector.extract_strided_slice %6 {offsets = [0, 0, 0], sizes = [8, 4, 16], strides = [1, 1, 1]} : vector<8x4x32xf32> to vector<8x4x16xf32>
    %8 = vector.extract_strided_slice %6 {offsets = [0, 0, 16], sizes = [8, 4, 16], strides = [1, 1, 1]} : vector<8x4x32xf32> to vector<8x4x16xf32>
    %9 = arith.maximumf %7, %8 : vector<8x4x16xf32>
    %c0_3 = arith.constant 0 : index
    %c0_4 = arith.constant 0 : index
    %10 = vector.load %arg2[%c0_3, %c0_4] : memref<2x16xf32, #tpu.memory_space<vmem>>, vector<2x16xf32>
    %11 = vector.extract_strided_slice %10 {offsets = [0, 0], sizes = [1, 16], strides = [1, 1]} : vector<2x16xf32> to vector<1x16xf32>
    %12 = vector.shape_cast %11 : vector<1x16xf32> to vector<16xf32>
    %13 = vector.shape_cast %12 : vector<16xf32> to vector<1x1x16xf32>
    %14 = vector.broadcast %13 : vector<1x1x16xf32> to vector<8x4x16xf32>
    %15 = arith.mulf %9, %14 : vector<8x4x16xf32>
    %16 = vector.extract_strided_slice %10 {offsets = [1, 0], sizes = [1, 16], strides = [1, 1]} : vector<2x16xf32> to vector<1x16xf32>
    %17 = vector.shape_cast %16 : vector<1x16xf32> to vector<16xf32>
    %18 = vector.shape_cast %17 : vector<16xf32> to vector<1x1x16xf32>
    %19 = vector.broadcast %18 : vector<1x1x16xf32> to vector<8x4x16xf32>
    %20 = arith.addf %15, %19 : vector<8x4x16xf32>
    %cst = arith.constant 0.000000e+00 : f32
    %21 = vector.broadcast %cst : f32 to vector<8x4x16xf32>
    %22 = arith.maximumf %20, %21 : vector<8x4x16xf32>
    %23 = arith.truncf %22 : vector<8x4x16xf32> to vector<8x4x16xbf16>
    %c0_5 = arith.constant 0 : index
    %c0_6 = arith.constant 0 : index
    %c0_7 = arith.constant 0 : index
    %24 = vector.load %arg3[%c0_5, %c0_6, %c0_7] : memref<8x4x16xbf16, #tpu.memory_space<vmem>>, vector<8x4x16xbf16>
    tpu.vector_store %arg3[%c0_5, %c0_6, %c0_7], %23 {strides = array<i32>} : memref<8x4x16xbf16, #tpu.memory_space<vmem>>, vector<8x4x16xbf16>,
    return
  }
  func.func @transform_0(%arg0: i32) -> (i32, i32, i32, i32) {
    %c0_i32 = arith.constant 0 : i32
    %c0_i32_0 = arith.constant 0 : i32
    %c0_i32_1 = arith.constant 0 : i32
    %c0_i32_2 = arith.constant 0 : i32
    return %arg0, %c0_i32, %c0_i32_0, %c0_i32_1 : i32, i32, i32, i32
  }
  func.func @transform_1(%arg0: i32) -> (i32, i32) {
    %c0_i32 = arith.constant 0 : i32
    %c0_i32_0 = arith.constant 0 : i32
    %c0_i32_1 = arith.constant 0 : i32
    return %c0_i32, %c0_i32_0 : i32, i32
  }
  func.func @transform_2(%arg0: i32) -> (i32, i32, i32) {
    %c0_i32 = arith.constant 0 : i32
    %c0_i32_0 = arith.constant 0 : i32
    %c0_i32_1 = arith.constant 0 : i32
    return %arg0, %c0_i32, %c0_i32_0 : i32, i32, i32
  }
}

module attributes {stable_mosaic.version = 11 : i64} {
  func.func @kernel(%arg0: i32, %arg1: i32, %arg2: memref<32x144xbf16, #tpu.memory_space<vmem>>, %arg3: memref<144x128xbf16, #tpu.memory_space<vmem>>, %arg4: memref<2x128xf32, #tpu.memory_space<vmem>>, %arg5: memref<32x128xbf16, #tpu.memory_space<vmem>>) attributes {dimension_semantics = [#tpu.dimension_semantics<parallel>, #tpu.dimension_semantics<parallel>], iteration_bounds = array<i64: 1, 1>, scalar_prefetch = 0 : i64, scratch_operands = 0 : i64, tpu.core_type = #tpu.core_type<tc>, window_params = [{transform_indices = @transform_0, window_bounds = array<i64: 32, 144>}, {transform_indices = @transform_1, window_bounds = array<i64: 144, 128>}, {transform_indices = @transform_2, window_bounds = array<i64: 2, 128>}, {transform_indices = @transform_3, window_bounds = array<i64: 32, 128>}]} {
    %c0 = arith.constant 0 : index
    %c0_0 = arith.constant 0 : index
    %0 = vector.load %arg2[%c0, %c0_0] : memref<32x144xbf16, #tpu.memory_space<vmem>>, vector<32x144xbf16>
    %c0_1 = arith.constant 0 : index
    %c0_2 = arith.constant 0 : index
    %1 = vector.load %arg3[%c0_1, %c0_2] : memref<144x128xbf16, #tpu.memory_space<vmem>>, vector<144x128xbf16>
    %cst = arith.constant dense<0.000000e+00> : vector<32x128xf32>
    %2 = tpu.matmul %0, %1, %cst {dimension_numbers = #tpu.dot_dimension_numbers<[1], [0], [0], [1], [0, 0, 1, 1], [], []>} : vector<32x144xbf16>, vector<144x128xbf16>, vector<32x128xf32> -> vector<32x128xf32>
    %c0_3 = arith.constant 0 : index
    %c0_4 = arith.constant 0 : index
    %3 = vector.load %arg4[%c0_3, %c0_4] : memref<2x128xf32, #tpu.memory_space<vmem>>, vector<2x128xf32>
    %4 = vector.extract_strided_slice %3 {offsets = [0, 0], sizes = [1, 128], strides = [1, 1]} : vector<2x128xf32> to vector<1x128xf32>
    %5 = vector.broadcast %4 : vector<1x128xf32> to vector<32x128xf32>
    %6 = arith.mulf %2, %5 : vector<32x128xf32>
    %7 = vector.extract_strided_slice %3 {offsets = [1, 0], sizes = [1, 128], strides = [1, 1]} : vector<2x128xf32> to vector<1x128xf32>
    %8 = vector.broadcast %7 : vector<1x128xf32> to vector<32x128xf32>
    %9 = arith.addf %6, %8 : vector<32x128xf32>
    %cst_5 = arith.constant 0.000000e+00 : f32
    %10 = vector.broadcast %cst_5 : f32 to vector<32x128xf32>
    %11 = arith.maximumf %9, %10 : vector<32x128xf32>
    %12 = arith.truncf %11 : vector<32x128xf32> to vector<32x128xbf16>
    %c0_6 = arith.constant 0 : index
    %c0_7 = arith.constant 0 : index
    %13 = vector.load %arg5[%c0_6, %c0_7] : memref<32x128xbf16, #tpu.memory_space<vmem>>, vector<32x128xbf16>
    tpu.vector_store %arg5[%c0_6, %c0_7], %12 {strides = array<i32>} : memref<32x128xbf16, #tpu.memory_space<vmem>>, vector<32x128xbf16>,
    return
  }
  func.func @transform_0(%arg0: i32, %arg1: i32) -> (i32, i32) {
    %c0_i32 = arith.constant 0 : i32
    %c0_i32_0 = arith.constant 0 : i32
    return %arg0, %c0_i32 : i32, i32
  }
  func.func @transform_1(%arg0: i32, %arg1: i32) -> (i32, i32) {
    %c0_i32 = arith.constant 0 : i32
    %c0_i32_0 = arith.constant 0 : i32
    return %c0_i32, %arg1 : i32, i32
  }
  func.func @transform_2(%arg0: i32, %arg1: i32) -> (i32, i32) {
    %c0_i32 = arith.constant 0 : i32
    %c0_i32_0 = arith.constant 0 : i32
    return %c0_i32, %arg1 : i32, i32
  }
  func.func @transform_3(%arg0: i32, %arg1: i32) -> (i32, i32) {
    %c0_i32 = arith.constant 0 : i32
    return %arg0, %arg1 : i32, i32
  }
}

module attributes {stable_mosaic.version = 11 : i64} {
  func.func @kernel(%arg0: i32, %arg1: i32, %arg2: memref<32x192xbf16, #tpu.memory_space<vmem>>, %arg3: memref<192x128xbf16, #tpu.memory_space<vmem>>, %arg4: memref<2x128xf32, #tpu.memory_space<vmem>>, %arg5: memref<32x128xbf16, #tpu.memory_space<vmem>>) attributes {dimension_semantics = [#tpu.dimension_semantics<parallel>, #tpu.dimension_semantics<parallel>], iteration_bounds = array<i64: 1, 1>, scalar_prefetch = 0 : i64, scratch_operands = 0 : i64, tpu.core_type = #tpu.core_type<tc>, window_params = [{transform_indices = @transform_0, window_bounds = array<i64: 32, 192>}, {transform_indices = @transform_1, window_bounds = array<i64: 192, 128>}, {transform_indices = @transform_2, window_bounds = array<i64: 2, 128>}, {transform_indices = @transform_3, window_bounds = array<i64: 32, 128>}]} {
    %c0 = arith.constant 0 : index
    %c0_0 = arith.constant 0 : index
    %0 = vector.load %arg2[%c0, %c0_0] : memref<32x192xbf16, #tpu.memory_space<vmem>>, vector<32x192xbf16>
    %c0_1 = arith.constant 0 : index
    %c0_2 = arith.constant 0 : index
    %1 = vector.load %arg3[%c0_1, %c0_2] : memref<192x128xbf16, #tpu.memory_space<vmem>>, vector<192x128xbf16>
    %cst = arith.constant dense<0.000000e+00> : vector<32x128xf32>
    %2 = tpu.matmul %0, %1, %cst {dimension_numbers = #tpu.dot_dimension_numbers<[1], [0], [0], [1], [0, 0, 1, 1], [], []>} : vector<32x192xbf16>, vector<192x128xbf16>, vector<32x128xf32> -> vector<32x128xf32>
    %c0_3 = arith.constant 0 : index
    %c0_4 = arith.constant 0 : index
    %3 = vector.load %arg4[%c0_3, %c0_4] : memref<2x128xf32, #tpu.memory_space<vmem>>, vector<2x128xf32>
    %4 = vector.extract_strided_slice %3 {offsets = [0, 0], sizes = [1, 128], strides = [1, 1]} : vector<2x128xf32> to vector<1x128xf32>
    %5 = vector.broadcast %4 : vector<1x128xf32> to vector<32x128xf32>
    %6 = arith.mulf %2, %5 : vector<32x128xf32>
    %7 = vector.extract_strided_slice %3 {offsets = [1, 0], sizes = [1, 128], strides = [1, 1]} : vector<2x128xf32> to vector<1x128xf32>
    %8 = vector.broadcast %7 : vector<1x128xf32> to vector<32x128xf32>
    %9 = arith.addf %6, %8 : vector<32x128xf32>
    %cst_5 = arith.constant 0.000000e+00 : f32
    %10 = vector.broadcast %cst_5 : f32 to vector<32x128xf32>
    %11 = arith.maximumf %9, %10 : vector<32x128xf32>
    %12 = arith.truncf %11 : vector<32x128xf32> to vector<32x128xbf16>
    %c0_6 = arith.constant 0 : index
    %c0_7 = arith.constant 0 : index
    %13 = vector.load %arg5[%c0_6, %c0_7] : memref<32x128xbf16, #tpu.memory_space<vmem>>, vector<32x128xbf16>
    tpu.vector_store %arg5[%c0_6, %c0_7], %12 {strides = array<i32>} : memref<32x128xbf16, #tpu.memory_space<vmem>>, vector<32x128xbf16>,
    return
  }
  func.func @transform_0(%arg0: i32, %arg1: i32) -> (i32, i32) {
    %c0_i32 = arith.constant 0 : i32
    %c0_i32_0 = arith.constant 0 : i32
    return %arg0, %c0_i32 : i32, i32
  }
  func.func @transform_1(%arg0: i32, %arg1: i32) -> (i32, i32) {
    %c0_i32 = arith.constant 0 : i32
    %c0_i32_0 = arith.constant 0 : i32
    return %c0_i32, %arg1 : i32, i32
  }
  func.func @transform_2(%arg0: i32, %arg1: i32) -> (i32, i32) {
    %c0_i32 = arith.constant 0 : i32
    %c0_i32_0 = arith.constant 0 : i32
    return %c0_i32, %arg1 : i32, i32
  }
  func.func @transform_3(%arg0: i32, %arg1: i32) -> (i32, i32) {
    %c0_i32 = arith.constant 0 : i32
    return %arg0, %arg1 : i32, i32
  }
}

module attributes {stable_mosaic.version = 11 : i64} {
  func.func @kernel(%arg0: i32, %arg1: memref<4x2x2x128xbf16, #tpu.memory_space<vmem>>, %arg2: memref<2x64xf32, #tpu.memory_space<vmem>>, %arg3: memref<4x2x64xbf16, #tpu.memory_space<vmem>>) attributes {dimension_semantics = [#tpu.dimension_semantics<parallel>], iteration_bounds = array<i64: 1>, scalar_prefetch = 0 : i64, scratch_operands = 0 : i64, tpu.core_type = #tpu.core_type<tc>, window_params = [{transform_indices = @transform_0, window_bounds = array<i64: 4, 2, 2, 128>}, {pipeline_mode = #tpu.pipeline_mode<synchronous>, transform_indices = @transform_1, window_bounds = array<i64: 2, 64>}, {transform_indices = @transform_2, window_bounds = array<i64: 4, 2, 64>}]} {
    %c0 = arith.constant 0 : index
    %c0_0 = arith.constant 0 : index
    %c0_1 = arith.constant 0 : index
    %c0_2 = arith.constant 0 : index
    %0 = vector.load %arg1[%c0, %c0_0, %c0_1, %c0_2] : memref<4x2x2x128xbf16, #tpu.memory_space<vmem>>, vector<4x2x2x128xbf16>
    %1 = arith.extf %0 : vector<4x2x2x128xbf16> to vector<4x2x2x128xf32>
    %2 = vector.extract_strided_slice %1 {offsets = [0, 0, 0, 0], sizes = [4, 1, 2, 128], strides = [1, 1, 1, 1]} : vector<4x2x2x128xf32> to vector<4x1x2x128xf32>
    %3 = vector.shape_cast %2 : vector<4x1x2x128xf32> to vector<4x2x128xf32>
    %4 = vector.extract_strided_slice %1 {offsets = [0, 1, 0, 0], sizes = [4, 1, 2, 128], strides = [1, 1, 1, 1]} : vector<4x2x2x128xf32> to vector<4x1x2x128xf32>
    %5 = vector.shape_cast %4 : vector<4x1x2x128xf32> to vector<4x2x128xf32>
    %6 = arith.maximumf %3, %5 : vector<4x2x128xf32>
    %7 = vector.extract_strided_slice %6 {offsets = [0, 0, 0], sizes = [4, 2, 64], strides = [1, 1, 1]} : vector<4x2x128xf32> to vector<4x2x64xf32>
    %8 = vector.extract_strided_slice %6 {offsets = [0, 0, 64], sizes = [4, 2, 64], strides = [1, 1, 1]} : vector<4x2x128xf32> to vector<4x2x64xf32>
    %9 = arith.maximumf %7, %8 : vector<4x2x64xf32>
    %c0_3 = arith.constant 0 : index
    %c0_4 = arith.constant 0 : index
    %10 = vector.load %arg2[%c0_3, %c0_4] : memref<2x64xf32, #tpu.memory_space<vmem>>, vector<2x64xf32>
    %11 = vector.extract_strided_slice %10 {offsets = [0, 0], sizes = [1, 64], strides = [1, 1]} : vector<2x64xf32> to vector<1x64xf32>
    %12 = vector.shape_cast %11 : vector<1x64xf32> to vector<64xf32>
    %13 = vector.shape_cast %12 : vector<64xf32> to vector<1x1x64xf32>
    %14 = vector.broadcast %13 : vector<1x1x64xf32> to vector<4x2x64xf32>
    %15 = arith.mulf %9, %14 : vector<4x2x64xf32>
    %16 = vector.extract_strided_slice %10 {offsets = [1, 0], sizes = [1, 64], strides = [1, 1]} : vector<2x64xf32> to vector<1x64xf32>
    %17 = vector.shape_cast %16 : vector<1x64xf32> to vector<64xf32>
    %18 = vector.shape_cast %17 : vector<64xf32> to vector<1x1x64xf32>
    %19 = vector.broadcast %18 : vector<1x1x64xf32> to vector<4x2x64xf32>
    %20 = arith.addf %15, %19 : vector<4x2x64xf32>
    %cst = arith.constant 0.000000e+00 : f32
    %21 = vector.broadcast %cst : f32 to vector<4x2x64xf32>
    %22 = arith.maximumf %20, %21 : vector<4x2x64xf32>
    %23 = arith.truncf %22 : vector<4x2x64xf32> to vector<4x2x64xbf16>
    %c0_5 = arith.constant 0 : index
    %c0_6 = arith.constant 0 : index
    %c0_7 = arith.constant 0 : index
    %24 = vector.load %arg3[%c0_5, %c0_6, %c0_7] : memref<4x2x64xbf16, #tpu.memory_space<vmem>>, vector<4x2x64xbf16>
    tpu.vector_store %arg3[%c0_5, %c0_6, %c0_7], %23 {strides = array<i32>} : memref<4x2x64xbf16, #tpu.memory_space<vmem>>, vector<4x2x64xbf16>,
    return
  }
  func.func @transform_0(%arg0: i32) -> (i32, i32, i32, i32) {
    %c0_i32 = arith.constant 0 : i32
    %c0_i32_0 = arith.constant 0 : i32
    %c0_i32_1 = arith.constant 0 : i32
    %c0_i32_2 = arith.constant 0 : i32
    return %arg0, %c0_i32, %c0_i32_0, %c0_i32_1 : i32, i32, i32, i32
  }
  func.func @transform_1(%arg0: i32) -> (i32, i32) {
    %c0_i32 = arith.constant 0 : i32
    %c0_i32_0 = arith.constant 0 : i32
    %c0_i32_1 = arith.constant 0 : i32
    return %c0_i32, %c0_i32_0 : i32, i32
  }
  func.func @transform_2(%arg0: i32) -> (i32, i32, i32) {
    %c0_i32 = arith.constant 0 : i32
    %c0_i32_0 = arith.constant 0 : i32
    %c0_i32_1 = arith.constant 0 : i32
    return %arg0, %c0_i32, %c0_i32_0 : i32, i32, i32
  }
}

module attributes {stable_mosaic.version = 11 : i64} {
  func.func @kernel(%arg0: i32, %arg1: i32, %arg2: memref<32x192xbf16, #tpu.memory_space<vmem>>, %arg3: memref<192x128xbf16, #tpu.memory_space<vmem>>, %arg4: memref<2x128xf32, #tpu.memory_space<vmem>>, %arg5: memref<32x128xbf16, #tpu.memory_space<vmem>>, %arg6: memref<32x128xbf16, #tpu.memory_space<vmem>>) attributes {dimension_semantics = [#tpu.dimension_semantics<parallel>, #tpu.dimension_semantics<parallel>], iteration_bounds = array<i64: 1, 1>, scalar_prefetch = 0 : i64, scratch_operands = 0 : i64, tpu.core_type = #tpu.core_type<tc>, window_params = [{transform_indices = @transform_0, window_bounds = array<i64: 32, 192>}, {transform_indices = @transform_1, window_bounds = array<i64: 192, 128>}, {transform_indices = @transform_2, window_bounds = array<i64: 2, 128>}, {transform_indices = @transform_3, window_bounds = array<i64: 32, 128>}, {transform_indices = @transform_4, window_bounds = array<i64: 32, 128>}]} {
    %c0 = arith.constant 0 : index
    %c0_0 = arith.constant 0 : index
    %0 = vector.load %arg2[%c0, %c0_0] : memref<32x192xbf16, #tpu.memory_space<vmem>>, vector<32x192xbf16>
    %c0_1 = arith.constant 0 : index
    %c0_2 = arith.constant 0 : index
    %1 = vector.load %arg3[%c0_1, %c0_2] : memref<192x128xbf16, #tpu.memory_space<vmem>>, vector<192x128xbf16>
    %cst = arith.constant dense<0.000000e+00> : vector<32x128xf32>
    %2 = tpu.matmul %0, %1, %cst {dimension_numbers = #tpu.dot_dimension_numbers<[1], [0], [0], [1], [0, 0, 1, 1], [], []>} : vector<32x192xbf16>, vector<192x128xbf16>, vector<32x128xf32> -> vector<32x128xf32>
    %c0_3 = arith.constant 0 : index
    %c0_4 = arith.constant 0 : index
    %3 = vector.load %arg4[%c0_3, %c0_4] : memref<2x128xf32, #tpu.memory_space<vmem>>, vector<2x128xf32>
    %c0_5 = arith.constant 0 : index
    %c0_6 = arith.constant 0 : index
    %4 = vector.load %arg5[%c0_5, %c0_6] : memref<32x128xbf16, #tpu.memory_space<vmem>>, vector<32x128xbf16>
    %5 = vector.extract_strided_slice %3 {offsets = [0, 0], sizes = [1, 128], strides = [1, 1]} : vector<2x128xf32> to vector<1x128xf32>
    %6 = vector.broadcast %5 : vector<1x128xf32> to vector<32x128xf32>
    %7 = arith.mulf %2, %6 : vector<32x128xf32>
    %8 = vector.extract_strided_slice %3 {offsets = [1, 0], sizes = [1, 128], strides = [1, 1]} : vector<2x128xf32> to vector<1x128xf32>
    %9 = vector.broadcast %8 : vector<1x128xf32> to vector<32x128xf32>
    %10 = arith.addf %7, %9 : vector<32x128xf32>
    %11 = arith.extf %4 : vector<32x128xbf16> to vector<32x128xf32>
    %12 = arith.addf %10, %11 : vector<32x128xf32>
    %cst_7 = arith.constant 0.000000e+00 : f32
    %13 = vector.broadcast %cst_7 : f32 to vector<32x128xf32>
    %14 = arith.maximumf %12, %13 : vector<32x128xf32>
    %15 = arith.truncf %14 : vector<32x128xf32> to vector<32x128xbf16>
    %c0_8 = arith.constant 0 : index
    %c0_9 = arith.constant 0 : index
    %16 = vector.load %arg6[%c0_8, %c0_9] : memref<32x128xbf16, #tpu.memory_space<vmem>>, vector<32x128xbf16>
    tpu.vector_store %arg6[%c0_8, %c0_9], %15 {strides = array<i32>} : memref<32x128xbf16, #tpu.memory_space<vmem>>, vector<32x128xbf16>,
    return
  }
  func.func @transform_0(%arg0: i32, %arg1: i32) -> (i32, i32) {
    %c0_i32 = arith.constant 0 : i32
    %c0_i32_0 = arith.constant 0 : i32
    return %arg0, %c0_i32 : i32, i32
  }
  func.func @transform_1(%arg0: i32, %arg1: i32) -> (i32, i32) {
    %c0_i32 = arith.constant 0 : i32
    %c0_i32_0 = arith.constant 0 : i32
    return %c0_i32, %arg1 : i32, i32
  }
  func.func @transform_2(%arg0: i32, %arg1: i32) -> (i32, i32) {
    %c0_i32 = arith.constant 0 : i32
    %c0_i32_0 = arith.constant 0 : i32
    return %c0_i32, %arg1 : i32, i32
  }
  func.func @transform_3(%arg0: i32, %arg1: i32) -> (i32, i32) {
    %c0_i32 = arith.constant 0 : i32
    return %arg0, %arg1 : i32, i32
  }
  func.func @transform_4(%arg0: i32, %arg1: i32) -> (i32, i32) {
    %c0_i32 = arith.constant 0 : i32
    return %arg0, %arg1 : i32, i32
  }
}

module attributes {stable_mosaic.version = 11 : i64} {
  func.func @kernel(%arg0: i32, %arg1: i32, %arg2: memref<16x576xbf16, #tpu.memory_space<vmem>>, %arg3: memref<576x128xbf16, #tpu.memory_space<vmem>>, %arg4: memref<2x128xf32, #tpu.memory_space<vmem>>, %arg5: memref<16x128xbf16, #tpu.memory_space<vmem>>) attributes {dimension_semantics = [#tpu.dimension_semantics<parallel>, #tpu.dimension_semantics<parallel>], iteration_bounds = array<i64: 1, 1>, scalar_prefetch = 0 : i64, scratch_operands = 0 : i64, tpu.core_type = #tpu.core_type<tc>, window_params = [{transform_indices = @transform_0, window_bounds = array<i64: 16, 576>}, {transform_indices = @transform_1, window_bounds = array<i64: 576, 128>}, {transform_indices = @transform_2, window_bounds = array<i64: 2, 128>}, {transform_indices = @transform_3, window_bounds = array<i64: 16, 128>}]} {
    %c0 = arith.constant 0 : index
    %c0_0 = arith.constant 0 : index
    %0 = vector.load %arg2[%c0, %c0_0] : memref<16x576xbf16, #tpu.memory_space<vmem>>, vector<16x576xbf16>
    %c0_1 = arith.constant 0 : index
    %c0_2 = arith.constant 0 : index
    %1 = vector.load %arg3[%c0_1, %c0_2] : memref<576x128xbf16, #tpu.memory_space<vmem>>, vector<576x128xbf16>
    %cst = arith.constant dense<0.000000e+00> : vector<16x128xf32>
    %2 = tpu.matmul %0, %1, %cst {dimension_numbers = #tpu.dot_dimension_numbers<[1], [0], [0], [1], [0, 0, 1, 1], [], []>} : vector<16x576xbf16>, vector<576x128xbf16>, vector<16x128xf32> -> vector<16x128xf32>
    %c0_3 = arith.constant 0 : index
    %c0_4 = arith.constant 0 : index
    %3 = vector.load %arg4[%c0_3, %c0_4] : memref<2x128xf32, #tpu.memory_space<vmem>>, vector<2x128xf32>
    %4 = vector.extract_strided_slice %3 {offsets = [0, 0], sizes = [1, 128], strides = [1, 1]} : vector<2x128xf32> to vector<1x128xf32>
    %5 = vector.broadcast %4 : vector<1x128xf32> to vector<16x128xf32>
    %6 = arith.mulf %2, %5 : vector<16x128xf32>
    %7 = vector.extract_strided_slice %3 {offsets = [1, 0], sizes = [1, 128], strides = [1, 1]} : vector<2x128xf32> to vector<1x128xf32>
    %8 = vector.broadcast %7 : vector<1x128xf32> to vector<16x128xf32>
    %9 = arith.addf %6, %8 : vector<16x128xf32>
    %cst_5 = arith.constant 0.000000e+00 : f32
    %10 = vector.broadcast %cst_5 : f32 to vector<16x128xf32>
    %11 = arith.maximumf %9, %10 : vector<16x128xf32>
    %12 = arith.truncf %11 : vector<16x128xf32> to vector<16x128xbf16>
    %c0_6 = arith.constant 0 : index
    %c0_7 = arith.constant 0 : index
    %13 = vector.load %arg5[%c0_6, %c0_7] : memref<16x128xbf16, #tpu.memory_space<vmem>>, vector<16x128xbf16>
    tpu.vector_store %arg5[%c0_6, %c0_7], %12 {strides = array<i32>} : memref<16x128xbf16, #tpu.memory_space<vmem>>, vector<16x128xbf16>,
    return
  }
  func.func @transform_0(%arg0: i32, %arg1: i32) -> (i32, i32) {
    %c0_i32 = arith.constant 0 : i32
    %c0_i32_0 = arith.constant 0 : i32
    return %arg0, %c0_i32 : i32, i32
  }
  func.func @transform_1(%arg0: i32, %arg1: i32) -> (i32, i32) {
    %c0_i32 = arith.constant 0 : i32
    %c0_i32_0 = arith.constant 0 : i32
    return %c0_i32, %arg1 : i32, i32
  }
  func.func @transform_2(%arg0: i32, %arg1: i32) -> (i32, i32) {
    %c0_i32 = arith.constant 0 : i32
    %c0_i32_0 = arith.constant 0 : i32
    return %c0_i32, %arg1 : i32, i32
  }
  func.func @transform_3(%arg0: i32, %arg1: i32) -> (i32, i32) {
    %c0_i32 = arith.constant 0 : i32
    return %arg0, %arg1 : i32, i32
  }
}

module attributes {stable_mosaic.version = 11 : i64} {
  func.func @kernel(%arg0: i32, %arg1: i32, %arg2: memref<16x384xbf16, #tpu.memory_space<vmem>>, %arg3: memref<384x128xbf16, #tpu.memory_space<vmem>>, %arg4: memref<2x128xf32, #tpu.memory_space<vmem>>, %arg5: memref<16x128xbf16, #tpu.memory_space<vmem>>) attributes {dimension_semantics = [#tpu.dimension_semantics<parallel>, #tpu.dimension_semantics<parallel>], iteration_bounds = array<i64: 1, 1>, scalar_prefetch = 0 : i64, scratch_operands = 0 : i64, tpu.core_type = #tpu.core_type<tc>, window_params = [{transform_indices = @transform_0, window_bounds = array<i64: 16, 384>}, {transform_indices = @transform_1, window_bounds = array<i64: 384, 128>}, {transform_indices = @transform_2, window_bounds = array<i64: 2, 128>}, {transform_indices = @transform_3, window_bounds = array<i64: 16, 128>}]} {
    %c0 = arith.constant 0 : index
    %c0_0 = arith.constant 0 : index
    %0 = vector.load %arg2[%c0, %c0_0] : memref<16x384xbf16, #tpu.memory_space<vmem>>, vector<16x384xbf16>
    %c0_1 = arith.constant 0 : index
    %c0_2 = arith.constant 0 : index
    %1 = vector.load %arg3[%c0_1, %c0_2] : memref<384x128xbf16, #tpu.memory_space<vmem>>, vector<384x128xbf16>
    %cst = arith.constant dense<0.000000e+00> : vector<16x128xf32>
    %2 = tpu.matmul %0, %1, %cst {dimension_numbers = #tpu.dot_dimension_numbers<[1], [0], [0], [1], [0, 0, 1, 1], [], []>} : vector<16x384xbf16>, vector<384x128xbf16>, vector<16x128xf32> -> vector<16x128xf32>
    %c0_3 = arith.constant 0 : index
    %c0_4 = arith.constant 0 : index
    %3 = vector.load %arg4[%c0_3, %c0_4] : memref<2x128xf32, #tpu.memory_space<vmem>>, vector<2x128xf32>
    %4 = vector.extract_strided_slice %3 {offsets = [0, 0], sizes = [1, 128], strides = [1, 1]} : vector<2x128xf32> to vector<1x128xf32>
    %5 = vector.broadcast %4 : vector<1x128xf32> to vector<16x128xf32>
    %6 = arith.mulf %2, %5 : vector<16x128xf32>
    %7 = vector.extract_strided_slice %3 {offsets = [1, 0], sizes = [1, 128], strides = [1, 1]} : vector<2x128xf32> to vector<1x128xf32>
    %8 = vector.broadcast %7 : vector<1x128xf32> to vector<16x128xf32>
    %9 = arith.addf %6, %8 : vector<16x128xf32>
    %cst_5 = arith.constant 0.000000e+00 : f32
    %10 = vector.broadcast %cst_5 : f32 to vector<16x128xf32>
    %11 = arith.maximumf %9, %10 : vector<16x128xf32>
    %12 = arith.truncf %11 : vector<16x128xf32> to vector<16x128xbf16>
    %c0_6 = arith.constant 0 : index
    %c0_7 = arith.constant 0 : index
    %13 = vector.load %arg5[%c0_6, %c0_7] : memref<16x128xbf16, #tpu.memory_space<vmem>>, vector<16x128xbf16>
    tpu.vector_store %arg5[%c0_6, %c0_7], %12 {strides = array<i32>} : memref<16x128xbf16, #tpu.memory_space<vmem>>, vector<16x128xbf16>,
    return
  }
  func.func @transform_0(%arg0: i32, %arg1: i32) -> (i32, i32) {
    %c0_i32 = arith.constant 0 : i32
    %c0_i32_0 = arith.constant 0 : i32
    return %arg0, %c0_i32 : i32, i32
  }
  func.func @transform_1(%arg0: i32, %arg1: i32) -> (i32, i32) {
    %c0_i32 = arith.constant 0 : i32
    %c0_i32_0 = arith.constant 0 : i32
    return %c0_i32, %arg1 : i32, i32
  }
  func.func @transform_2(%arg0: i32, %arg1: i32) -> (i32, i32) {
    %c0_i32 = arith.constant 0 : i32
    %c0_i32_0 = arith.constant 0 : i32
    return %c0_i32, %arg1 : i32, i32
  }
  func.func @transform_3(%arg0: i32, %arg1: i32) -> (i32, i32) {
    %c0_i32 = arith.constant 0 : i32
    return %arg0, %arg1 : i32, i32
  }
}

module attributes {stable_mosaic.version = 11 : i64} {
  func.func @kernel(%arg0: i32, %arg1: i32, %arg2: memref<16x384xbf16, #tpu.memory_space<vmem>>, %arg3: memref<384x128xbf16, #tpu.memory_space<vmem>>, %arg4: memref<2x128xf32, #tpu.memory_space<vmem>>, %arg5: memref<16x128xbf16, #tpu.memory_space<vmem>>, %arg6: memref<16x128xbf16, #tpu.memory_space<vmem>>) attributes {dimension_semantics = [#tpu.dimension_semantics<parallel>, #tpu.dimension_semantics<parallel>], iteration_bounds = array<i64: 1, 1>, scalar_prefetch = 0 : i64, scratch_operands = 0 : i64, tpu.core_type = #tpu.core_type<tc>, window_params = [{transform_indices = @transform_0, window_bounds = array<i64: 16, 384>}, {transform_indices = @transform_1, window_bounds = array<i64: 384, 128>}, {transform_indices = @transform_2, window_bounds = array<i64: 2, 128>}, {transform_indices = @transform_3, window_bounds = array<i64: 16, 128>}, {transform_indices = @transform_4, window_bounds = array<i64: 16, 128>}]} {
    %c0 = arith.constant 0 : index
    %c0_0 = arith.constant 0 : index
    %0 = vector.load %arg2[%c0, %c0_0] : memref<16x384xbf16, #tpu.memory_space<vmem>>, vector<16x384xbf16>
    %c0_1 = arith.constant 0 : index
    %c0_2 = arith.constant 0 : index
    %1 = vector.load %arg3[%c0_1, %c0_2] : memref<384x128xbf16, #tpu.memory_space<vmem>>, vector<384x128xbf16>
    %cst = arith.constant dense<0.000000e+00> : vector<16x128xf32>
    %2 = tpu.matmul %0, %1, %cst {dimension_numbers = #tpu.dot_dimension_numbers<[1], [0], [0], [1], [0, 0, 1, 1], [], []>} : vector<16x384xbf16>, vector<384x128xbf16>, vector<16x128xf32> -> vector<16x128xf32>
    %c0_3 = arith.constant 0 : index
    %c0_4 = arith.constant 0 : index
    %3 = vector.load %arg4[%c0_3, %c0_4] : memref<2x128xf32, #tpu.memory_space<vmem>>, vector<2x128xf32>
    %c0_5 = arith.constant 0 : index
    %c0_6 = arith.constant 0 : index
    %4 = vector.load %arg5[%c0_5, %c0_6] : memref<16x128xbf16, #tpu.memory_space<vmem>>, vector<16x128xbf16>
    %5 = vector.extract_strided_slice %3 {offsets = [0, 0], sizes = [1, 128], strides = [1, 1]} : vector<2x128xf32> to vector<1x128xf32>
    %6 = vector.broadcast %5 : vector<1x128xf32> to vector<16x128xf32>
    %7 = arith.mulf %2, %6 : vector<16x128xf32>
    %8 = vector.extract_strided_slice %3 {offsets = [1, 0], sizes = [1, 128], strides = [1, 1]} : vector<2x128xf32> to vector<1x128xf32>
    %9 = vector.broadcast %8 : vector<1x128xf32> to vector<16x128xf32>
    %10 = arith.addf %7, %9 : vector<16x128xf32>
    %11 = arith.extf %4 : vector<16x128xbf16> to vector<16x128xf32>
    %12 = arith.addf %10, %11 : vector<16x128xf32>
    %cst_7 = arith.constant 0.000000e+00 : f32
    %13 = vector.broadcast %cst_7 : f32 to vector<16x128xf32>
    %14 = arith.maximumf %12, %13 : vector<16x128xf32>
    %15 = arith.truncf %14 : vector<16x128xf32> to vector<16x128xbf16>
    %c0_8 = arith.constant 0 : index
    %c0_9 = arith.constant 0 : index
    %16 = vector.load %arg6[%c0_8, %c0_9] : memref<16x128xbf16, #tpu.memory_space<vmem>>, vector<16x128xbf16>
    tpu.vector_store %arg6[%c0_8, %c0_9], %15 {strides = array<i32>} : memref<16x128xbf16, #tpu.memory_space<vmem>>, vector<16x128xbf16>,
    return
  }
  func.func @transform_0(%arg0: i32, %arg1: i32) -> (i32, i32) {
    %c0_i32 = arith.constant 0 : i32
    %c0_i32_0 = arith.constant 0 : i32
    return %arg0, %c0_i32 : i32, i32
  }
  func.func @transform_1(%arg0: i32, %arg1: i32) -> (i32, i32) {
    %c0_i32 = arith.constant 0 : i32
    %c0_i32_0 = arith.constant 0 : i32
    return %c0_i32, %arg1 : i32, i32
  }
  func.func @transform_2(%arg0: i32, %arg1: i32) -> (i32, i32) {
    %c0_i32 = arith.constant 0 : i32
    %c0_i32_0 = arith.constant 0 : i32
    return %c0_i32, %arg1 : i32, i32
  }
  func.func @transform_3(%arg0: i32, %arg1: i32) -> (i32, i32) {
    %c0_i32 = arith.constant 0 : i32
    return %arg0, %arg1 : i32, i32
  }
  func.func @transform_4(%arg0: i32, %arg1: i32) -> (i32, i32) {
    %c0_i32 = arith.constant 0 : i32
    return %arg0, %arg1 : i32, i32
  }
}

module attributes {stable_mosaic.version = 11 : i64} {
  func.func @kernel(%arg0: i32, %arg1: i32, %arg2: memref<16x512xbf16, #tpu.memory_space<vmem>>, %arg3: memref<512x256xbf16, #tpu.memory_space<vmem>>, %arg4: memref<2x256xf32, #tpu.memory_space<vmem>>, %arg5: memref<16x256xbf16, #tpu.memory_space<vmem>>) attributes {dimension_semantics = [#tpu.dimension_semantics<parallel>, #tpu.dimension_semantics<parallel>], iteration_bounds = array<i64: 1, 1>, scalar_prefetch = 0 : i64, scratch_operands = 0 : i64, tpu.core_type = #tpu.core_type<tc>, window_params = [{transform_indices = @transform_0, window_bounds = array<i64: 16, 512>}, {transform_indices = @transform_1, window_bounds = array<i64: 512, 256>}, {transform_indices = @transform_2, window_bounds = array<i64: 2, 256>}, {transform_indices = @transform_3, window_bounds = array<i64: 16, 256>}]} {
    %c0 = arith.constant 0 : index
    %c0_0 = arith.constant 0 : index
    %0 = vector.load %arg2[%c0, %c0_0] : memref<16x512xbf16, #tpu.memory_space<vmem>>, vector<16x512xbf16>
    %c0_1 = arith.constant 0 : index
    %c0_2 = arith.constant 0 : index
    %1 = vector.load %arg3[%c0_1, %c0_2] : memref<512x256xbf16, #tpu.memory_space<vmem>>, vector<512x256xbf16>
    %cst = arith.constant dense<0.000000e+00> : vector<16x256xf32>
    %2 = tpu.matmul %0, %1, %cst {dimension_numbers = #tpu.dot_dimension_numbers<[1], [0], [0], [1], [0, 0, 1, 1], [], []>} : vector<16x512xbf16>, vector<512x256xbf16>, vector<16x256xf32> -> vector<16x256xf32>
    %c0_3 = arith.constant 0 : index
    %c0_4 = arith.constant 0 : index
    %3 = vector.load %arg4[%c0_3, %c0_4] : memref<2x256xf32, #tpu.memory_space<vmem>>, vector<2x256xf32>
    %4 = vector.extract_strided_slice %3 {offsets = [0, 0], sizes = [1, 256], strides = [1, 1]} : vector<2x256xf32> to vector<1x256xf32>
    %5 = vector.broadcast %4 : vector<1x256xf32> to vector<16x256xf32>
    %6 = arith.mulf %2, %5 : vector<16x256xf32>
    %7 = vector.extract_strided_slice %3 {offsets = [1, 0], sizes = [1, 256], strides = [1, 1]} : vector<2x256xf32> to vector<1x256xf32>
    %8 = vector.broadcast %7 : vector<1x256xf32> to vector<16x256xf32>
    %9 = arith.addf %6, %8 : vector<16x256xf32>
    %cst_5 = arith.constant 0.000000e+00 : f32
    %10 = vector.broadcast %cst_5 : f32 to vector<16x256xf32>
    %11 = arith.maximumf %9, %10 : vector<16x256xf32>
    %12 = arith.truncf %11 : vector<16x256xf32> to vector<16x256xbf16>
    %c0_6 = arith.constant 0 : index
    %c0_7 = arith.constant 0 : index
    %13 = vector.load %arg5[%c0_6, %c0_7] : memref<16x256xbf16, #tpu.memory_space<vmem>>, vector<16x256xbf16>
    tpu.vector_store %arg5[%c0_6, %c0_7], %12 {strides = array<i32>} : memref<16x256xbf16, #tpu.memory_space<vmem>>, vector<16x256xbf16>,
    return
  }
  func.func @transform_0(%arg0: i32, %arg1: i32) -> (i32, i32) {
    %c0_i32 = arith.constant 0 : i32
    %c0_i32_0 = arith.constant 0 : i32
    return %arg0, %c0_i32 : i32, i32
  }
  func.func @transform_1(%arg0: i32, %arg1: i32) -> (i32, i32) {
    %c0_i32 = arith.constant 0 : i32
    %c0_i32_0 = arith.constant 0 : i32
    return %c0_i32, %arg1 : i32, i32
  }
  func.func @transform_2(%arg0: i32, %arg1: i32) -> (i32, i32) {
    %c0_i32 = arith.constant 0 : i32
    %c0_i32_0 = arith.constant 0 : i32
    return %c0_i32, %arg1 : i32, i32
  }
  func.func @transform_3(%arg0: i32, %arg1: i32) -> (i32, i32) {
    %c0_i32 = arith.constant 0 : i32
    return %arg0, %arg1 : i32, i32
  }
}

module attributes {stable_mosaic.version = 11 : i64} {
  func.func @kernel(%arg0: i32, %arg1: i32, %arg2: memref<32x256xbf16, #tpu.memory_space<vmem>>, %arg3: memref<256x128xbf16, #tpu.memory_space<vmem>>, %arg4: memref<2x128xf32, #tpu.memory_space<vmem>>, %arg5: memref<32x128xbf16, #tpu.memory_space<vmem>>) attributes {dimension_semantics = [#tpu.dimension_semantics<parallel>, #tpu.dimension_semantics<parallel>], iteration_bounds = array<i64: 1, 1>, scalar_prefetch = 0 : i64, scratch_operands = 0 : i64, tpu.core_type = #tpu.core_type<tc>, window_params = [{transform_indices = @transform_0, window_bounds = array<i64: 32, 256>}, {transform_indices = @transform_1, window_bounds = array<i64: 256, 128>}, {transform_indices = @transform_2, window_bounds = array<i64: 2, 128>}, {transform_indices = @transform_3, window_bounds = array<i64: 32, 128>}]} {
    %c0 = arith.constant 0 : index
    %c0_0 = arith.constant 0 : index
    %0 = vector.load %arg2[%c0, %c0_0] : memref<32x256xbf16, #tpu.memory_space<vmem>>, vector<32x256xbf16>
    %c0_1 = arith.constant 0 : index
    %c0_2 = arith.constant 0 : index
    %1 = vector.load %arg3[%c0_1, %c0_2] : memref<256x128xbf16, #tpu.memory_space<vmem>>, vector<256x128xbf16>
    %cst = arith.constant dense<0.000000e+00> : vector<32x128xf32>
    %2 = tpu.matmul %0, %1, %cst {dimension_numbers = #tpu.dot_dimension_numbers<[1], [0], [0], [1], [0, 0, 1, 1], [], []>} : vector<32x256xbf16>, vector<256x128xbf16>, vector<32x128xf32> -> vector<32x128xf32>
    %c0_3 = arith.constant 0 : index
    %c0_4 = arith.constant 0 : index
    %3 = vector.load %arg4[%c0_3, %c0_4] : memref<2x128xf32, #tpu.memory_space<vmem>>, vector<2x128xf32>
    %4 = vector.extract_strided_slice %3 {offsets = [0, 0], sizes = [1, 128], strides = [1, 1]} : vector<2x128xf32> to vector<1x128xf32>
    %5 = vector.broadcast %4 : vector<1x128xf32> to vector<32x128xf32>
    %6 = arith.mulf %2, %5 : vector<32x128xf32>
    %7 = vector.extract_strided_slice %3 {offsets = [1, 0], sizes = [1, 128], strides = [1, 1]} : vector<2x128xf32> to vector<1x128xf32>
    %8 = vector.broadcast %7 : vector<1x128xf32> to vector<32x128xf32>
    %9 = arith.addf %6, %8 : vector<32x128xf32>
    %cst_5 = arith.constant 0.000000e+00 : f32
    %10 = vector.broadcast %cst_5 : f32 to vector<32x128xf32>
    %11 = arith.maximumf %9, %10 : vector<32x128xf32>
    %12 = arith.truncf %11 : vector<32x128xf32> to vector<32x128xbf16>
    %c0_6 = arith.constant 0 : index
    %c0_7 = arith.constant 0 : index
    %13 = vector.load %arg5[%c0_6, %c0_7] : memref<32x128xbf16, #tpu.memory_space<vmem>>, vector<32x128xbf16>
    tpu.vector_store %arg5[%c0_6, %c0_7], %12 {strides = array<i32>} : memref<32x128xbf16, #tpu.memory_space<vmem>>, vector<32x128xbf16>,
    return
  }
  func.func @transform_0(%arg0: i32, %arg1: i32) -> (i32, i32) {
    %c0_i32 = arith.constant 0 : i32
    %c0_i32_0 = arith.constant 0 : i32
    return %arg0, %c0_i32 : i32, i32
  }
  func.func @transform_1(%arg0: i32, %arg1: i32) -> (i32, i32) {
    %c0_i32 = arith.constant 0 : i32
    %c0_i32_0 = arith.constant 0 : i32
    return %c0_i32, %arg1 : i32, i32
  }
  func.func @transform_2(%arg0: i32, %arg1: i32) -> (i32, i32) {
    %c0_i32 = arith.constant 0 : i32
    %c0_i32_0 = arith.constant 0 : i32
    return %c0_i32, %arg1 : i32, i32
  }
  func.func @transform_3(%arg0: i32, %arg1: i32) -> (i32, i32) {
    %c0_i32 = arith.constant 0 : i32
    return %arg0, %arg1 : i32, i32
  }
}

module attributes {stable_mosaic.version = 11 : i64} {
  func.func @kernel(%arg0: i32, %arg1: i32, %arg2: memref<128x48xbf16, #tpu.memory_space<vmem>>, %arg3: memref<48x128xbf16, #tpu.memory_space<vmem>>, %arg4: memref<2x128xf32, #tpu.memory_space<vmem>>, %arg5: memref<128x128xbf16, #tpu.memory_space<vmem>>) attributes {dimension_semantics = [#tpu.dimension_semantics<parallel>, #tpu.dimension_semantics<parallel>], iteration_bounds = array<i64: 1, 1>, scalar_prefetch = 0 : i64, scratch_operands = 0 : i64, tpu.core_type = #tpu.core_type<tc>, window_params = [{transform_indices = @transform_0, window_bounds = array<i64: 128, 48>}, {transform_indices = @transform_1, window_bounds = array<i64: 48, 128>}, {transform_indices = @transform_2, window_bounds = array<i64: 2, 128>}, {transform_indices = @transform_3, window_bounds = array<i64: 128, 128>}]} {
    %c0 = arith.constant 0 : index
    %c0_0 = arith.constant 0 : index
    %0 = vector.load %arg2[%c0, %c0_0] : memref<128x48xbf16, #tpu.memory_space<vmem>>, vector<128x48xbf16>
    %c0_1 = arith.constant 0 : index
    %c0_2 = arith.constant 0 : index
    %1 = vector.load %arg3[%c0_1, %c0_2] : memref<48x128xbf16, #tpu.memory_space<vmem>>, vector<48x128xbf16>
    %cst = arith.constant dense<0.000000e+00> : vector<128x128xf32>
    %2 = tpu.matmul %0, %1, %cst {dimension_numbers = #tpu.dot_dimension_numbers<[1], [0], [0], [1], [0, 0, 1, 1], [], []>} : vector<128x48xbf16>, vector<48x128xbf16>, vector<128x128xf32> -> vector<128x128xf32>
    %c0_3 = arith.constant 0 : index
    %c0_4 = arith.constant 0 : index
    %3 = vector.load %arg4[%c0_3, %c0_4] : memref<2x128xf32, #tpu.memory_space<vmem>>, vector<2x128xf32>
    %4 = vector.extract_strided_slice %3 {offsets = [0, 0], sizes = [1, 128], strides = [1, 1]} : vector<2x128xf32> to vector<1x128xf32>
    %5 = vector.broadcast %4 : vector<1x128xf32> to vector<128x128xf32>
    %6 = arith.mulf %2, %5 : vector<128x128xf32>
    %7 = vector.extract_strided_slice %3 {offsets = [1, 0], sizes = [1, 128], strides = [1, 1]} : vector<2x128xf32> to vector<1x128xf32>
    %8 = vector.broadcast %7 : vector<1x128xf32> to vector<128x128xf32>
    %9 = arith.addf %6, %8 : vector<128x128xf32>
    %cst_5 = arith.constant 0.000000e+00 : f32
    %10 = vector.broadcast %cst_5 : f32 to vector<128x128xf32>
    %11 = arith.maximumf %9, %10 : vector<128x128xf32>
    %12 = arith.truncf %11 : vector<128x128xf32> to vector<128x128xbf16>
    %c0_6 = arith.constant 0 : index
    %c0_7 = arith.constant 0 : index
    %13 = vector.load %arg5[%c0_6, %c0_7] : memref<128x128xbf16, #tpu.memory_space<vmem>>, vector<128x128xbf16>
    tpu.vector_store %arg5[%c0_6, %c0_7], %12 {strides = array<i32>} : memref<128x128xbf16, #tpu.memory_space<vmem>>, vector<128x128xbf16>,
    return
  }
  func.func @transform_0(%arg0: i32, %arg1: i32) -> (i32, i32) {
    %c0_i32 = arith.constant 0 : i32
    %c0_i32_0 = arith.constant 0 : i32
    return %arg0, %c0_i32 : i32, i32
  }
  func.func @transform_1(%arg0: i32, %arg1: i32) -> (i32, i32) {
    %c0_i32 = arith.constant 0 : i32
    %c0_i32_0 = arith.constant 0 : i32
    return %c0_i32, %arg1 : i32, i32
  }
  func.func @transform_2(%arg0: i32, %arg1: i32) -> (i32, i32) {
    %c0_i32 = arith.constant 0 : i32
    %c0_i32_0 = arith.constant 0 : i32
    return %c0_i32, %arg1 : i32, i32
  }
  func.func @transform_3(%arg0: i32, %arg1: i32) -> (i32, i32) {
    %c0_i32 = arith.constant 0 : i32
    return %arg0, %arg1 : i32, i32
  }
}

module attributes {stable_mosaic.version = 11 : i64} {
  func.func @kernel(%arg0: i32, %arg1: i32, %arg2: memref<128x48xbf16, #tpu.memory_space<vmem>>, %arg3: memref<48x128xbf16, #tpu.memory_space<vmem>>, %arg4: memref<2x128xf32, #tpu.memory_space<vmem>>, %arg5: memref<128x128xbf16, #tpu.memory_space<vmem>>, %arg6: memref<128x128xbf16, #tpu.memory_space<vmem>>) attributes {dimension_semantics = [#tpu.dimension_semantics<parallel>, #tpu.dimension_semantics<parallel>], iteration_bounds = array<i64: 1, 1>, scalar_prefetch = 0 : i64, scratch_operands = 0 : i64, tpu.core_type = #tpu.core_type<tc>, window_params = [{transform_indices = @transform_0, window_bounds = array<i64: 128, 48>}, {transform_indices = @transform_1, window_bounds = array<i64: 48, 128>}, {transform_indices = @transform_2, window_bounds = array<i64: 2, 128>}, {transform_indices = @transform_3, window_bounds = array<i64: 128, 128>}, {transform_indices = @transform_4, window_bounds = array<i64: 128, 128>}]} {
    %c0 = arith.constant 0 : index
    %c0_0 = arith.constant 0 : index
    %0 = vector.load %arg2[%c0, %c0_0] : memref<128x48xbf16, #tpu.memory_space<vmem>>, vector<128x48xbf16>
    %c0_1 = arith.constant 0 : index
    %c0_2 = arith.constant 0 : index
    %1 = vector.load %arg3[%c0_1, %c0_2] : memref<48x128xbf16, #tpu.memory_space<vmem>>, vector<48x128xbf16>
    %cst = arith.constant dense<0.000000e+00> : vector<128x128xf32>
    %2 = tpu.matmul %0, %1, %cst {dimension_numbers = #tpu.dot_dimension_numbers<[1], [0], [0], [1], [0, 0, 1, 1], [], []>} : vector<128x48xbf16>, vector<48x128xbf16>, vector<128x128xf32> -> vector<128x128xf32>
    %c0_3 = arith.constant 0 : index
    %c0_4 = arith.constant 0 : index
    %3 = vector.load %arg4[%c0_3, %c0_4] : memref<2x128xf32, #tpu.memory_space<vmem>>, vector<2x128xf32>
    %c0_5 = arith.constant 0 : index
    %c0_6 = arith.constant 0 : index
    %4 = vector.load %arg5[%c0_5, %c0_6] : memref<128x128xbf16, #tpu.memory_space<vmem>>, vector<128x128xbf16>
    %5 = vector.extract_strided_slice %3 {offsets = [0, 0], sizes = [1, 128], strides = [1, 1]} : vector<2x128xf32> to vector<1x128xf32>
    %6 = vector.broadcast %5 : vector<1x128xf32> to vector<128x128xf32>
    %7 = arith.mulf %2, %6 : vector<128x128xf32>
    %8 = vector.extract_strided_slice %3 {offsets = [1, 0], sizes = [1, 128], strides = [1, 1]} : vector<2x128xf32> to vector<1x128xf32>
    %9 = vector.broadcast %8 : vector<1x128xf32> to vector<128x128xf32>
    %10 = arith.addf %7, %9 : vector<128x128xf32>
    %11 = arith.extf %4 : vector<128x128xbf16> to vector<128x128xf32>
    %12 = arith.addf %10, %11 : vector<128x128xf32>
    %cst_7 = arith.constant 0.000000e+00 : f32
    %13 = vector.broadcast %cst_7 : f32 to vector<128x128xf32>
    %14 = arith.maximumf %12, %13 : vector<128x128xf32>
    %15 = arith.truncf %14 : vector<128x128xf32> to vector<128x128xbf16>
    %c0_8 = arith.constant 0 : index
    %c0_9 = arith.constant 0 : index
    %16 = vector.load %arg6[%c0_8, %c0_9] : memref<128x128xbf16, #tpu.memory_space<vmem>>, vector<128x128xbf16>
    tpu.vector_store %arg6[%c0_8, %c0_9], %15 {strides = array<i32>} : memref<128x128xbf16, #tpu.memory_space<vmem>>, vector<128x128xbf16>,
    return
  }
  func.func @transform_0(%arg0: i32, %arg1: i32) -> (i32, i32) {
    %c0_i32 = arith.constant 0 : i32
    %c0_i32_0 = arith.constant 0 : i32
    return %arg0, %c0_i32 : i32, i32
  }
  func.func @transform_1(%arg0: i32, %arg1: i32) -> (i32, i32) {
    %c0_i32 = arith.constant 0 : i32
    %c0_i32_0 = arith.constant 0 : i32
    return %c0_i32, %arg1 : i32, i32
  }
  func.func @transform_2(%arg0: i32, %arg1: i32) -> (i32, i32) {
    %c0_i32 = arith.constant 0 : i32
    %c0_i32_0 = arith.constant 0 : i32
    return %c0_i32, %arg1 : i32, i32
  }
  func.func @transform_3(%arg0: i32, %arg1: i32) -> (i32, i32) {
    %c0_i32 = arith.constant 0 : i32
    return %arg0, %arg1 : i32, i32
  }
  func.func @transform_4(%arg0: i32, %arg1: i32) -> (i32, i32) {
    %c0_i32 = arith.constant 0 : i32
    return %arg0, %arg1 : i32, i32
  }
}

module attributes {stable_mosaic.version = 11 : i64} {
  func.func @kernel(%arg0: i32, %arg1: i32, %arg2: memref<128x16xbf16, #tpu.memory_space<vmem>>, %arg3: memref<16x128xbf16, #tpu.memory_space<vmem>>, %arg4: memref<2x128xf32, #tpu.memory_space<vmem>>, %arg5: memref<128x128xf32, #tpu.memory_space<vmem>>) attributes {dimension_semantics = [#tpu.dimension_semantics<parallel>, #tpu.dimension_semantics<parallel>], iteration_bounds = array<i64: 1, 1>, scalar_prefetch = 0 : i64, scratch_operands = 0 : i64, tpu.core_type = #tpu.core_type<tc>, window_params = [{transform_indices = @transform_0, window_bounds = array<i64: 128, 16>}, {transform_indices = @transform_1, window_bounds = array<i64: 16, 128>}, {transform_indices = @transform_2, window_bounds = array<i64: 2, 128>}, {transform_indices = @transform_3, window_bounds = array<i64: 128, 128>}]} {
    %c0 = arith.constant 0 : index
    %c0_0 = arith.constant 0 : index
    %0 = vector.load %arg2[%c0, %c0_0] : memref<128x16xbf16, #tpu.memory_space<vmem>>, vector<128x16xbf16>
    %c0_1 = arith.constant 0 : index
    %c0_2 = arith.constant 0 : index
    %1 = vector.load %arg3[%c0_1, %c0_2] : memref<16x128xbf16, #tpu.memory_space<vmem>>, vector<16x128xbf16>
    %cst = arith.constant dense<0.000000e+00> : vector<128x128xf32>
    %2 = tpu.matmul %0, %1, %cst {dimension_numbers = #tpu.dot_dimension_numbers<[1], [0], [0], [1], [0, 0, 1, 1], [], []>} : vector<128x16xbf16>, vector<16x128xbf16>, vector<128x128xf32> -> vector<128x128xf32>
    %c0_3 = arith.constant 0 : index
    %c0_4 = arith.constant 0 : index
    %3 = vector.load %arg4[%c0_3, %c0_4] : memref<2x128xf32, #tpu.memory_space<vmem>>, vector<2x128xf32>
    %4 = vector.extract_strided_slice %3 {offsets = [0, 0], sizes = [1, 128], strides = [1, 1]} : vector<2x128xf32> to vector<1x128xf32>
    %5 = vector.broadcast %4 : vector<1x128xf32> to vector<128x128xf32>
    %6 = arith.mulf %2, %5 : vector<128x128xf32>
    %7 = vector.extract_strided_slice %3 {offsets = [1, 0], sizes = [1, 128], strides = [1, 1]} : vector<2x128xf32> to vector<1x128xf32>
    %8 = vector.broadcast %7 : vector<1x128xf32> to vector<128x128xf32>
    %9 = arith.addf %6, %8 : vector<128x128xf32>
    %c0_5 = arith.constant 0 : index
    %c0_6 = arith.constant 0 : index
    %10 = vector.load %arg5[%c0_5, %c0_6] : memref<128x128xf32, #tpu.memory_space<vmem>>, vector<128x128xf32>
    tpu.vector_store %arg5[%c0_5, %c0_6], %9 {strides = array<i32>} : memref<128x128xf32, #tpu.memory_space<vmem>>, vector<128x128xf32>,
    return
  }
  func.func @transform_0(%arg0: i32, %arg1: i32) -> (i32, i32) {
    %c0_i32 = arith.constant 0 : i32
    %c0_i32_0 = arith.constant 0 : i32
    return %arg0, %c0_i32 : i32, i32
  }
  func.func @transform_1(%arg0: i32, %arg1: i32) -> (i32, i32) {
    %c0_i32 = arith.constant 0 : i32
    %c0_i32_0 = arith.constant 0 : i32
    return %c0_i32, %arg1 : i32, i32
  }
  func.func @transform_2(%arg0: i32, %arg1: i32) -> (i32, i32) {
    %c0_i32 = arith.constant 0 : i32
    %c0_i32_0 = arith.constant 0 : i32
    return %c0_i32, %arg1 : i32, i32
  }
  func.func @transform_3(%arg0: i32, %arg1: i32) -> (i32, i32) {
    %c0_i32 = arith.constant 0 : i32
    return %arg0, %arg1 : i32, i32
  }
}

module attributes {stable_mosaic.version = 11 : i64} {
  func.func @kernel(%arg0: i32, %arg1: i32, %arg2: memref<16x128xbf16, #tpu.memory_space<vmem>>, %arg3: memref<128x256xbf16, #tpu.memory_space<vmem>>, %arg4: memref<2x256xf32, #tpu.memory_space<vmem>>, %arg5: memref<16x256xf32, #tpu.memory_space<vmem>>) attributes {dimension_semantics = [#tpu.dimension_semantics<parallel>, #tpu.dimension_semantics<parallel>], iteration_bounds = array<i64: 1, 1>, scalar_prefetch = 0 : i64, scratch_operands = 0 : i64, tpu.core_type = #tpu.core_type<tc>, window_params = [{transform_indices = @transform_0, window_bounds = array<i64: 16, 128>}, {transform_indices = @transform_1, window_bounds = array<i64: 128, 256>}, {transform_indices = @transform_2, window_bounds = array<i64: 2, 256>}, {transform_indices = @transform_3, window_bounds = array<i64: 16, 256>}]} {
    %c0 = arith.constant 0 : index
    %c0_0 = arith.constant 0 : index
    %0 = vector.load %arg2[%c0, %c0_0] : memref<16x128xbf16, #tpu.memory_space<vmem>>, vector<16x128xbf16>
    %c0_1 = arith.constant 0 : index
    %c0_2 = arith.constant 0 : index
    %1 = vector.load %arg3[%c0_1, %c0_2] : memref<128x256xbf16, #tpu.memory_space<vmem>>, vector<128x256xbf16>
    %cst = arith.constant dense<0.000000e+00> : vector<16x256xf32>
    %2 = tpu.matmul %0, %1, %cst {dimension_numbers = #tpu.dot_dimension_numbers<[1], [0], [0], [1], [0, 0, 1, 1], [], []>} : vector<16x128xbf16>, vector<128x256xbf16>, vector<16x256xf32> -> vector<16x256xf32>
    %c0_3 = arith.constant 0 : index
    %c0_4 = arith.constant 0 : index
    %3 = vector.load %arg4[%c0_3, %c0_4] : memref<2x256xf32, #tpu.memory_space<vmem>>, vector<2x256xf32>
    %4 = vector.extract_strided_slice %3 {offsets = [0, 0], sizes = [1, 256], strides = [1, 1]} : vector<2x256xf32> to vector<1x256xf32>
    %5 = vector.broadcast %4 : vector<1x256xf32> to vector<16x256xf32>
    %6 = arith.mulf %2, %5 : vector<16x256xf32>
    %7 = vector.extract_strided_slice %3 {offsets = [1, 0], sizes = [1, 256], strides = [1, 1]} : vector<2x256xf32> to vector<1x256xf32>
    %8 = vector.broadcast %7 : vector<1x256xf32> to vector<16x256xf32>
    %9 = arith.addf %6, %8 : vector<16x256xf32>
    %c0_5 = arith.constant 0 : index
    %c0_6 = arith.constant 0 : index
    %10 = vector.load %arg5[%c0_5, %c0_6] : memref<16x256xf32, #tpu.memory_space<vmem>>, vector<16x256xf32>
    tpu.vector_store %arg5[%c0_5, %c0_6], %9 {strides = array<i32>} : memref<16x256xf32, #tpu.memory_space<vmem>>, vector<16x256xf32>,
    return
  }
  func.func @transform_0(%arg0: i32, %arg1: i32) -> (i32, i32) {
    %c0_i32 = arith.constant 0 : i32
    %c0_i32_0 = arith.constant 0 : i32
    return %arg0, %c0_i32 : i32, i32
  }
  func.func @transform_1(%arg0: i32, %arg1: i32) -> (i32, i32) {
    %c0_i32 = arith.constant 0 : i32
    %c0_i32_0 = arith.constant 0 : i32
    return %c0_i32, %arg1 : i32, i32
  }
  func.func @transform_2(%arg0: i32, %arg1: i32) -> (i32, i32) {
    %c0_i32 = arith.constant 0 : i32
    %c0_i32_0 = arith.constant 0 : i32
    return %c0_i32, %arg1 : i32, i32
  }
  func.func @transform_3(%arg0: i32, %arg1: i32) -> (i32, i32) {
    %c0_i32 = arith.constant 0 : i32
    return %arg0, %arg1 : i32, i32
  }
}

</mosaic_0001>

<bundles_post_ra>
// kernel: _lambda_.79
= control target key start
LH: loop header
LB: loop body
LE: loop exit
PB: predicated region body
PF: predicated region fallthrough
CT: control target
= control target key end

     0   :  { %s234_s25 = smov 125   ;;  %v140_v48 = vlaneseq  ;;  %vm212_vm0 = vcmask 19456   ;;  %s529_s0 = inlined_call_operand.vmem [shape: f32[16,2,8,6], index: 0, kind: input, shape index: {}]   ;;  %s530_s1 = inlined_call_operand.vmem [shape: f32[2,3], index: 1, kind: input, shape index: {}]   ;;  %s531_s2 = inlined_call_operand.vmem [shape: bf16[16,8,3], index: 2, kind: output, shape index: {}]  }
   0x1   :  { %v15_v0 = vld [vmem:[%s529_s0 + $0x20] sm:$0xff]  ;;  %v16_v1 = vld [vmem:[%s529_s0 + $0x28] sm:$0xff]  ;;  %v17_v5 = vld [vmem:[%s529_s0 + $0x30] sm:$0xff] }
   0x2   :  { %v11_v2 = vld [vmem:[%s529_s0] sm:$0xff]  ;;  %v259_v3 = vmax.f32 %v15_v0, %v16_v1  ;;  %v12_v4 = vld [vmem:[%s529_s0 + $0x8] sm:$0xff]  ;;  %v18_v6 = vld [vmem:[%s529_s0 + $0x38] sm:$0xff]  ;;  %v141_v49 = vshrl.u32 %v140_v48, 7 }
   0x3   :  { %v270_v7 = vmax.f32 %v11_v2, %v12_v4  ;;  %v13_v8 = vld [vmem:[%s529_s0 + $0x10] sm:$0xff]  ;;  %v14_v9 = vld [vmem:[%s529_s0 + $0x18] sm:$0xff]  ;;  %v280_v10 = vmax.f32 %v17_v5, %v18_v6  ;;  %v19_v14 = vld [vmem:[%s529_s0 + $0x40] sm:$0xff] }
   0x4   :  { %79 = vrot.lane.b32.xlu1 %v259_v3, %s234_s25  ;;  %v284_v11 = vmax.f32 %v13_v8, %v14_v9  ;;  %v21_v12 = vld [vmem:[%s529_s0 + $0x50] sm:$0xff]  ;;  %v22_v13 = vld [vmem:[%s529_s0 + $0x58] sm:$0xff]  ;;  %v20_v15 = vld [vmem:[%s529_s0 + $0x48] sm:$0xff]  ;;  %v142_v50 = vsub.s32 0, %v141_v49  ;;  %v162_v52 = vsub.s32 1, %v141_v49 }
   0x5   :  { %75 = vrot.lane.b32.xlu0 %v270_v7, %s234_s25  ;;  %v300_v16 = vmax.f32 %v21_v12, %v22_v13  ;;  %v304_v17 = vmax.f32 %v19_v14, %v20_v15  ;;  %v25_v18 = vld [vmem:[%s529_s0 + $0x70] sm:$0xff]  ;;  %v26_v19 = vld [vmem:[%s529_s0 + $0x78] sm:$0xff]  ;;  %v23_v20 = vld [vmem:[%s529_s0 + $0x60] sm:$0xff] }
   0x6   :  { %v24_v21 = vld [vmem:[%s529_s0 + $0x68] sm:$0xff]  ;;  %v320_v22 = vmax.f32 %v25_v18, %v26_v19  ;;  %v29_v24 = vld [vmem:[%s529_s0 + $0x90] sm:$0xff]  ;;  %v30_v25 = vld [vmem:[%s529_s0 + $0x98] sm:$0xff] }
   0x7   :  { %v324_v23 = vmax.f32 %v23_v20, %v24_v21  ;;  %v27_v26 = vld [vmem:[%s529_s0 + $0x80] sm:$0xff]  ;;  %v28_v27 = vld [vmem:[%s529_s0 + $0x88] sm:$0xff]  ;;  %v340_v28 = vmax.f32 %v29_v24, %v30_v25  ;;  %v33_v30 = vld [vmem:[%s529_s0 + $0xb0] sm:$0xff] }
   0x8   :  { %81 = vrot.lane.b32.xlu1 %v280_v10, %s234_s25  ;;  %v344_v29 = vmax.f32 %v27_v26, %v28_v27  ;;  %v34_v31 = vld [vmem:[%s529_s0 + $0xb8] sm:$0xff]  ;;  %v31_v32 = vld [vmem:[%s529_s0 + $0xa0] sm:$0xff]  ;;  %v32_v33 = vld [vmem:[%s529_s0 + $0xa8] sm:$0xff] }
   0x9   :  { %77 = vrot.lane.b32.xlu0 %v284_v11, %s234_s25  ;;  %v360_v34 = vmax.f32 %v33_v30, %v34_v31  ;;  %v364_v35 = vmax.f32 %v31_v32, %v32_v33  ;;  %v37_v36 = vld [vmem:[%s529_s0 + $0xd0] sm:$0xff]  ;;  %v38_v37 = vld [vmem:[%s529_s0 + $0xd8] sm:$0xff]  ;;  %v35_v38 = vld [vmem:[%s529_s0 + $0xc0] sm:$0xff] }
   0xa   :  { %v36_v39 = vld [vmem:[%s529_s0 + $0xc8] sm:$0xff]  ;;  %v380_v40 = vmax.f32 %v37_v36, %v38_v37  ;;  %v41_v42 = vld [vmem:[%s529_s0 + $0xf0] sm:$0xff]  ;;  %v42_v43 = vld [vmem:[%s529_s0 + $0xf8] sm:$0xff] }
   0xb   :  { %v384_v41 = vmax.f32 %v35_v38, %v36_v39  ;;  %v39_v44 = vld [vmem:[%s529_s0 + $0xe0] sm:$0xff]  ;;  %v40_v45 = vld [vmem:[%s529_s0 + $0xe8] sm:$0xff]  ;;  %v400_v46 = vmax.f32 %v41_v42, %v42_v43 }
   0xc   :  { %85 = vrot.lane.b32.xlu1 %v300_v16, %s234_s25  ;;  %v404_v47 = vmax.f32 %v39_v44, %v40_v45  ;;  %v139_v51 = vld [vmem:[%s530_s1] sm:$0x3] }
   0xd   :  { %83 = vrot.lane.b32.xlu0 %v304_v17, %s234_s25  ;;  %v413_v53 = vrot.slane %v139_v51, %v142_v50  ;;  %v415_v55 = vrot.slane %v139_v51, %v162_v52 }
  0x10   :  { %89 = vrot.lane.b32.xlu1 %v320_v22, %s234_s25 }
  0x11   :  { %87 = vrot.lane.b32.xlu0 %v324_v23, %s234_s25 }
  0x14   :  { %93 = vrot.lane.b32.xlu1 %v340_v28, %s234_s25 }
  0x15   :  { %91 = vrot.lane.b32.xlu0 %v344_v29, %s234_s25 }
  0x18   :  { %97 = vrot.lane.b32.xlu1 %v360_v34, %s234_s25 }
  0x19   :  { %95 = vrot.lane.b32.xlu0 %v364_v35, %s234_s25 }
  0x1c   :  { %101 = vrot.lane.b32.xlu1 %v380_v40, %s234_s25 }
  0x1d   :  { %99 = vrot.lane.b32.xlu0 %v384_v41, %s234_s25 }
  0x20   :  { %105 = vrot.lane.b32.xlu1 %v400_v46, %s234_s25 }
  0x21   :  { %103 = vrot.lane.b32.xlu0 %v404_v47, %s234_s25 }
  0x76   :  { %v80_v54 = vpop.permute.xlu1 %79 }
  0x77   :  { %v125_v56 = vmax.f32 %v259_v3, %v80_v54  ;;  %v76_v57 = vpop.permute.xlu0 %75 }
  0x78   :  { %v123_v58 = vmax.f32 %v270_v7, %v76_v57 }
  0x79   :  { %v146_v59 = vmul.f32 %v413_v53, %v125_v56 }
  0x7a   :  { %v144_v60 = vmul.f32 %v413_v53, %v123_v58  ;;  %v82_v61 = vpop.permute.xlu1 %81 }
  0x7b   :  { %v166_v62 = vadd.f32 %v415_v55, %v146_v59  ;;  %v126_v63 = vmax.f32 %v280_v10, %v82_v61  ;;  %v78_v0 = vpop.permute.xlu0 %77 }
  0x7c   :  { %v164_v1 = vadd.f32 %v415_v55, %v144_v60  ;;  %v124_v2 = vmax.f32 %v284_v11, %v78_v0 }
  0x7d   :  { %v182_v4 = vmax.f32 %v166_v62, 0.0  ;;  %v147_v3 = vmul.f32 %v413_v53, %v126_v63 }
  0x7e   :  { %v180_v5 = vmax.f32 %v164_v1, 0.0  ;;  %v145_v6 = vmul.f32 %v413_v53, %v124_v2  ;;  %v86_v7 = vpop.permute.xlu1 %85 }
  0x7f   :  { %v198_v8 = vpack.c.bf16 %v182_v4, %v182_v4  ;;  %v167_v9 = vadd.f32 %v415_v55, %v147_v3  ;;  %v128_v12 = vmax.f32 %v300_v16, %v86_v7  ;;  %v84_v13 = vpop.permute.xlu0 %83 }
  0x80   :  { %v196_v10 = vpack.c.bf16 %v180_v5, %v180_v5  ;;  %v165_v14 = vadd.f32 %v415_v55, %v145_v6  ;;  %v127_v15 = vmax.f32 %v304_v17, %v84_v13 }
  0x81   :  { %215 = vst.msk [vmem:[%s531_s2 + $0x8] sm:$0xf] %vm212_vm0, %v198_v8  ;;  %v183_v11 = vmax.f32 %v167_v9, 0.0  ;;  %v149_v18 = vmul.f32 %v413_v53, %v128_v12 }
  0x82   :  { %213 = vst.msk [vmem:[%s531_s2] sm:$0xf] %vm212_vm0, %v196_v10  ;;  %v181_v16 = vmax.f32 %v165_v14, 0.0  ;;  %v148_v19 = vmul.f32 %v413_v53, %v127_v15  ;;  %v90_v20 = vpop.permute.xlu1 %89 }
  0x83   :  { %v199_v21 = vpack.c.bf16 %v183_v11, %v183_v11  ;;  %v169_v17 = vadd.f32 %v415_v55, %v149_v18  ;;  %v130_v24 = vmax.f32 %v320_v22, %v90_v20  ;;  %v88_v25 = vpop.permute.xlu0 %87 }
  0x84   :  { %v197_v26 = vpack.c.bf16 %v181_v16, %v181_v16  ;;  %v168_v27 = vadd.f32 %v415_v55, %v148_v19  ;;  %v129_v30 = vmax.f32 %v324_v23, %v88_v25 }
  0x85   :  { %216 = vst.msk [vmem:[%s531_s2 + $0xc] sm:$0xf] %vm212_vm0, %v199_v21  ;;  %v185_v31 = vmax.f32 %v169_v17, 0.0  ;;  %v151_v32 = vmul.f32 %v413_v53, %v130_v24 }
  0x86   :  { %214 = vst.msk [vmem:[%s531_s2 + $0x4] sm:$0xf] %vm212_vm0, %v197_v26  ;;  %v184_v22 = vmax.f32 %v168_v27, 0.0  ;;  %v150_v33 = vmul.f32 %v413_v53, %v129_v30  ;;  %v94_v36 = vpop.permute.xlu1 %93 }
  0x87   :  { %v201_v37 = vpack.c.bf16 %v185_v31, %v185_v31  ;;  %v171_v23 = vadd.f32 %v415_v55, %v151_v32  ;;  %v132_v38 = vmax.f32 %v340_v28, %v94_v36  ;;  %v92_v39 = vpop.permute.xlu0 %91 }
  0x88   :  { %v200_v42 = vpack.c.bf16 %v184_v22, %v184_v22  ;;  %v170_v43 = vadd.f32 %v415_v55, %v150_v33  ;;  %v131_v44 = vmax.f32 %v344_v29, %v92_v39 }
  0x89   :  { %218 = vst.msk [vmem:[%s531_s2 + $0x14] sm:$0xf] %vm212_vm0, %v201_v37  ;;  %v187_v45 = vmax.f32 %v171_v23, 0.0  ;;  %v153_v48 = vmul.f32 %v413_v53, %v132_v38 }
  0x8a   :  { %217 = vst.msk [vmem:[%s531_s2 + $0x10] sm:$0xf] %vm212_vm0, %v200_v42  ;;  %v186_v28 = vmax.f32 %v170_v43, 0.0  ;;  %v152_v49 = vmul.f32 %v413_v53, %v131_v44  ;;  %v98_v50 = vpop.permute.xlu1 %97 }
  0x8b   :  { %v203_v51 = vpack.c.bf16 %v187_v45, %v187_v45  ;;  %v173_v29 = vadd.f32 %v415_v55, %v153_v48  ;;  %v134_v52 = vmax.f32 %v360_v34, %v98_v50  ;;  %v96_v54 = vpop.permute.xlu0 %95 }
  0x8c   :  { %v202_v56 = vpack.c.bf16 %v186_v28, %v186_v28  ;;  %v172_v57 = vadd.f32 %v415_v55, %v152_v49  ;;  %v133_v58 = vmax.f32 %v364_v35, %v96_v54 }
  0x8d   :  { %220 = vst.msk [vmem:[%s531_s2 + $0x1c] sm:$0xf] %vm212_vm0, %v203_v51  ;;  %v189_v59 = vmax.f32 %v173_v29, 0.0  ;;  %v155_v60 = vmul.f32 %v413_v53, %v134_v52 }
  0x8e   :  { %219 = vst.msk [vmem:[%s531_s2 + $0x18] sm:$0xf] %vm212_vm0, %v202_v56  ;;  %v188_v34 = vmax.f32 %v172_v57, 0.0  ;;  %v154_v61 = vmul.f32 %v413_v53, %v133_v58  ;;  %v102_v62 = vpop.permute.xlu1 %101 }
  0x8f   :  { %v205_v63 = vpack.c.bf16 %v189_v59, %v189_v59  ;;  %v175_v35 = vadd.f32 %v415_v55, %v155_v60  ;;  %v136_v0 = vmax.f32 %v380_v40, %v102_v62  ;;  %v100_v1 = vpop.permute.xlu0 %99 }
  0x90   :  { %v204_v2 = vpack.c.bf16 %v188_v34, %v188_v34  ;;  %v174_v4 = vadd.f32 %v415_v55, %v154_v61  ;;  %v135_v3 = vmax.f32 %v384_v41, %v100_v1 }
  0x91   :  { %222 = vst.msk [vmem:[%s531_s2 + $0x24] sm:$0xf] %vm212_vm0, %v205_v63  ;;  %v191_v5 = vmax.f32 %v175_v35, 0.0  ;;  %v157_v6 = vmul.f32 %v413_v53, %v136_v0 }
  0x92   :  { %221 = vst.msk [vmem:[%s531_s2 + $0x20] sm:$0xf] %vm212_vm0, %v204_v2  ;;  %v190_v40 = vmax.f32 %v174_v4, 0.0  ;;  %v156_v7 = vmul.f32 %v413_v53, %v135_v3  ;;  %v106_v8 = vpop.permute.xlu1 %105 }
  0x93   :  { %v207_v9 = vpack.c.bf16 %v191_v5, %v191_v5  ;;  %v177_v41 = vadd.f32 %v415_v55, %v157_v6  ;;  %v138_v12 = vmax.f32 %v400_v46, %v106_v8  ;;  %v104_v13 = vpop.permute.xlu0 %103 }
  0x94   :  { %v206_v10 = vpack.c.bf16 %v190_v40, %v190_v40  ;;  %v176_v14 = vadd.f32 %v415_v55, %v156_v7  ;;  %v137_v15 = vmax.f32 %v404_v47, %v104_v13 }
  0x95   :  { %224 = vst.msk [vmem:[%s531_s2 + $0x2c] sm:$0xf] %vm212_vm0, %v207_v9  ;;  %v193_v11 = vmax.f32 %v177_v41, 0.0  ;;  %v159_v18 = vmul.f32 %v413_v53, %v138_v12 }
  0x96   :  { %223 = vst.msk [vmem:[%s531_s2 + $0x28] sm:$0xf] %vm212_vm0, %v206_v10  ;;  %v192_v46 = vmax.f32 %v176_v14, 0.0  ;;  %v158_v16 = vmul.f32 %v413_v53, %v137_v15 }
  0x97   :  { %v209_v19 = vpack.c.bf16 %v193_v11, %v193_v11  ;;  %v179_v20 = vadd.f32 %v415_v55, %v159_v18 }
  0x98   :  { %v208_v47 = vpack.c.bf16 %v192_v46, %v192_v46  ;;  %v178_v21 = vadd.f32 %v415_v55, %v158_v16 }
  0x99   :  { %226 = vst.msk [vmem:[%s531_s2 + $0x34] sm:$0xf] %vm212_vm0, %v209_v19  ;;  %v195_v17 = vmax.f32 %v179_v20, 0.0 }
  0x9a   :  { %225 = vst.msk [vmem:[%s531_s2 + $0x30] sm:$0xf] %vm212_vm0, %v208_v47  ;;  %v194_v24 = vmax.f32 %v178_v21, 0.0 }
  0x9b   :  { %v211_v25 = vpack.c.bf16 %v195_v17, %v195_v17 }
  0x9c   :  { %v210_v53 = vpack.c.bf16 %v194_v24, %v194_v24 }
  0x9d   :  { %228 = vst.msk [vmem:[%s531_s2 + $0x3c] sm:$0xf] %vm212_vm0, %v211_v25 }
  0x9e   :  { %227 = vst.msk [vmem:[%s531_s2 + $0x38] sm:$0xf] %vm212_vm0, %v210_v53 }

// kernel: _lambda_.78
= control target key start
LH: loop header
LB: loop body
LE: loop exit
PB: predicated region body
PF: predicated region fallthrough
CT: control target
= control target key end

     0   :  { %vm87_vm0 = vcmask 261120   ;;  %v210_v10 = vlaneseq  ;;  %s594_s1 = inlined_call_operand.vmem [shape: bf16[32,128], index: 1, kind: input, shape index: {}]   ;;  %s595_s0 = inlined_call_operand.vmem [shape: bf16[128,32], index: 0, kind: input, shape index: {}]   ;;  %s596_s2 = inlined_call_operand.vmem [shape: f32[2,128], index: 2, kind: input, shape index: {}]   ;;  %s597_s3 = inlined_call_operand.vmem [shape: bf16[128,128], index: 3, kind: output, shape index: {}]  }
   0x1   :  { %v481_v0 = vld [vmem:[%s594_s1 + $0x8] sm:$0xff]   ;;  %v482_v1 = vld [vmem:[%s594_s1] sm:$0xff]   ;;  %v487_v6 = vld [vmem:[%s595_s0 + $0x10] sm:$0xff]  }
   0x2   :  { %457 = vmatprep.subr.bf16.mxu0 %v481_v0  ;;  %477 = vmatprep.subr.bf16.mxu1 %v481_v0  ;;  %v483_v2 = vld [vmem:[%s595_s0] sm:$0xff]   ;;  %v485_v4 = vld [vmem:[%s595_s0 + $0x8] sm:$0xff]   ;;  %v488_v7 = vld [vmem:[%s595_s0 + $0x30] sm:$0xff]   ;;  %v211_v11 = vshrl.u32 %v210_v10, 7 }
   0x3   :  { %458 = vmatpush3.bf16.msra.mxu0 %v481_v0  ;;  %479 = vmatpush3.bf16.msra.mxu1 %v481_v0  ;;  %v484_v3 = vld [vmem:[%s595_s0 + $0x20] sm:$0xff]   ;;  %v486_v5 = vld [vmem:[%s595_s0 + $0x28] sm:$0xff]   ;;  %v489_v8 = vld [vmem:[%s595_s0 + $0x18] sm:$0xff]  }
   0x4   :  { %459 = vmatprep.subr.bf16.mxu0 %v482_v1  ;;  %478 = vmatprep.subr.bf16.mxu1 %v482_v1  ;;  %v490_v9 = vld [vmem:[%s595_s0 + $0x38] sm:$0xff]   ;;  %v212_v12 = vsub.s32 0, %v211_v11  ;;  %v209_v13 = vld [vmem:[%s596_s2] sm:$0x3]  ;;  %v232_v15 = vsub.s32 1, %v211_v11 }
   0x5   :  { %461 = vmatprep.mubr.msk.bf16.mxu0 %vm87_vm0, %v483_v2  ;;  %469 = vmatprep.mubr.msk.bf16.mxu1 %vm87_vm0, %v484_v3 }
   0x6   :  { %v552_v14 = vrot.slane %v209_v13, %v212_v12  ;;  %v233_v19 = vrot.slane %v209_v13, %v232_v15 }
   0x7   :  { %460 = vmatpush3.bf16.msra.mxu0 %v482_v1  ;;  %480 = vmatpush3.bf16.msra.mxu1 %v482_v1 }
   0xa   :  { %462 = vmatmul.mubr.msk.bf16.vlgmr.msra.gmra.mxu0 %vm87_vm0, %v485_v4  ;;  %470 = vmatmul.mubr.msk.bf16.vlgmr.msra.gmra.mxu1 %vm87_vm0, %v486_v5 }
   0xb   :  { %465 = vmatprep.mubr.msk.bf16.mxu0 %vm87_vm0, %v487_v6  ;;  %473 = vmatprep.mubr.msk.bf16.mxu1 %vm87_vm0, %v488_v7 }
  0x12   :  { %466 = vmatmul.mubr.msk.bf16.gmra.mxu0 %vm87_vm0, %v489_v8  ;;  %474 = vmatmul.mubr.msk.bf16.gmra.mxu1 %vm87_vm0, %v490_v9 }
  0xca   :  { %v463_v16 = vpop.f32.mrf.mxu0  ;;  %v471_v17 = vpop.f32.mrf.mxu1 }
  0xcb   :  { %v216_v18 = vmul.f32 %v463_v16, %v552_v14  ;;  %v224_v20 = vmul.f32 %v471_v17, %v552_v14 }
  0xcc   :  { %v146_v21 = vpop.f32.mrf.mxu0  ;;  %v178_v22 = vpop.f32.mrf.mxu1 }
  0xcd   :  { %v214_v23 = vmul.f32 %v552_v14, %v146_v21  ;;  %v222_v24 = vmul.f32 %v552_v14, %v178_v22  ;;  %v236_v27 = vadd.f32 %v233_v19, %v216_v18  ;;  %v244_v28 = vadd.f32 %v233_v19, %v224_v20 }
  0xce   :  { %v464_v25 = vpop.f32.mrf.mxu0  ;;  %v472_v26 = vpop.f32.mrf.mxu1 }
  0xcf   :  { %v217_v29 = vmul.f32 %v464_v25, %v552_v14  ;;  %v225_v30 = vmul.f32 %v472_v26, %v552_v14  ;;  %v234_v33 = vadd.f32 %v233_v19, %v214_v23  ;;  %v242_v34 = vadd.f32 %v233_v19, %v222_v24 }
  0xd0   :  { %v149_v31 = vpop.f32.mrf.mxu0  ;;  %v181_v32 = vpop.f32.mrf.mxu1  ;;  %v252_v41 = vmax.f32 %v236_v27, 0.0  ;;  %v260_v42 = vmax.f32 %v244_v28, 0.0 }
  0xd1   :  { %v215_v35 = vmul.f32 %v552_v14, %v149_v31  ;;  %v223_v36 = vmul.f32 %v552_v14, %v181_v32  ;;  %v237_v37 = vadd.f32 %v233_v19, %v217_v29  ;;  %v245_v38 = vadd.f32 %v233_v19, %v225_v30 }
  0xd2   :  { %v467_v39 = vpop.f32.mrf.mxu0  ;;  %v475_v40 = vpop.f32.mrf.mxu1  ;;  %v250_v51 = vmax.f32 %v234_v33, 0.0  ;;  %v258_v52 = vmax.f32 %v242_v34, 0.0 }
  0xd3   :  { %v235_v43 = vadd.f32 %v233_v19, %v215_v35  ;;  %v243_v44 = vadd.f32 %v233_v19, %v223_v36  ;;  %v253_v45 = vmax.f32 %v237_v37, 0.0  ;;  %v261_v46 = vmax.f32 %v245_v38, 0.0 }
  0xd4   :  { %v220_v47 = vmul.f32 %v467_v39, %v552_v14  ;;  %v228_v48 = vmul.f32 %v475_v40, %v552_v14  ;;  %v162_v49 = vpop.f32.mrf.mxu0  ;;  %v194_v50 = vpop.f32.mrf.mxu1 }
  0xd5   :  { %v251_v53 = vmax.f32 %v235_v43, 0.0  ;;  %v259_v54 = vmax.f32 %v243_v44, 0.0  ;;  %v408_v55 = vpack.c.bf16 %v253_v45, %v252_v41  ;;  %v428_v56 = vpack.c.bf16 %v261_v46, %v260_v42 }
  0xd6   :  { %v218_v57 = vmul.f32 %v552_v14, %v162_v49  ;;  %v226_v58 = vmul.f32 %v552_v14, %v194_v50  ;;  %v468_v59 = vpop.f32.mrf.mxu0  ;;  %v476_v60 = vpop.f32.mrf.mxu1  ;;  %v240_v63 = vadd.f32 %v233_v19, %v220_v47  ;;  %v248_v0 = vadd.f32 %v233_v19, %v228_v48 }
  0xd7   :  { %v403_v61 = vpack.c.bf16 %v251_v53, %v250_v51  ;;  %v423_v62 = vpack.c.bf16 %v259_v54, %v258_v52  ;;  %440 = vst [vmem:[%s597_s3 + $0x8] sm:$0xff] %v408_v55   ;;  %444 = vst [vmem:[%s597_s3 + $0x28] sm:$0xff] %v428_v56   ;;  %v221_v1 = vmul.f32 %v468_v59, %v552_v14 }
  0xd8   :  { %v229_v2 = vmul.f32 %v476_v60, %v552_v14  ;;  %v165_v3 = vpop.f32.mrf.mxu0  ;;  %v197_v4 = vpop.f32.mrf.mxu1  ;;  %v238_v5 = vadd.f32 %v233_v19, %v218_v57  ;;  %v246_v6 = vadd.f32 %v233_v19, %v226_v58  ;;  %v256_v13 = vmax.f32 %v240_v63, 0.0 }
  0xd9   :  { %404 = vst [vmem:[%s597_s3] sm:$0xff] %v403_v61   ;;  %443 = vst [vmem:[%s597_s3 + $0x20] sm:$0xff] %v423_v62   ;;  %v219_v7 = vmul.f32 %v552_v14, %v165_v3  ;;  %v227_v8 = vmul.f32 %v552_v14, %v197_v4  ;;  %v241_v9 = vadd.f32 %v233_v19, %v221_v1  ;;  %v264_v15 = vmax.f32 %v248_v0, 0.0 }
  0xda   :  { %v249_v10 = vadd.f32 %v233_v19, %v229_v2  ;;  %v254_v18 = vmax.f32 %v238_v5, 0.0  ;;  %v262_v20 = vmax.f32 %v246_v6, 0.0 }
  0xdb   :  { %v239_v11 = vadd.f32 %v233_v19, %v219_v7  ;;  %v247_v12 = vadd.f32 %v233_v19, %v227_v8  ;;  %v257_v16 = vmax.f32 %v241_v9, 0.0 }
  0xdc   :  { %v265_v17 = vmax.f32 %v249_v10, 0.0 }
  0xdd   :  { %v255_v21 = vmax.f32 %v239_v11, 0.0  ;;  %v263_v22 = vmax.f32 %v247_v12, 0.0  ;;  %v418_v23 = vpack.c.bf16 %v257_v16, %v256_v13 }
  0xde   :  { %v438_v24 = vpack.c.bf16 %v265_v17, %v264_v15 }
  0xdf   :  { %v413_v25 = vpack.c.bf16 %v255_v21, %v254_v18  ;;  %v433_v26 = vpack.c.bf16 %v263_v22, %v262_v20  ;;  %442 = vst [vmem:[%s597_s3 + $0x18] sm:$0xff] %v418_v23  }
  0xe0   :  { %446 = vst [vmem:[%s597_s3 + $0x38] sm:$0xff] %v438_v24  }
  0xe1   :  { %441 = vst [vmem:[%s597_s3 + $0x10] sm:$0xff] %v413_v25   ;;  %445 = vst [vmem:[%s597_s3 + $0x30] sm:$0xff] %v433_v26  }

// kernel: _lambda_.81
= control target key start
LH: loop header
LB: loop body
LE: loop exit
PB: predicated region body
PF: predicated region fallthrough
CT: control target
= control target key end

     0   :  { %s166_s13 = smov 112   ;;  %v92_v44 = vlaneseq  ;;  %vm132_vm0 = vcmask 123904   ;;  %s265_s0 = inlined_call_operand.vmem [shape: bf16[8,2,4,32], index: 0, kind: input, shape index: {}]   ;;  %s266_s1 = inlined_call_operand.vmem [shape: f32[2,16], index: 1, kind: input, shape index: {}]   ;;  %s267_s2 = inlined_call_operand.vmem [shape: bf16[8,4,16], index: 2, kind: output, shape index: {}]  }
   0x1   :  { %v19_v0 = vld [vmem:[%s265_s0 + $0x10] sm:$0x3]  ;;  %v20_v1 = vld [vmem:[%s265_s0 + $0x12] sm:$0x3]  ;;  %v21_v2 = vld [vmem:[%s265_s0 + $0x14] sm:$0x3] }
   0x2   :  { %v22_v3 = vld [vmem:[%s265_s0 + $0x16] sm:$0x3]  ;;  %v35_v4 = vunpack.c.l.bf16 %v19_v0  ;;  %v36_v5 = vunpack.c.l.bf16 %v20_v1  ;;  %v37_v6 = vunpack.c.l.bf16 %v21_v2  ;;  %v11_v7 = vld [vmem:[%s265_s0] sm:$0x3]  ;;  %v12_v8 = vld [vmem:[%s265_s0 + $0x2] sm:$0x3] }
   0x3   :  { %v38_v9 = vunpack.c.l.bf16 %v22_v3  ;;  %v13_v10 = vld [vmem:[%s265_s0 + $0x4] sm:$0x3]  ;;  %v14_v11 = vld [vmem:[%s265_s0 + $0x6] sm:$0x3]  ;;  %v27_v12 = vunpack.c.l.bf16 %v11_v7  ;;  %v28_v13 = vunpack.c.l.bf16 %v12_v8  ;;  %v23_v14 = vld [vmem:[%s265_s0 + $0x18] sm:$0x3] }
   0x4   :  { %v47_v15 = vmax.f32 %v35_v4, %v36_v5  ;;  %v29_v16 = vunpack.c.l.bf16 %v13_v10  ;;  %v30_v17 = vunpack.c.l.bf16 %v14_v11  ;;  %v24_v18 = vld [vmem:[%s265_s0 + $0x1a] sm:$0x3]  ;;  %v25_v19 = vld [vmem:[%s265_s0 + $0x1c] sm:$0x3]  ;;  %v26_v20 = vld [vmem:[%s265_s0 + $0x1e] sm:$0x3]  ;;  %v39_v21 = vunpack.c.l.bf16 %v23_v14 }
   0x5   :  { %v48_v22 = vmax.f32 %v37_v6, %v38_v9  ;;  %v43_v23 = vmax.f32 %v27_v12, %v28_v13  ;;  %v40_v24 = vunpack.c.l.bf16 %v24_v18  ;;  %v41_v25 = vunpack.c.l.bf16 %v25_v19  ;;  %v15_v26 = vld [vmem:[%s265_s0 + $0x8] sm:$0x3]  ;;  %v16_v27 = vld [vmem:[%s265_s0 + $0xa] sm:$0x3]  ;;  %v17_v28 = vld [vmem:[%s265_s0 + $0xc] sm:$0x3] }
   0x6   :  { %v44_v29 = vmax.f32 %v29_v16, %v30_v17  ;;  %v42_v30 = vunpack.c.l.bf16 %v26_v20  ;;  %v18_v31 = vld [vmem:[%s265_s0 + $0xe] sm:$0x3]  ;;  %v31_v32 = vunpack.c.l.bf16 %v15_v26  ;;  %v32_v33 = vunpack.c.l.bf16 %v16_v27  ;;  %v91_v47 = vld [vmem:[%s266_s1] sm:$0x3] }
   0x7   :  { %v156_v34 = vpack.i.bf16 %v48_v22, %v47_v15  ;;  %v49_v35 = vmax.f32 %v39_v21, %v40_v24  ;;  %v33_v36 = vunpack.c.l.bf16 %v17_v28  ;;  %v34_v37 = vunpack.c.l.bf16 %v18_v31 }
   0x8   :  { %v146_v38 = vpack.i.bf16 %v44_v29, %v43_v23  ;;  %v50_v39 = vmax.f32 %v41_v25, %v42_v30  ;;  %v45_v40 = vmax.f32 %v31_v32, %v32_v33  ;;  %v93_v45 = vshrl.u32 %v92_v44, 7 }
   0x9   :  { %157 = vrot.lane.b32.xlu1 %v156_v34, %s166_s13  ;;  %v46_v41 = vmax.f32 %v33_v36, %v34_v37 }
   0xa   :  { %147 = vrot.lane.b32.xlu0 %v146_v38, %s166_s13  ;;  %v161_v42 = vpack.i.bf16 %v50_v39, %v49_v35  ;;  %v94_v46 = vsub.s32 0, %v93_v45  ;;  %v106_v48 = vsub.s32 1, %v93_v45 }
   0xb   :  { %v151_v43 = vpack.i.bf16 %v46_v41, %v45_v40 }
   0xc   :  { %v95_v50 = vrot.slane %v91_v47, %v94_v46  ;;  %v107_v56 = vrot.slane %v91_v47, %v106_v48 }
   0xd   :  { %162 = vrot.lane.b32.xlu1 %v161_v42, %s166_s13 }
   0xe   :  { %152 = vrot.lane.b32.xlu0 %v151_v43, %s166_s13 }
  0x7b   :  { %v158_v49 = vpop.permute.xlu1 %157 }
  0x7c   :  { %v160_v51 = vunpack.i.h.bf16 %v158_v49  ;;  %v159_v52 = vunpack.i.l.bf16 %v158_v49  ;;  %v148_v53 = vpop.permute.xlu0 %147 }
  0x7d   :  { %v150_v54 = vunpack.i.h.bf16 %v148_v53  ;;  %v149_v55 = vunpack.i.l.bf16 %v148_v53 }
  0x7e   :  { %v88_v57 = vmax.f32 %v48_v22, %v160_v51  ;;  %v87_v58 = vmax.f32 %v47_v15, %v159_v52 }
  0x7f   :  { %v84_v59 = vmax.f32 %v44_v29, %v150_v54  ;;  %v83_v60 = vmax.f32 %v43_v23, %v149_v55  ;;  %v163_v61 = vpop.permute.xlu1 %162 }
  0x80   :  { %v101_v62 = vmul.f32 %v95_v50, %v88_v57  ;;  %v100_v63 = vmul.f32 %v95_v50, %v87_v58  ;;  %v165_v0 = vunpack.i.h.bf16 %v163_v61  ;;  %v164_v1 = vunpack.i.l.bf16 %v163_v61  ;;  %v153_v2 = vpop.permute.xlu0 %152 }
  0x81   :  { %v97_v3 = vmul.f32 %v95_v50, %v84_v59  ;;  %v96_v4 = vmul.f32 %v95_v50, %v83_v60  ;;  %v155_v5 = vunpack.i.h.bf16 %v153_v2  ;;  %v154_v6 = vunpack.i.l.bf16 %v153_v2 }
  0x82   :  { %v113_v7 = vadd.f32 %v107_v56, %v101_v62  ;;  %v112_v8 = vadd.f32 %v107_v56, %v100_v63  ;;  %v90_v9 = vmax.f32 %v50_v39, %v165_v0  ;;  %v89_v10 = vmax.f32 %v49_v35, %v164_v1 }
  0x83   :  { %v109_v11 = vadd.f32 %v107_v56, %v97_v3  ;;  %v108_v12 = vadd.f32 %v107_v56, %v96_v4  ;;  %v86_v13 = vmax.f32 %v46_v41, %v155_v5  ;;  %v85_v14 = vmax.f32 %v45_v40, %v154_v6 }
  0x84   :  { %v121_v15 = vmax.f32 %v113_v7, 0.0  ;;  %v120_v16 = vmax.f32 %v112_v8, 0.0  ;;  %v103_v17 = vmul.f32 %v95_v50, %v90_v9  ;;  %v102_v18 = vmul.f32 %v95_v50, %v89_v10 }
  0x85   :  { %v117_v19 = vmax.f32 %v109_v11, 0.0  ;;  %v116_v20 = vmax.f32 %v108_v12, 0.0  ;;  %v99_v21 = vmul.f32 %v95_v50, %v86_v13  ;;  %v98_v22 = vmul.f32 %v95_v50, %v85_v14 }
  0x86   :  { %v129_v23 = vpack.c.bf16 %v121_v15, %v121_v15  ;;  %v128_v24 = vpack.c.bf16 %v120_v16, %v120_v16  ;;  %v115_v25 = vadd.f32 %v107_v56, %v103_v17  ;;  %v114_v26 = vadd.f32 %v107_v56, %v102_v18 }
  0x87   :  { %v125_v27 = vpack.c.bf16 %v117_v19, %v117_v19  ;;  %v124_v28 = vpack.c.bf16 %v116_v20, %v116_v20  ;;  %v111_v29 = vadd.f32 %v107_v56, %v99_v21  ;;  %v110_v30 = vadd.f32 %v107_v56, %v98_v22 }
  0x88   :  { %138 = vst.msk [vmem:[%s267_s2 + $0xa] sm:$0x3] %vm132_vm0, %v129_v23  ;;  %137 = vst.msk [vmem:[%s267_s2 + $0x8] sm:$0x3] %vm132_vm0, %v128_v24  ;;  %v123_v31 = vmax.f32 %v115_v25, 0.0  ;;  %v122_v32 = vmax.f32 %v114_v26, 0.0 }
  0x89   :  { %134 = vst.msk [vmem:[%s267_s2 + $0x2] sm:$0x3] %vm132_vm0, %v125_v27  ;;  %133 = vst.msk [vmem:[%s267_s2] sm:$0x3] %vm132_vm0, %v124_v28  ;;  %v119_v33 = vmax.f32 %v111_v29, 0.0  ;;  %v118_v34 = vmax.f32 %v110_v30, 0.0 }
  0x8a   :  { %v131_v35 = vpack.c.bf16 %v123_v31, %v123_v31  ;;  %v130_v36 = vpack.c.bf16 %v122_v32, %v122_v32 }
  0x8b   :  { %v127_v37 = vpack.c.bf16 %v119_v33, %v119_v33  ;;  %v126_v38 = vpack.c.bf16 %v118_v34, %v118_v34 }
  0x8c   :  { %140 = vst.msk [vmem:[%s267_s2 + $0xe] sm:$0x3] %vm132_vm0, %v131_v35  ;;  %139 = vst.msk [vmem:[%s267_s2 + $0xc] sm:$0x3] %vm132_vm0, %v130_v36 }
  0x8d   :  { %136 = vst.msk [vmem:[%s267_s2 + $0x6] sm:$0x3] %vm132_vm0, %v127_v37  ;;  %135 = vst.msk [vmem:[%s267_s2 + $0x4] sm:$0x3] %vm132_vm0, %v126_v38 }

// kernel: _lambda_.80
= control target key start
LH: loop header
LB: loop body
LE: loop exit
PB: predicated region body
PF: predicated region fallthrough
CT: control target
= control target key end

     0   :  { %v278_v0 = vmov 0   ;;  %vm109_vm0 = vcmask 130048   ;;  %v166_v14 = vlaneseq  ;;  %s347_s1 = inlined_call_operand.vmem [shape: bf16[144,128], index: 1, kind: input, shape index: {}]   ;;  %s348_s0 = inlined_call_operand.vmem [shape: bf16[32,144], index: 0, kind: input, shape index: {}]   ;;  %s349_s2 = inlined_call_operand.vmem [shape: f32[2,128], index: 2, kind: input, shape index: {}]   ;;  %s350_s3 = inlined_call_operand.vmem [shape: bf16[32,128], index: 3, kind: output, shape index: {}]  }
   0x1   :  { %116 = vmatprep.subr.bf16.mxu0 %v278_v0  ;;  %244 = vmatprep.subr.bf16.mxu1 %v278_v0  ;;  %v263_v1 = vld [vmem:[%s347_s1 + $0x38] sm:$0xff]   ;;  %v264_v2 = vld [vmem:[%s347_s1 + $0x30] sm:$0xff]   ;;  %v265_v3 = vld [vmem:[%s347_s1 + $0x28] sm:$0xff]  }
   0x2   :  { %117 = vmatpush1.bf16.msra.mxu0 %v263_v1  ;;  %253 = vmatpush1.bf16.msra.mxu1 %v263_v1  ;;  %v266_v4 = vld [vmem:[%s347_s1 + $0x20] sm:$0xff]   ;;  %v277_v6 = vld [vmem:[%s348_s0 + $0x14] ss:$8 sps:$4 sm:$0xff]   ;;  %v269_v9 = vld [vmem:[%s347_s1 + $0x8] sm:$0xff]   ;;  %v167_v15 = vshrl.u32 %v166_v14, 7 }
   0x3   :  { %118 = vmatprep.subr.bf16.mxu0 %v278_v0  ;;  %245 = vmatprep.subr.bf16.mxu1 %v278_v0  ;;  %v274_v5 = vld [vmem:[%s348_s0 + $0x4] ss:$8 sps:$4 sm:$0xff]   ;;  %v267_v7 = vld [vmem:[%s347_s1 + $0x18] sm:$0xff]   ;;  %v268_v8 = vld [vmem:[%s347_s1 + $0x10] sm:$0xff]  }
   0x4   :  { %223 = vmatprep.mubr.msk.bf16.mxu0 %vm109_vm0, %v274_v5  ;;  %224 = vmatprep.mubr.msk.bf16.mxu1 %vm109_vm0, %v277_v6  ;;  %v270_v10 = vld [vmem:[%s347_s1] sm:$0xff]   ;;  %v275_v13 = vld [vmem:[%s348_s0 + $0x10] ss:$8 sps:$4 sm:$0xff]   ;;  %v168_v16 = vsub.s32 0, %v167_v15  ;;  %v176_v19 = vsub.s32 1, %v167_v15 }
   0x5   :  { %v271_v11 = vld [vmem:[%s347_s1 + $0x40] sm:$0xff]  }
   0x6   :  { %119 = vmatpush1.bf16.msra.mxu0 %v264_v2  ;;  %254 = vmatpush1.bf16.msra.mxu1 %v264_v2  ;;  %v272_v12 = vld [vmem:[%s348_s0] ss:$8 sps:$4 sm:$0xff]  }
   0x7   :  { %120 = vmatprep.subr.bf16.mxu0 %v278_v0  ;;  %246 = vmatprep.subr.bf16.mxu1 %v278_v0  ;;  %v165_v17 = vld [vmem:[%s349_s2] sm:$0x3] }
   0x8   :  { %v169_v18 = vrot.slane %v165_v17, %v168_v16  ;;  %v177_v23 = vrot.slane %v165_v17, %v176_v19 }
   0xa   :  { %121 = vmatpush1.bf16.msra.mxu0 %v265_v3  ;;  %255 = vmatpush1.bf16.msra.mxu1 %v265_v3 }
   0xb   :  { %122 = vmatprep.subr.bf16.mxu0 %v278_v0  ;;  %247 = vmatprep.subr.bf16.mxu1 %v278_v0 }
   0xe   :  { %123 = vmatpush1.bf16.msra.mxu0 %v266_v4  ;;  %256 = vmatpush1.bf16.msra.mxu1 %v266_v4 }
   0xf   :  { %124 = vmatprep.subr.bf16.mxu0 %v278_v0  ;;  %248 = vmatprep.subr.bf16.mxu1 %v278_v0 }
  0x12   :  { %125 = vmatpush1.bf16.msra.mxu0 %v267_v7  ;;  %257 = vmatpush1.bf16.msra.mxu1 %v267_v7 }
  0x13   :  { %126 = vmatprep.subr.bf16.mxu0 %v278_v0  ;;  %249 = vmatprep.subr.bf16.mxu1 %v278_v0 }
  0x16   :  { %127 = vmatpush1.bf16.msra.mxu0 %v268_v8  ;;  %258 = vmatpush1.bf16.msra.mxu1 %v268_v8 }
  0x17   :  { %128 = vmatprep.subr.bf16.mxu0 %v278_v0  ;;  %250 = vmatprep.subr.bf16.mxu1 %v278_v0 }
  0x1a   :  { %129 = vmatpush1.bf16.msra.mxu0 %v269_v9  ;;  %259 = vmatpush1.bf16.msra.mxu1 %v269_v9 }
  0x1b   :  { %130 = vmatprep.subr.bf16.mxu0 %v278_v0  ;;  %251 = vmatprep.subr.bf16.mxu1 %v278_v0 }
  0x1e   :  { %131 = vmatpush1.bf16.msra.mxu0 %v270_v10  ;;  %260 = vmatpush1.bf16.msra.mxu1 %v270_v10 }
  0x1f   :  { %146 = vmatprep.subr.bf16.mxu0 %v278_v0  ;;  %252 = vmatprep.subr.bf16.mxu1 %v278_v0 }
  0x22   :  { %147 = vmatpush2.bf16.msra.mxu0 %v271_v11  ;;  %261 = vmatpush2.bf16.msra.mxu1 %v271_v11 }
  0x25   :  { %149 = vmatmul.mubr.bf16.vlgmr.msra.gmra.mxu0 %v272_v12  ;;  %157 = vmatmul.mubr.bf16.vlgmr.msra.gmra.mxu1 %v275_v13 }
  0xe5   :  { %v150_v20 = vpop.f32.mrf.mxu0  ;;  %v158_v21 = vpop.f32.mrf.mxu1 }
  0xe6   :  { %v170_v22 = vmul.f32 %v169_v18, %v150_v20  ;;  %v172_v24 = vmul.f32 %v169_v18, %v158_v21 }
  0xe7   :  { %v152_v25 = vpop.f32.mrf.mxu0  ;;  %v160_v26 = vpop.f32.mrf.mxu1 }
  0xe8   :  { %v178_v29 = vadd.f32 %v177_v23, %v170_v22  ;;  %v180_v30 = vadd.f32 %v177_v23, %v172_v24 }
  0xe9   :  { %v153_v27 = vpop.f32.mrf.mxu0  ;;  %v161_v28 = vpop.f32.mrf.mxu1 }
  0xea   :  { %v171_v31 = vmul.f32 %v169_v18, %v153_v27  ;;  %v173_v32 = vmul.f32 %v169_v18, %v161_v28  ;;  %v182_v37 = vmax.f32 %v178_v29, 0.0  ;;  %v184_v38 = vmax.f32 %v180_v30, 0.0 }
  0xeb   :  { %v155_v33 = vpop.f32.mrf.mxu0  ;;  %v163_v34 = vpop.f32.mrf.mxu1 }
  0xec   :  { %v179_v35 = vadd.f32 %v177_v23, %v171_v31  ;;  %v181_v36 = vadd.f32 %v177_v23, %v173_v32 }
  0xee   :  { %v183_v39 = vmax.f32 %v179_v35, 0.0  ;;  %v185_v40 = vmax.f32 %v181_v36, 0.0 }
  0xf0   :  { %v236_v41 = vpack.c.bf16 %v183_v39, %v182_v37  ;;  %v241_v42 = vpack.c.bf16 %v185_v40, %v184_v38 }
  0xf2   :  { %237 = vst [vmem:[%s350_s3] sm:$0xff] %v236_v41   ;;  %243 = vst [vmem:[%s350_s3 + $0x8] sm:$0xff] %v241_v42  }

// kernel: _lambda_.82
= control target key start
LH: loop header
LB: loop body
LE: loop exit
PB: predicated region body
PF: predicated region fallthrough
CT: control target
= control target key end

     0   :  { %v314_v0 = vmov 0   ;;  %vm133_vm0 = vcmask 523264   ;;  %v190_v17 = vlaneseq  ;;  %s416_s1 = inlined_call_operand.vmem [shape: bf16[192,128], index: 1, kind: input, shape index: {}]   ;;  %s417_s0 = inlined_call_operand.vmem [shape: bf16[32,192], index: 0, kind: input, shape index: {}]   ;;  %s418_s2 = inlined_call_operand.vmem [shape: f32[2,128], index: 2, kind: input, shape index: {}]   ;;  %s419_s3 = inlined_call_operand.vmem [shape: bf16[32,128], index: 3, kind: output, shape index: {}]  }
   0x1   :  { %140 = vmatprep.subr.bf16.mxu0 %v314_v0  ;;  %271 = vmatprep.subr.bf16.mxu1 %v314_v0  ;;  %v296_v1 = vld [vmem:[%s416_s1 + $0x38] sm:$0xff]   ;;  %v297_v2 = vld [vmem:[%s416_s1 + $0x30] sm:$0xff]   ;;  %v298_v3 = vld [vmem:[%s416_s1 + $0x28] sm:$0xff]  }
   0x2   :  { %141 = vmatpush1.bf16.msra.mxu0 %v296_v1  ;;  %283 = vmatpush1.bf16.msra.mxu1 %v296_v1  ;;  %v299_v4 = vld [vmem:[%s416_s1 + $0x20] sm:$0xff]   ;;  %v300_v6 = vld [vmem:[%s416_s1 + $0x18] sm:$0xff]   ;;  %v301_v8 = vld [vmem:[%s416_s1 + $0x10] sm:$0xff]   ;;  %v191_v18 = vshrl.u32 %v190_v17, 7 }
   0x3   :  { %142 = vmatprep.subr.bf16.mxu0 %v314_v0  ;;  %272 = vmatprep.subr.bf16.mxu1 %v314_v0  ;;  %v310_v5 = vld [vmem:[%s417_s0 + $0x4] ss:$8 sps:$4 sm:$0xff]   ;;  %v313_v7 = vld [vmem:[%s417_s0 + $0x14] ss:$8 sps:$4 sm:$0xff]   ;;  %v308_v15 = vld [vmem:[%s417_s0] ss:$8 sps:$4 sm:$0xff]  }
   0x4   :  { %250 = vmatprep.mubr.msk.bf16.mxu0 %vm133_vm0, %v310_v5  ;;  %251 = vmatprep.mubr.msk.bf16.mxu1 %vm133_vm0, %v313_v7  ;;  %v302_v9 = vld [vmem:[%s416_s1 + $0x8] sm:$0xff]   ;;  %v303_v10 = vld [vmem:[%s416_s1] sm:$0xff]   ;;  %v304_v11 = vld [vmem:[%s416_s1 + $0x58] sm:$0xff]   ;;  %v192_v19 = vsub.s32 0, %v191_v18  ;;  %v200_v22 = vsub.s32 1, %v191_v18 }
   0x5   :  { %v305_v12 = vld [vmem:[%s416_s1 + $0x50] sm:$0xff]   ;;  %v306_v13 = vld [vmem:[%s416_s1 + $0x48] sm:$0xff]   ;;  %v307_v14 = vld [vmem:[%s416_s1 + $0x40] sm:$0xff]  }
   0x6   :  { %143 = vmatpush1.bf16.msra.mxu0 %v297_v2  ;;  %284 = vmatpush1.bf16.msra.mxu1 %v297_v2  ;;  %v311_v16 = vld [vmem:[%s417_s0 + $0x10] ss:$8 sps:$4 sm:$0xff]   ;;  %v189_v20 = vld [vmem:[%s418_s2] sm:$0x3] }
   0x7   :  { %144 = vmatprep.subr.bf16.mxu0 %v314_v0  ;;  %273 = vmatprep.subr.bf16.mxu1 %v314_v0  ;;  %v193_v21 = vrot.slane %v189_v20, %v192_v19  ;;  %v201_v26 = vrot.slane %v189_v20, %v200_v22 }
   0xa   :  { %145 = vmatpush1.bf16.msra.mxu0 %v298_v3  ;;  %285 = vmatpush1.bf16.msra.mxu1 %v298_v3 }
   0xb   :  { %146 = vmatprep.subr.bf16.mxu0 %v314_v0  ;;  %274 = vmatprep.subr.bf16.mxu1 %v314_v0 }
   0xe   :  { %147 = vmatpush1.bf16.msra.mxu0 %v299_v4  ;;  %286 = vmatpush1.bf16.msra.mxu1 %v299_v4 }
   0xf   :  { %148 = vmatprep.subr.bf16.mxu0 %v314_v0  ;;  %275 = vmatprep.subr.bf16.mxu1 %v314_v0 }
  0x12   :  { %149 = vmatpush1.bf16.msra.mxu0 %v300_v6  ;;  %287 = vmatpush1.bf16.msra.mxu1 %v300_v6 }
  0x13   :  { %150 = vmatprep.subr.bf16.mxu0 %v314_v0  ;;  %276 = vmatprep.subr.bf16.mxu1 %v314_v0 }
  0x16   :  { %151 = vmatpush1.bf16.msra.mxu0 %v301_v8  ;;  %288 = vmatpush1.bf16.msra.mxu1 %v301_v8 }
  0x17   :  { %152 = vmatprep.subr.bf16.mxu0 %v314_v0  ;;  %277 = vmatprep.subr.bf16.mxu1 %v314_v0 }
  0x1a   :  { %153 = vmatpush1.bf16.msra.mxu0 %v302_v9  ;;  %289 = vmatpush1.bf16.msra.mxu1 %v302_v9 }
  0x1b   :  { %154 = vmatprep.subr.bf16.mxu0 %v314_v0  ;;  %278 = vmatprep.subr.bf16.mxu1 %v314_v0 }
  0x1e   :  { %155 = vmatpush1.bf16.msra.mxu0 %v303_v10  ;;  %290 = vmatpush1.bf16.msra.mxu1 %v303_v10 }
  0x1f   :  { %164 = vmatprep.subr.bf16.mxu0 %v314_v0  ;;  %279 = vmatprep.subr.bf16.mxu1 %v314_v0 }
  0x22   :  { %165 = vmatpush2.bf16.msra.mxu0 %v304_v11  ;;  %291 = vmatpush2.bf16.msra.mxu1 %v304_v11 }
  0x23   :  { %166 = vmatprep.subr.bf16.mxu0 %v314_v0  ;;  %280 = vmatprep.subr.bf16.mxu1 %v314_v0 }
  0x26   :  { %167 = vmatpush2.bf16.msra.mxu0 %v305_v12  ;;  %292 = vmatpush2.bf16.msra.mxu1 %v305_v12 }
  0x27   :  { %168 = vmatprep.subr.bf16.mxu0 %v314_v0  ;;  %281 = vmatprep.subr.bf16.mxu1 %v314_v0 }
  0x2a   :  { %169 = vmatpush2.bf16.msra.mxu0 %v306_v13  ;;  %293 = vmatpush2.bf16.msra.mxu1 %v306_v13 }
  0x2b   :  { %170 = vmatprep.subr.bf16.mxu0 %v314_v0  ;;  %282 = vmatprep.subr.bf16.mxu1 %v314_v0 }
  0x2e   :  { %171 = vmatpush2.bf16.msra.mxu0 %v307_v14  ;;  %294 = vmatpush2.bf16.msra.mxu1 %v307_v14 }
  0x31   :  { %173 = vmatmul.mubr.bf16.vlgmr.msra.gmra.mxu0 %v308_v15  ;;  %181 = vmatmul.mubr.bf16.vlgmr.msra.gmra.mxu1 %v311_v16 }
  0xf1   :  { %v174_v23 = vpop.f32.mrf.mxu0  ;;  %v182_v24 = vpop.f32.mrf.mxu1 }
  0xf2   :  { %v194_v25 = vmul.f32 %v193_v21, %v174_v23  ;;  %v196_v27 = vmul.f32 %v193_v21, %v182_v24 }
  0xf3   :  { %v176_v28 = vpop.f32.mrf.mxu0  ;;  %v184_v29 = vpop.f32.mrf.mxu1 }
  0xf4   :  { %v202_v32 = vadd.f32 %v201_v26, %v194_v25  ;;  %v204_v33 = vadd.f32 %v201_v26, %v196_v27 }
  0xf5   :  { %v177_v30 = vpop.f32.mrf.mxu0  ;;  %v185_v31 = vpop.f32.mrf.mxu1 }
  0xf6   :  { %v195_v34 = vmul.f32 %v193_v21, %v177_v30  ;;  %v197_v35 = vmul.f32 %v193_v21, %v185_v31  ;;  %v206_v40 = vmax.f32 %v202_v32, 0.0  ;;  %v208_v41 = vmax.f32 %v204_v33, 0.0 }
  0xf7   :  { %v179_v36 = vpop.f32.mrf.mxu0  ;;  %v187_v37 = vpop.f32.mrf.mxu1 }
  0xf8   :  { %v203_v38 = vadd.f32 %v201_v26, %v195_v34  ;;  %v205_v39 = vadd.f32 %v201_v26, %v197_v35 }
  0xfa   :  { %v207_v42 = vmax.f32 %v203_v38, 0.0  ;;  %v209_v43 = vmax.f32 %v205_v39, 0.0 }
  0xfc   :  { %v263_v44 = vpack.c.bf16 %v207_v42, %v206_v40  ;;  %v268_v45 = vpack.c.bf16 %v209_v43, %v208_v41 }
  0xfe   :  { %264 = vst [vmem:[%s419_s3] sm:$0xff] %v263_v44   ;;  %270 = vst [vmem:[%s419_s3 + $0x8] sm:$0xff] %v268_v45  }

// kernel: _lambda_.103
= control target key start
LH: loop header
LB: loop body
LE: loop exit
PB: predicated region body
PF: predicated region fallthrough
CT: control target
= control target key end

     0   :  { %s96_s25 = smov 64   ;;  %v52_v22 = vlaneseq  ;;  %vm76_vm0 = vcmask 516096   ;;  %s151_s0 = inlined_call_operand.vmem [shape: bf16[4,2,2,128], index: 0, kind: input, shape index: {}]   ;;  %s152_s1 = inlined_call_operand.vmem [shape: f32[2,64], index: 1, kind: input, shape index: {}]   ;;  %s153_s2 = inlined_call_operand.vmem [shape: bf16[4,2,64], index: 2, kind: output, shape index: {}]  }
   0x1   :  { %v11_v0 = vld [vmem:[%s151_s0] sm:$0x1]  ;;  %v12_v1 = vld [vmem:[%s151_s0 + $0x1] sm:$0x1]  ;;  %v13_v2 = vld [vmem:[%s151_s0 + $0x2] sm:$0x1] }
   0x2   :  { %v14_v3 = vld [vmem:[%s151_s0 + $0x3] sm:$0x1]  ;;  %v19_v4 = vunpack.c.l.bf16 %v11_v0  ;;  %v20_v5 = vunpack.c.l.bf16 %v12_v1  ;;  %v21_v6 = vunpack.c.l.bf16 %v13_v2  ;;  %v15_v7 = vld [vmem:[%s151_s0 + $0x4] sm:$0x1]  ;;  %v16_v8 = vld [vmem:[%s151_s0 + $0x5] sm:$0x1] }
   0x3   :  { %v22_v9 = vunpack.c.l.bf16 %v14_v3  ;;  %v17_v10 = vld [vmem:[%s151_s0 + $0x6] sm:$0x1]  ;;  %v18_v11 = vld [vmem:[%s151_s0 + $0x7] sm:$0x1]  ;;  %v23_v12 = vunpack.c.l.bf16 %v15_v7  ;;  %v24_v13 = vunpack.c.l.bf16 %v16_v8  ;;  %v53_v23 = vshrl.u32 %v52_v22, 7 }
   0x4   :  { %v27_v14 = vmax.f32 %v19_v4, %v20_v5  ;;  %v25_v15 = vunpack.c.l.bf16 %v17_v10  ;;  %v26_v16 = vunpack.c.l.bf16 %v18_v11  ;;  %v51_v25 = vld [vmem:[%s152_s1] sm:$0x3] }
   0x5   :  { %v28_v17 = vmax.f32 %v21_v6, %v22_v9  ;;  %v29_v18 = vmax.f32 %v23_v12, %v24_v13  ;;  %v54_v24 = vsub.s32 0, %v53_v23  ;;  %v62_v26 = vsub.s32 1, %v53_v23 }
   0x6   :  { %v30_v19 = vmax.f32 %v25_v15, %v26_v16 }
   0x7   :  { %v86_v20 = vpack.i.bf16 %v28_v17, %v27_v14  ;;  %v55_v28 = vrot.slane %v51_v25, %v54_v24  ;;  %v63_v31 = vrot.slane %v51_v25, %v62_v26 }
   0x8   :  { %v91_v21 = vpack.i.bf16 %v30_v19, %v29_v18 }
   0x9   :  { %87 = vrot.lane.b32.xlu0 %v86_v20, %s96_s25 }
   0xd   :  { %92 = vrot.lane.b32.xlu0 %v91_v21, %s96_s25 }
  0x7b   :  { %v88_v27 = vpop.permute.xlu0 %87 }
  0x7c   :  { %v90_v29 = vunpack.i.h.bf16 %v88_v27  ;;  %v89_v30 = vunpack.i.l.bf16 %v88_v27 }
  0x7e   :  { %v48_v32 = vmax.f32 %v28_v17, %v90_v29  ;;  %v47_v33 = vmax.f32 %v27_v14, %v89_v30 }
  0x7f   :  { %v93_v34 = vpop.permute.xlu0 %92 }
  0x80   :  { %v57_v35 = vmul.f32 %v55_v28, %v48_v32  ;;  %v56_v36 = vmul.f32 %v55_v28, %v47_v33  ;;  %v95_v37 = vunpack.i.h.bf16 %v93_v34  ;;  %v94_v38 = vunpack.i.l.bf16 %v93_v34 }
  0x82   :  { %v65_v39 = vadd.f32 %v63_v31, %v57_v35  ;;  %v64_v40 = vadd.f32 %v63_v31, %v56_v36  ;;  %v50_v41 = vmax.f32 %v30_v19, %v95_v37  ;;  %v49_v42 = vmax.f32 %v29_v18, %v94_v38 }
  0x84   :  { %v69_v43 = vmax.f32 %v65_v39, 0.0  ;;  %v68_v44 = vmax.f32 %v64_v40, 0.0  ;;  %v59_v45 = vmul.f32 %v55_v28, %v50_v41  ;;  %v58_v46 = vmul.f32 %v55_v28, %v49_v42 }
  0x86   :  { %v73_v47 = vpack.c.bf16 %v69_v43, %v69_v43  ;;  %v72_v48 = vpack.c.bf16 %v68_v44, %v68_v44  ;;  %v67_v49 = vadd.f32 %v63_v31, %v59_v45  ;;  %v66_v50 = vadd.f32 %v63_v31, %v58_v46 }
  0x88   :  { %78 = vst.msk [vmem:[%s153_s2 + $0x1] sm:$0x1] %vm76_vm0, %v73_v47  ;;  %77 = vst.msk [vmem:[%s153_s2] sm:$0x1] %vm76_vm0, %v72_v48  ;;  %v71_v51 = vmax.f32 %v67_v49, 0.0  ;;  %v70_v52 = vmax.f32 %v66_v50, 0.0 }
  0x8a   :  { %v75_v53 = vpack.c.bf16 %v71_v51, %v71_v51  ;;  %v74_v54 = vpack.c.bf16 %v70_v52, %v70_v52 }
  0x8c   :  { %80 = vst.msk [vmem:[%s153_s2 + $0x3] sm:$0x1] %vm76_vm0, %v75_v53  ;;  %79 = vst.msk [vmem:[%s153_s2 + $0x2] sm:$0x1] %vm76_vm0, %v74_v54 }

// kernel: _lambda_.85
= control target key start
LH: loop header
LB: loop body
LE: loop exit
PB: predicated region body
PF: predicated region fallthrough
CT: control target
= control target key end

     0   :  { %v338_v0 = vmov 0   ;;  %vm136_vm0 = vcmask 523264   ;;  %v197_v17 = vlaneseq  ;;  %s451_s1 = inlined_call_operand.vmem [shape: bf16[192,128], index: 1, kind: input, shape index: {}]   ;;  %s452_s0 = inlined_call_operand.vmem [shape: bf16[32,192], index: 0, kind: input, shape index: {}]   ;;  %s453_s2 = inlined_call_operand.vmem [shape: f32[2,128], index: 2, kind: input, shape index: {}]   ;;  %s454_s3 = inlined_call_operand.vmem [shape: bf16[32,128], index: 3, kind: input, shape index: {}]   ;;  %s455_s4 = inlined_call_operand.vmem [shape: bf16[32,128], index: 4, kind: output, shape index: {}]  }
   0x1   :  { %143 = vmatprep.subr.bf16.mxu0 %v338_v0  ;;  %295 = vmatprep.subr.bf16.mxu1 %v338_v0  ;;  %v320_v1 = vld [vmem:[%s451_s1 + $0x38] sm:$0xff]   ;;  %v321_v2 = vld [vmem:[%s451_s1 + $0x30] sm:$0xff]   ;;  %v322_v3 = vld [vmem:[%s451_s1 + $0x28] sm:$0xff]  }
   0x2   :  { %144 = vmatpush1.bf16.msra.mxu0 %v320_v1  ;;  %307 = vmatpush1.bf16.msra.mxu1 %v320_v1  ;;  %v323_v4 = vld [vmem:[%s451_s1 + $0x20] sm:$0xff]   ;;  %v324_v6 = vld [vmem:[%s451_s1 + $0x18] sm:$0xff]   ;;  %v325_v8 = vld [vmem:[%s451_s1 + $0x10] sm:$0xff]   ;;  %v198_v18 = vshrl.u32 %v197_v17, 7 }
   0x3   :  { %145 = vmatprep.subr.bf16.mxu0 %v338_v0  ;;  %296 = vmatprep.subr.bf16.mxu1 %v338_v0  ;;  %v334_v5 = vld [vmem:[%s452_s0 + $0x4] ss:$8 sps:$4 sm:$0xff]   ;;  %v337_v7 = vld [vmem:[%s452_s0 + $0x14] ss:$8 sps:$4 sm:$0xff]   ;;  %v332_v15 = vld [vmem:[%s452_s0] ss:$8 sps:$4 sm:$0xff]  }
   0x4   :  { %265 = vmatprep.mubr.msk.bf16.mxu0 %vm136_vm0, %v334_v5  ;;  %266 = vmatprep.mubr.msk.bf16.mxu1 %vm136_vm0, %v337_v7  ;;  %v326_v9 = vld [vmem:[%s451_s1 + $0x8] sm:$0xff]   ;;  %v327_v10 = vld [vmem:[%s451_s1] sm:$0xff]   ;;  %v328_v11 = vld [vmem:[%s451_s1 + $0x58] sm:$0xff]   ;;  %v199_v19 = vsub.s32 0, %v198_v18  ;;  %v207_v21 = vsub.s32 1, %v198_v18 }
   0x5   :  { %v329_v12 = vld [vmem:[%s451_s1 + $0x50] sm:$0xff]   ;;  %v330_v13 = vld [vmem:[%s451_s1 + $0x48] sm:$0xff]   ;;  %v331_v14 = vld [vmem:[%s451_s1 + $0x40] sm:$0xff]  }
   0x6   :  { %146 = vmatpush1.bf16.msra.mxu0 %v321_v2  ;;  %308 = vmatpush1.bf16.msra.mxu1 %v321_v2  ;;  %v335_v16 = vld [vmem:[%s452_s0 + $0x10] ss:$8 sps:$4 sm:$0xff]   ;;  %v192_v20 = vld [vmem:[%s453_s2] sm:$0x3]  ;;  %v293_v27 = vld [vmem:[%s454_s3 + $0x8] sm:$0xff]  }
   0x7   :  { %147 = vmatprep.subr.bf16.mxu0 %v338_v0  ;;  %297 = vmatprep.subr.bf16.mxu1 %v338_v0  ;;  %v200_v22 = vrot.slane %v192_v20, %v199_v19  ;;  %v208_v23 = vrot.slane %v192_v20, %v207_v21  ;;  %v276_v25 = vld [vmem:[%s454_s3] sm:$0xff]   ;;  %v281_v34 = vunpack.c.l.bf16 %v293_v27  ;;  %v282_v40 = vunpack.c.h.bf16 %v293_v27 }
   0x8   :  { %v277_v32 = vunpack.c.l.bf16 %v276_v25  ;;  %v278_v38 = vunpack.c.h.bf16 %v276_v25 }
   0xa   :  { %148 = vmatpush1.bf16.msra.mxu0 %v322_v3  ;;  %309 = vmatpush1.bf16.msra.mxu1 %v322_v3 }
   0xb   :  { %149 = vmatprep.subr.bf16.mxu0 %v338_v0  ;;  %298 = vmatprep.subr.bf16.mxu1 %v338_v0 }
   0xe   :  { %150 = vmatpush1.bf16.msra.mxu0 %v323_v4  ;;  %310 = vmatpush1.bf16.msra.mxu1 %v323_v4 }
   0xf   :  { %151 = vmatprep.subr.bf16.mxu0 %v338_v0  ;;  %299 = vmatprep.subr.bf16.mxu1 %v338_v0 }
  0x12   :  { %152 = vmatpush1.bf16.msra.mxu0 %v324_v6  ;;  %311 = vmatpush1.bf16.msra.mxu1 %v324_v6 }
  0x13   :  { %153 = vmatprep.subr.bf16.mxu0 %v338_v0  ;;  %300 = vmatprep.subr.bf16.mxu1 %v338_v0 }
  0x16   :  { %154 = vmatpush1.bf16.msra.mxu0 %v325_v8  ;;  %312 = vmatpush1.bf16.msra.mxu1 %v325_v8 }
  0x17   :  { %155 = vmatprep.subr.bf16.mxu0 %v338_v0  ;;  %301 = vmatprep.subr.bf16.mxu1 %v338_v0 }
  0x1a   :  { %156 = vmatpush1.bf16.msra.mxu0 %v326_v9  ;;  %313 = vmatpush1.bf16.msra.mxu1 %v326_v9 }
  0x1b   :  { %157 = vmatprep.subr.bf16.mxu0 %v338_v0  ;;  %302 = vmatprep.subr.bf16.mxu1 %v338_v0 }
  0x1e   :  { %158 = vmatpush1.bf16.msra.mxu0 %v327_v10  ;;  %314 = vmatpush1.bf16.msra.mxu1 %v327_v10 }
  0x1f   :  { %167 = vmatprep.subr.bf16.mxu0 %v338_v0  ;;  %303 = vmatprep.subr.bf16.mxu1 %v338_v0 }
  0x22   :  { %168 = vmatpush2.bf16.msra.mxu0 %v328_v11  ;;  %315 = vmatpush2.bf16.msra.mxu1 %v328_v11 }
  0x23   :  { %169 = vmatprep.subr.bf16.mxu0 %v338_v0  ;;  %304 = vmatprep.subr.bf16.mxu1 %v338_v0 }
  0x26   :  { %170 = vmatpush2.bf16.msra.mxu0 %v329_v12  ;;  %316 = vmatpush2.bf16.msra.mxu1 %v329_v12 }
  0x27   :  { %171 = vmatprep.subr.bf16.mxu0 %v338_v0  ;;  %305 = vmatprep.subr.bf16.mxu1 %v338_v0 }
  0x2a   :  { %172 = vmatpush2.bf16.msra.mxu0 %v330_v13  ;;  %317 = vmatpush2.bf16.msra.mxu1 %v330_v13 }
  0x2b   :  { %173 = vmatprep.subr.bf16.mxu0 %v338_v0  ;;  %306 = vmatprep.subr.bf16.mxu1 %v338_v0 }
  0x2e   :  { %174 = vmatpush2.bf16.msra.mxu0 %v331_v14  ;;  %318 = vmatpush2.bf16.msra.mxu1 %v331_v14 }
  0x31   :  { %176 = vmatmul.mubr.bf16.vlgmr.msra.gmra.mxu0 %v332_v15  ;;  %184 = vmatmul.mubr.bf16.vlgmr.msra.gmra.mxu1 %v335_v16 }
  0xf1   :  { %v177_v24 = vpop.f32.mrf.mxu0  ;;  %v185_v26 = vpop.f32.mrf.mxu1 }
  0xf2   :  { %v201_v28 = vmul.f32 %v200_v22, %v177_v24  ;;  %v203_v29 = vmul.f32 %v200_v22, %v185_v26 }
  0xf3   :  { %v179_v30 = vpop.f32.mrf.mxu0  ;;  %v187_v31 = vpop.f32.mrf.mxu1 }
  0xf4   :  { %v209_v33 = vadd.f32 %v208_v23, %v201_v28  ;;  %v211_v35 = vadd.f32 %v208_v23, %v203_v29 }
  0xf5   :  { %v180_v36 = vpop.f32.mrf.mxu0  ;;  %v188_v37 = vpop.f32.mrf.mxu1 }
  0xf6   :  { %v202_v39 = vmul.f32 %v200_v22, %v180_v36  ;;  %v204_v41 = vmul.f32 %v200_v22, %v188_v37  ;;  %v217_v44 = vadd.f32 %v277_v32, %v209_v33  ;;  %v219_v45 = vadd.f32 %v281_v34, %v211_v35 }
  0xf7   :  { %v182_v42 = vpop.f32.mrf.mxu0  ;;  %v190_v43 = vpop.f32.mrf.mxu1 }
  0xf8   :  { %v210_v46 = vadd.f32 %v208_v23, %v202_v39  ;;  %v212_v47 = vadd.f32 %v208_v23, %v204_v41  ;;  %v221_v50 = vmax.f32 %v217_v44, 0.0  ;;  %v223_v51 = vmax.f32 %v219_v45, 0.0 }
  0xfa   :  { %v218_v48 = vadd.f32 %v278_v38, %v210_v46  ;;  %v220_v49 = vadd.f32 %v282_v40, %v212_v47 }
  0xfc   :  { %v222_v52 = vmax.f32 %v218_v48, 0.0  ;;  %v224_v53 = vmax.f32 %v220_v49, 0.0 }
  0xfe   :  { %v286_v54 = vpack.c.bf16 %v222_v52, %v221_v50  ;;  %v291_v55 = vpack.c.bf16 %v224_v53, %v223_v51 }
 0x100   :  { %287 = vst [vmem:[%s455_s4] sm:$0xff] %v286_v54   ;;  %294 = vst [vmem:[%s455_s4 + $0x8] sm:$0xff] %v291_v55  }

// kernel: tile.25
= control target key start
LH: loop header
LB: loop body
LE: loop exit
PB: predicated region body
PF: predicated region fallthrough
CT: control target
= control target key end

     0   :  { %s22_s0 = inlined_call_operand.vmem [shape: f32[64], index: 0, kind: input, shape index: {}]   ;;  %s23_s1 = inlined_call_operand.vmem [shape: f32[4,64], index: 1, kind: output, shape index: {}]  }
   0x1   :  { %v4_v0 = vld [vmem:[%s22_s0] ss:$0 sm:$0xff] }
   0x2   :  { %5 = vst [vmem:[%s23_s1] sm:$0xf] %v4_v0 }

// kernel: tile.27
= control target key start
LH: loop header
LB: loop body
LE: loop exit
PB: predicated region body
PF: predicated region fallthrough
CT: control target
= control target key end

     0   :  { %s7_s8 = smov 3  ;;  %vm9_vm0 = vcmask 523264   ;;  %s34_s9 = smov 64   ;;  %vm16_vm1 = vcmask 1048064   ;;  %s54_s0 = inlined_call_operand.vmem [shape: f32[4,64], index: 0, kind: input, shape index: {}]   ;;  %s55_s1 = inlined_call_operand.vmem [shape: f32[1,256], index: 1, kind: output, shape index: {}]  }
   0x1   :  { %v5_v0 = vld [vmem:[%s54_s0] sm:$0xf]  ;;  %s12_s0 = smov 3 }
   0x2   :  { %6 = vst [vmem:[#allocation1] sm:$0xf] %v5_v0 }
   0x9   :  { %v13_v1 = vld [vmem:[#allocation1 + $0x1] ss:$2 sm:%s12_s0]   ;;  %v8_v2 = vld [vmem:[#allocation1] ss:$2 sm:%s7_s8]  }
   0xa   :  { %14 = vrot.lane.b32.xlu0 %v13_v1, %s34_s9  ;;  %10 = vst.msk [vmem:[#allocation0] ss:$8 sm:$0x3] %vm9_vm0, %v8_v2  }
  0x7c   :  { %v15_v3 = vpop.permute.xlu0 %14  }
  0x7d   :  { %17 = vst.msk [vmem:[#allocation0] ss:$8 sm:$0x3] %vm16_vm1, %v15_v3  }
  0x84   :  { %v22_v4 = vld [vmem:[#allocation0] sm:$0x1]  ;;  %v27_v5 = vld [vmem:[#allocation0 + $0x8] sm:$0x1] }
  0x85   :  { %25 = vst [vmem:[%s55_s1] sm:$0x1] %v22_v4  ;;  %32 = vst [vmem:[%s55_s1 + $0x1] sm:$0x1] %v27_v5 }

// kernel: _lambda_.102
= control target key start
LH: loop header
LB: loop body
LE: loop exit
PB: predicated region body
PF: predicated region fallthrough
CT: control target
= control target key end

     0   :  { %v647_v34 = vmov 0.0   ;;  %vm648_vm0 = vmmov 0   ;;  %vm334_vm1 = vcmask 523264   ;;  %v462_v44 = vlaneseq  ;;  %s798_s1 = inlined_call_operand.vmem [shape: bf16[576,128], index: 1, kind: input, shape index: {}]   ;;  %s799_s0 = inlined_call_operand.vmem [shape: bf16[16,576], index: 0, kind: input, shape index: {}]   ;;  %s800_s2 = inlined_call_operand.vmem [shape: f32[2,128], index: 2, kind: input, shape index: {}]   ;;  %s801_s3 = inlined_call_operand.vmem [shape: bf16[16,128], index: 3, kind: output, shape index: {}]  }
   0x1   :  { %v604_v0 = vld [vmem:[%s798_s1 + $0x78] sm:$0xff]   ;;  %v608_v4 = vld [vmem:[%s798_s1 + $0x70] sm:$0xff]   ;;  %v612_v8 = vld [vmem:[%s798_s1 + $0x68] sm:$0xff]  }
   0x2   :  { %v605_v1 = vld [vmem:[%s798_s1 + $0xf8] sm:$0xff]   ;;  %541 = vmatprep.subr.bf16.mxu0 %v604_v0  ;;  %v609_v5 = vld [vmem:[%s798_s1 + $0xf0] sm:$0xff]   ;;  %v613_v9 = vld [vmem:[%s798_s1 + $0xe8] sm:$0xff]   ;;  %v463_v47 = vshrl.u32 %v462_v44, 7 }
   0x3   :  { %v606_v2 = vld [vmem:[%s798_s1 + $0x38] sm:$0xff]   ;;  %563 = vmatprep.subr.bf16.mxu1 %v605_v1  ;;  %v610_v6 = vld [vmem:[%s798_s1 + $0x30] sm:$0xff]   ;;  %v614_v10 = vld [vmem:[%s798_s1 + $0x28] sm:$0xff]  }
   0x4   :  { %v607_v3 = vld [vmem:[%s798_s1 + $0xb8] sm:$0xff]   ;;  %542 = vmatpush3.bf16.msra.mxu0 %v606_v2  ;;  %v611_v7 = vld [vmem:[%s798_s1 + $0xb0] sm:$0xff]   ;;  %v615_v11 = vld [vmem:[%s798_s1 + $0xa8] sm:$0xff]   ;;  %v464_v50 = vsub.s32 0, %v463_v47  ;;  %v470_v60 = vsub.s32 1, %v463_v47 }
   0x5   :  { %564 = vmatpush3.bf16.msra.mxu1 %v607_v3  ;;  %543 = vmatprep.subr.bf16.mxu0 %v608_v4  ;;  %v616_v12 = vld [vmem:[%s798_s1 + $0x60] sm:$0xff]   ;;  %v620_v16 = vld [vmem:[%s798_s1 + $0x58] sm:$0xff]   ;;  %v624_v20 = vld [vmem:[%s798_s1 + $0x50] sm:$0xff]  }
   0x6   :  { %565 = vmatprep.subr.bf16.mxu1 %v609_v5  ;;  %v617_v13 = vld [vmem:[%s798_s1 + $0xe0] sm:$0xff]   ;;  %v621_v17 = vld [vmem:[%s798_s1 + $0xd8] sm:$0xff]   ;;  %v625_v21 = vld [vmem:[%s798_s1 + $0xd0] sm:$0xff]  }
   0x7   :  { %v618_v14 = vld [vmem:[%s798_s1 + $0x20] sm:$0xff]   ;;  %v622_v18 = vld [vmem:[%s798_s1 + $0x18] sm:$0xff]   ;;  %v626_v22 = vld [vmem:[%s798_s1 + $0x10] sm:$0xff]  }
   0x8   :  { %544 = vmatpush3.bf16.msra.mxu0 %v610_v6  ;;  %v619_v15 = vld [vmem:[%s798_s1 + $0xa0] sm:$0xff]   ;;  %v623_v19 = vld [vmem:[%s798_s1 + $0x98] sm:$0xff]   ;;  %v627_v23 = vld [vmem:[%s798_s1 + $0x90] sm:$0xff]  }
   0x9   :  { %566 = vmatpush3.bf16.msra.mxu1 %v611_v7  ;;  %545 = vmatprep.subr.bf16.mxu0 %v612_v8  ;;  %v628_v24 = vld [vmem:[%s798_s1 + $0x48] sm:$0xff]   ;;  %v632_v28 = vld [vmem:[%s798_s1 + $0x40] sm:$0xff]   ;;  %v642_v37 = vld [vmem:[%s798_s1 + $0x118] sm:$0xff]  }
   0xa   :  { %567 = vmatprep.subr.bf16.mxu1 %v613_v9  ;;  %v629_v25 = vld [vmem:[%s798_s1 + $0xc8] sm:$0xff]   ;;  %v633_v29 = vld [vmem:[%s798_s1 + $0xc0] sm:$0xff]   ;;  %v643_v38 = vld [vmem:[%s798_s1 + $0x110] sm:$0xff]  }
   0xb   :  { %v630_v26 = vld [vmem:[%s798_s1 + $0x8] sm:$0xff]   ;;  %v634_v30 = vld [vmem:[%s798_s1] sm:$0xff]  }
   0xc   :  { %546 = vmatpush3.bf16.msra.mxu0 %v614_v10  ;;  %v631_v27 = vld [vmem:[%s798_s1 + $0x88] sm:$0xff]   ;;  %v635_v31 = vld [vmem:[%s798_s1 + $0x80] sm:$0xff]  }
   0xd   :  { %568 = vmatpush3.bf16.msra.mxu1 %v615_v11  ;;  %547 = vmatprep.subr.bf16.mxu0 %v616_v12  ;;  %v636_v32 = vld [vmem:[%s799_s0] ss:$20 sps:$4 sm:$0xff]   ;;  %v638_v33 = vld [vmem:[%s799_s0 + $0x4] ss:$20 sps:$4 sm:$0xff]   ;;  %v639_v35 = vld [vmem:[%s799_s0 + $0x8] ss:$20 sps:$4 sm:$0xff]  }
   0xe   :  { %569 = vmatprep.subr.bf16.mxu1 %v617_v13  ;;  %v641_v36 = vld [vmem:[%s799_s0 + $0xc] ss:$20 sps:$4 sm:$0xff]   ;;  %370 = vmatprep.mubr.bf16.mxu0 %v638_v33  ;;  %v646_v41 = vld [vmem:[%s799_s0 + $0x10] ss:$20 sps:$4 sm:$0xff]  }
   0xf   :  { %411 = vmatprep.mubr.bf16.mxu1 %v641_v36  ;;  %v644_v39 = vld [vmem:[%s798_s1 + $0x108] sm:$0xff]   ;;  %v645_v40 = vld [vmem:[%s798_s1 + $0x100] sm:$0xff]  }
  0x10   :  { %548 = vmatpush3.bf16.msra.mxu0 %v618_v14  ;;  %v461_v53 = vld [vmem:[%s800_s2] sm:$0x3] }
  0x11   :  { %570 = vmatpush3.bf16.msra.mxu1 %v619_v15  ;;  %549 = vmatprep.subr.bf16.mxu0 %v620_v16  ;;  %v465_v56 = vrot.slane %v461_v53, %v464_v50  ;;  %v471_v1 = vrot.slane %v461_v53, %v470_v60 }
  0x12   :  { %571 = vmatprep.subr.bf16.mxu1 %v621_v17 }
  0x14   :  { %550 = vmatpush3.bf16.msra.mxu0 %v622_v18 }
  0x15   :  { %572 = vmatpush3.bf16.msra.mxu1 %v623_v19  ;;  %551 = vmatprep.subr.bf16.mxu0 %v624_v20 }
  0x16   :  { %573 = vmatprep.subr.bf16.mxu1 %v625_v21 }
  0x18   :  { %552 = vmatpush3.bf16.msra.mxu0 %v626_v22 }
  0x19   :  { %574 = vmatpush3.bf16.msra.mxu1 %v627_v23  ;;  %553 = vmatprep.subr.bf16.mxu0 %v628_v24 }
  0x1a   :  { %575 = vmatprep.subr.bf16.mxu1 %v629_v25 }
  0x1c   :  { %554 = vmatpush3.bf16.msra.mxu0 %v630_v26 }
  0x1d   :  { %576 = vmatpush3.bf16.msra.mxu1 %v631_v27  ;;  %555 = vmatprep.subr.bf16.mxu0 %v632_v28 }
  0x1e   :  { %577 = vmatprep.subr.bf16.mxu1 %v633_v29 }
  0x20   :  { %556 = vmatpush3.bf16.msra.mxu0 %v634_v30 }
  0x21   :  { %578 = vmatpush3.bf16.msra.mxu1 %v635_v31  ;;  %590 = vmatprep.subr.bf16.mxu0 %v647_v34 }
  0x23   :  { %371 = vmatmul.mubr.bf16.vlgmr.msra.gmra.mxu0 %v636_v32 }
  0x24   :  { %412 = vmatmul.mubr.bf16.vlgmr.msra.gmra.mxu1 %v639_v35  ;;  %591 = vmatpush3.bf16.msra.mxu0 %v642_v37 }
  0x25   :  { %592 = vmatprep.subr.bf16.mxu0 %v647_v34  ;;  %598 = vmatprep.mubr.msk.bf16.mxu0 %vm648_vm0, %v647_v34 }
  0x28   :  { %593 = vmatpush3.bf16.msra.mxu0 %v643_v38 }
  0x29   :  { %594 = vmatprep.subr.bf16.mxu0 %v647_v34 }
  0x2c   :  { %595 = vmatpush3.bf16.msra.mxu0 %v644_v39 }
  0x2d   :  { %596 = vmatprep.subr.bf16.mxu0 %v647_v34 }
  0x30   :  { %597 = vmatpush3.bf16.msra.mxu0 %v645_v40 }
  0x33   :  { %599 = vmatmul.mubr.msk.bf16.vlgmr.msra.gmra.mxu0 %vm334_vm1, %v646_v41 }
  0xe3   :  { %v557_v42 = vpop.f32.mrf.mxu0 }
  0xe4   :  { %v579_v43 = vpop.f32.mrf.mxu1 }
  0xe5   :  { %v558_v45 = vpop.f32.mrf.mxu0 }
  0xe6   :  { %v580_v46 = vpop.f32.mrf.mxu1  ;;  %v559_v51 = vadd.f32 %v558_v45, %v557_v42 }
  0xe7   :  { %v560_v48 = vpop.f32.mrf.mxu0  ;;  %v581_v52 = vadd.f32 %v580_v46, %v579_v43 }
  0xe8   :  { %v582_v49 = vpop.f32.mrf.mxu1 }
  0xe9   :  { %v561_v54 = vpop.f32.mrf.mxu0  ;;  %v414_v59 = vadd.f32 %v581_v52, %v559_v51 }
  0xea   :  { %v583_v55 = vpop.f32.mrf.mxu1  ;;  %v562_v57 = vadd.f32 %v561_v54, %v560_v48 }
  0xeb   :  { %v584_v58 = vadd.f32 %v583_v55, %v582_v49 }
  0xed   :  { %v417_v2 = vadd.f32 %v584_v58, %v562_v57 }
  0xf3   :  { %v454_v61 = vpop.f32.mrf.mxu0 }
  0xf4   :  { %v455_v62 = vadd.f32 %v454_v61, %v414_v59 }
  0xf5   :  { %v600_v63 = vpop.f32.mrf.mxu0 }
  0xf6   :  { %v466_v0 = vmul.f32 %v465_v56, %v455_v62 }
  0xf7   :  { %v457_v3 = vpop.f32.mrf.mxu0 }
  0xf8   :  { %v458_v4 = vadd.f32 %v457_v3, %v417_v2  ;;  %v472_v6 = vadd.f32 %v471_v1, %v466_v0 }
  0xf9   :  { %v601_v5 = vpop.f32.mrf.mxu0 }
  0xfa   :  { %v467_v7 = vmul.f32 %v465_v56, %v458_v4  ;;  %v474_v9 = vmax.f32 %v472_v6, 0.0 }
  0xfc   :  { %v473_v8 = vadd.f32 %v471_v1, %v467_v7 }
  0xfe   :  { %v475_v10 = vmax.f32 %v473_v8, 0.0 }
 0x100   :  { %v539_v11 = vpack.c.bf16 %v475_v10, %v474_v9 }
 0x102   :  { %540 = vst [vmem:[%s801_s3] sm:$0xff] %v539_v11  }

// kernel: _lambda_.104
= control target key start
LH: loop header
LB: loop body
LE: loop exit
PB: predicated region body
PF: predicated region fallthrough
CT: control target
= control target key end

     0   :  { %v455_v0 = vmov 0.0   ;;  %vm456_vm0 = vmmov 0   ;;  %v310_v28 = vlaneseq  ;;  %s564_s1 = inlined_call_operand.vmem [shape: bf16[384,128], index: 1, kind: input, shape index: {}]   ;;  %s565_s0 = inlined_call_operand.vmem [shape: bf16[16,384], index: 0, kind: input, shape index: {}]   ;;  %s566_s2 = inlined_call_operand.vmem [shape: f32[2,128], index: 2, kind: input, shape index: {}]   ;;  %s567_s3 = inlined_call_operand.vmem [shape: bf16[16,128], index: 3, kind: output, shape index: {}]  }
   0x1   :  { %405 = vmatprep.subr.bf16.mxu1 %v455_v0  ;;  %v427_v1 = vld [vmem:[%s564_s1 + $0x78] sm:$0xff]   ;;  %421 = vmatprep.mubr.msk.bf16.mxu1 %vm456_vm0, %v455_v0  ;;  %v430_v4 = vld [vmem:[%s564_s1 + $0x70] sm:$0xff]   ;;  %v433_v7 = vld [vmem:[%s564_s1 + $0x68] sm:$0xff]  }
   0x2   :  { %v428_v2 = vld [vmem:[%s564_s1 + $0xb8] sm:$0xff]   ;;  %374 = vmatprep.subr.bf16.mxu0 %v427_v1  ;;  %v431_v5 = vld [vmem:[%s564_s1 + $0xb0] sm:$0xff]   ;;  %v434_v8 = vld [vmem:[%s564_s1 + $0xa8] sm:$0xff]   ;;  %v311_v29 = vshrl.u32 %v310_v28, 7 }
   0x3   :  { %v429_v3 = vld [vmem:[%s564_s1 + $0x38] sm:$0xff]   ;;  %406 = vmatpush3.bf16.msra.mxu1 %v428_v2  ;;  %v432_v6 = vld [vmem:[%s564_s1 + $0x30] sm:$0xff]   ;;  %v435_v9 = vld [vmem:[%s564_s1 + $0x28] sm:$0xff]  }
   0x4   :  { %375 = vmatpush3.bf16.msra.mxu0 %v429_v3  ;;  %407 = vmatprep.subr.bf16.mxu1 %v455_v0  ;;  %v436_v10 = vld [vmem:[%s564_s1 + $0x60] sm:$0xff]   ;;  %v439_v13 = vld [vmem:[%s564_s1 + $0x58] sm:$0xff]   ;;  %v442_v16 = vld [vmem:[%s564_s1 + $0x50] sm:$0xff]   ;;  %v312_v31 = vsub.s32 0, %v311_v29  ;;  %v318_v38 = vsub.s32 1, %v311_v29 }
   0x5   :  { %376 = vmatprep.subr.bf16.mxu0 %v430_v4  ;;  %v437_v11 = vld [vmem:[%s564_s1 + $0xa0] sm:$0xff]   ;;  %v440_v14 = vld [vmem:[%s564_s1 + $0x98] sm:$0xff]   ;;  %v443_v17 = vld [vmem:[%s564_s1 + $0x90] sm:$0xff]  }
   0x6   :  { %v438_v12 = vld [vmem:[%s564_s1 + $0x20] sm:$0xff]   ;;  %v441_v15 = vld [vmem:[%s564_s1 + $0x18] sm:$0xff]   ;;  %v444_v18 = vld [vmem:[%s564_s1 + $0x10] sm:$0xff]  }
   0x7   :  { %408 = vmatpush3.bf16.msra.mxu1 %v431_v5  ;;  %v445_v19 = vld [vmem:[%s564_s1 + $0x48] sm:$0xff]   ;;  %v448_v22 = vld [vmem:[%s564_s1 + $0x40] sm:$0xff]  }
   0x8   :  { %377 = vmatpush3.bf16.msra.mxu0 %v432_v6  ;;  %409 = vmatprep.subr.bf16.mxu1 %v455_v0  ;;  %v446_v20 = vld [vmem:[%s564_s1 + $0x88] sm:$0xff]   ;;  %v453_v23 = vld [vmem:[%s565_s0 + $0x4] ss:$12 sps:$4 sm:$0xff]   ;;  %v309_v33 = vld [vmem:[%s566_s2] sm:$0x3] }
   0x9   :  { %378 = vmatprep.subr.bf16.mxu0 %v433_v7  ;;  %v447_v21 = vld [vmem:[%s564_s1 + $0x8] sm:$0xff]   ;;  %v449_v24 = vld [vmem:[%s564_s1 + $0x80] sm:$0xff]   ;;  %259 = vmatprep.mubr.bf16.mxu0 %v453_v23  ;;  %v313_v37 = vrot.slane %v309_v33, %v312_v31  ;;  %v319_v45 = vrot.slane %v309_v33, %v318_v38 }
   0xa   :  { %v450_v25 = vld [vmem:[%s564_s1] sm:$0xff]   ;;  %v454_v26 = vld [vmem:[%s565_s0 + $0x8] ss:$12 sps:$4 sm:$0xff]  }
   0xb   :  { %410 = vmatpush3.bf16.msra.mxu1 %v434_v8  ;;  %v451_v27 = vld [vmem:[%s565_s0] ss:$12 sps:$4 sm:$0xff]  }
   0xc   :  { %379 = vmatpush3.bf16.msra.mxu0 %v435_v9  ;;  %411 = vmatprep.subr.bf16.mxu1 %v455_v0 }
   0xd   :  { %380 = vmatprep.subr.bf16.mxu0 %v436_v10 }
   0xf   :  { %412 = vmatpush3.bf16.msra.mxu1 %v437_v11 }
  0x10   :  { %381 = vmatpush3.bf16.msra.mxu0 %v438_v12  ;;  %413 = vmatprep.subr.bf16.mxu1 %v455_v0 }
  0x11   :  { %382 = vmatprep.subr.bf16.mxu0 %v439_v13 }
  0x13   :  { %414 = vmatpush3.bf16.msra.mxu1 %v440_v14 }
  0x14   :  { %383 = vmatpush3.bf16.msra.mxu0 %v441_v15  ;;  %415 = vmatprep.subr.bf16.mxu1 %v455_v0 }
  0x15   :  { %384 = vmatprep.subr.bf16.mxu0 %v442_v16 }
  0x17   :  { %416 = vmatpush3.bf16.msra.mxu1 %v443_v17 }
  0x18   :  { %385 = vmatpush3.bf16.msra.mxu0 %v444_v18  ;;  %417 = vmatprep.subr.bf16.mxu1 %v455_v0 }
  0x19   :  { %386 = vmatprep.subr.bf16.mxu0 %v445_v19 }
  0x1b   :  { %418 = vmatpush3.bf16.msra.mxu1 %v446_v20 }
  0x1c   :  { %387 = vmatpush3.bf16.msra.mxu0 %v447_v21  ;;  %419 = vmatprep.subr.bf16.mxu1 %v455_v0 }
  0x1d   :  { %388 = vmatprep.subr.bf16.mxu0 %v448_v22 }
  0x1f   :  { %420 = vmatpush3.bf16.msra.mxu1 %v449_v24 }
  0x20   :  { %389 = vmatpush3.bf16.msra.mxu0 %v450_v25 }
  0x22   :  { %422 = vmatmul.mubr.bf16.vlgmr.msra.gmra.mxu1 %v454_v26 }
  0x23   :  { %260 = vmatmul.mubr.bf16.vlgmr.msra.gmra.mxu0 %v451_v27 }
  0xe2   :  { %v302_v30 = vpop.f32.mrf.mxu1 }
  0xe3   :  { %v390_v32 = vpop.f32.mrf.mxu0 }
  0xe4   :  { %v423_v34 = vpop.f32.mrf.mxu1 }
  0xe5   :  { %v391_v35 = vpop.f32.mrf.mxu0 }
  0xe6   :  { %v392_v36 = vadd.f32 %v391_v35, %v390_v32  ;;  %v305_v39 = vpop.f32.mrf.mxu1 }
  0xe7   :  { %v393_v40 = vpop.f32.mrf.mxu0 }
  0xe8   :  { %v303_v41 = vadd.f32 %v392_v36, %v302_v30  ;;  %v424_v42 = vpop.f32.mrf.mxu1 }
  0xe9   :  { %v394_v43 = vpop.f32.mrf.mxu0 }
  0xea   :  { %v314_v44 = vmul.f32 %v313_v37, %v303_v41  ;;  %v395_v46 = vadd.f32 %v394_v43, %v393_v40 }
  0xec   :  { %v306_v47 = vadd.f32 %v395_v46, %v305_v39  ;;  %v320_v48 = vadd.f32 %v319_v45, %v314_v44 }
  0xee   :  { %v315_v49 = vmul.f32 %v313_v37, %v306_v47  ;;  %v322_v51 = vmax.f32 %v320_v48, 0.0 }
  0xf0   :  { %v321_v50 = vadd.f32 %v319_v45, %v315_v49 }
  0xf2   :  { %v323_v52 = vmax.f32 %v321_v50, 0.0 }
  0xf4   :  { %v372_v53 = vpack.c.bf16 %v323_v52, %v322_v51 }
  0xf6   :  { %373 = vst [vmem:[%s567_s3] sm:$0xff] %v372_v53  }

// kernel: tile.33
= control target key start
LH: loop header
LB: loop body
LE: loop exit
PB: predicated region body
PF: predicated region fallthrough
CT: control target
= control target key end

     0   :  { %s22_s0 = inlined_call_operand.vmem [shape: f32[16], index: 0, kind: input, shape index: {}]   ;;  %s23_s1 = inlined_call_operand.vmem [shape: f32[4,16], index: 1, kind: output, shape index: {}]  }
   0x1   :  { %v4_v0 = vld [vmem:[%s22_s0] ss:$0 sm:$0xff] }
   0x2   :  { %5 = vst [vmem:[%s23_s1] sm:$0xf] %v4_v0 }

// kernel: _lambda_.107
= control target key start
LH: loop header
LB: loop body
LE: loop exit
PB: predicated region body
PF: predicated region fallthrough
CT: control target
= control target key end

     0   :  { %v468_v0 = vmov 0.0   ;;  %vm469_vm0 = vmmov 0   ;;  %v315_v28 = vlaneseq  ;;  %s585_s1 = inlined_call_operand.vmem [shape: bf16[384,128], index: 1, kind: input, shape index: {}]   ;;  %s586_s0 = inlined_call_operand.vmem [shape: bf16[16,384], index: 0, kind: input, shape index: {}]   ;;  %s587_s2 = inlined_call_operand.vmem [shape: f32[2,128], index: 2, kind: input, shape index: {}]   ;;  %s588_s3 = inlined_call_operand.vmem [shape: bf16[16,128], index: 3, kind: input, shape index: {}]   ;;  %s589_s4 = inlined_call_operand.vmem [shape: bf16[16,128], index: 4, kind: output, shape index: {}]  }
   0x1   :  { %418 = vmatprep.subr.bf16.mxu1 %v468_v0  ;;  %v440_v1 = vld [vmem:[%s585_s1 + $0x78] sm:$0xff]   ;;  %434 = vmatprep.mubr.msk.bf16.mxu1 %vm469_vm0, %v468_v0  ;;  %v443_v4 = vld [vmem:[%s585_s1 + $0x70] sm:$0xff]   ;;  %v446_v7 = vld [vmem:[%s585_s1 + $0x68] sm:$0xff]  }
   0x2   :  { %v441_v2 = vld [vmem:[%s585_s1 + $0xb8] sm:$0xff]   ;;  %387 = vmatprep.subr.bf16.mxu0 %v440_v1  ;;  %v444_v5 = vld [vmem:[%s585_s1 + $0xb0] sm:$0xff]   ;;  %v447_v8 = vld [vmem:[%s585_s1 + $0xa8] sm:$0xff]   ;;  %v316_v29 = vshrl.u32 %v315_v28, 7 }
   0x3   :  { %v442_v3 = vld [vmem:[%s585_s1 + $0x38] sm:$0xff]   ;;  %419 = vmatpush3.bf16.msra.mxu1 %v441_v2  ;;  %v445_v6 = vld [vmem:[%s585_s1 + $0x30] sm:$0xff]   ;;  %v448_v9 = vld [vmem:[%s585_s1 + $0x28] sm:$0xff]  }
   0x4   :  { %388 = vmatpush3.bf16.msra.mxu0 %v442_v3  ;;  %420 = vmatprep.subr.bf16.mxu1 %v468_v0  ;;  %v449_v10 = vld [vmem:[%s585_s1 + $0x60] sm:$0xff]   ;;  %v452_v13 = vld [vmem:[%s585_s1 + $0x58] sm:$0xff]   ;;  %v455_v16 = vld [vmem:[%s585_s1 + $0x50] sm:$0xff]   ;;  %v317_v31 = vsub.s32 0, %v316_v29  ;;  %v323_v35 = vsub.s32 1, %v316_v29 }
   0x5   :  { %389 = vmatprep.subr.bf16.mxu0 %v443_v4  ;;  %v450_v11 = vld [vmem:[%s585_s1 + $0xa0] sm:$0xff]   ;;  %v453_v14 = vld [vmem:[%s585_s1 + $0x98] sm:$0xff]   ;;  %v456_v17 = vld [vmem:[%s585_s1 + $0x90] sm:$0xff]  }
   0x6   :  { %v451_v12 = vld [vmem:[%s585_s1 + $0x20] sm:$0xff]   ;;  %v454_v15 = vld [vmem:[%s585_s1 + $0x18] sm:$0xff]   ;;  %v457_v18 = vld [vmem:[%s585_s1 + $0x10] sm:$0xff]  }
   0x7   :  { %421 = vmatpush3.bf16.msra.mxu1 %v444_v5  ;;  %v458_v19 = vld [vmem:[%s585_s1 + $0x48] sm:$0xff]   ;;  %v461_v22 = vld [vmem:[%s585_s1 + $0x40] sm:$0xff]  }
   0x8   :  { %390 = vmatpush3.bf16.msra.mxu0 %v445_v6  ;;  %422 = vmatprep.subr.bf16.mxu1 %v468_v0  ;;  %v459_v20 = vld [vmem:[%s585_s1 + $0x88] sm:$0xff]   ;;  %v466_v23 = vld [vmem:[%s586_s0 + $0x4] ss:$12 sps:$4 sm:$0xff]   ;;  %v312_v33 = vld [vmem:[%s587_s2] sm:$0x3] }
   0x9   :  { %391 = vmatprep.subr.bf16.mxu0 %v446_v7  ;;  %v460_v21 = vld [vmem:[%s585_s1 + $0x8] sm:$0xff]   ;;  %v462_v24 = vld [vmem:[%s585_s1 + $0x80] sm:$0xff]   ;;  %262 = vmatprep.mubr.bf16.mxu0 %v466_v23  ;;  %v318_v38 = vrot.slane %v312_v33, %v317_v31  ;;  %v324_v42 = vrot.slane %v312_v33, %v323_v35 }
   0xa   :  { %v463_v25 = vld [vmem:[%s585_s1] sm:$0xff]   ;;  %v467_v26 = vld [vmem:[%s586_s0 + $0x8] ss:$12 sps:$4 sm:$0xff]  }
   0xb   :  { %423 = vmatpush3.bf16.msra.mxu1 %v447_v8  ;;  %v464_v27 = vld [vmem:[%s586_s0] ss:$12 sps:$4 sm:$0xff]  }
   0xc   :  { %392 = vmatpush3.bf16.msra.mxu0 %v448_v9  ;;  %424 = vmatprep.subr.bf16.mxu1 %v468_v0  ;;  %v379_v44 = vld [vmem:[%s588_s3] sm:$0xff]  }
   0xd   :  { %393 = vmatprep.subr.bf16.mxu0 %v449_v10  ;;  %v380_v48 = vunpack.c.l.bf16 %v379_v44  ;;  %v381_v51 = vunpack.c.h.bf16 %v379_v44 }
   0xf   :  { %425 = vmatpush3.bf16.msra.mxu1 %v450_v11 }
  0x10   :  { %394 = vmatpush3.bf16.msra.mxu0 %v451_v12  ;;  %426 = vmatprep.subr.bf16.mxu1 %v468_v0 }
  0x11   :  { %395 = vmatprep.subr.bf16.mxu0 %v452_v13 }
  0x13   :  { %427 = vmatpush3.bf16.msra.mxu1 %v453_v14 }
  0x14   :  { %396 = vmatpush3.bf16.msra.mxu0 %v454_v15  ;;  %428 = vmatprep.subr.bf16.mxu1 %v468_v0 }
  0x15   :  { %397 = vmatprep.subr.bf16.mxu0 %v455_v16 }
  0x17   :  { %429 = vmatpush3.bf16.msra.mxu1 %v456_v17 }
  0x18   :  { %398 = vmatpush3.bf16.msra.mxu0 %v457_v18  ;;  %430 = vmatprep.subr.bf16.mxu1 %v468_v0 }
  0x19   :  { %399 = vmatprep.subr.bf16.mxu0 %v458_v19 }
  0x1b   :  { %431 = vmatpush3.bf16.msra.mxu1 %v459_v20 }
  0x1c   :  { %400 = vmatpush3.bf16.msra.mxu0 %v460_v21  ;;  %432 = vmatprep.subr.bf16.mxu1 %v468_v0 }
  0x1d   :  { %401 = vmatprep.subr.bf16.mxu0 %v461_v22 }
  0x1f   :  { %433 = vmatpush3.bf16.msra.mxu1 %v462_v24 }
  0x20   :  { %402 = vmatpush3.bf16.msra.mxu0 %v463_v25 }
  0x22   :  { %435 = vmatmul.mubr.bf16.vlgmr.msra.gmra.mxu1 %v467_v26 }
  0x23   :  { %263 = vmatmul.mubr.bf16.vlgmr.msra.gmra.mxu0 %v464_v27 }
  0xe2   :  { %v305_v30 = vpop.f32.mrf.mxu1 }
  0xe3   :  { %v403_v32 = vpop.f32.mrf.mxu0 }
  0xe4   :  { %v436_v34 = vpop.f32.mrf.mxu1 }
  0xe5   :  { %v404_v36 = vpop.f32.mrf.mxu0 }
  0xe6   :  { %v405_v37 = vadd.f32 %v404_v36, %v403_v32  ;;  %v308_v39 = vpop.f32.mrf.mxu1 }
  0xe7   :  { %v406_v40 = vpop.f32.mrf.mxu0 }
  0xe8   :  { %v306_v41 = vadd.f32 %v405_v37, %v305_v30  ;;  %v437_v43 = vpop.f32.mrf.mxu1 }
  0xe9   :  { %v407_v45 = vpop.f32.mrf.mxu0 }
  0xea   :  { %v319_v46 = vmul.f32 %v318_v38, %v306_v41  ;;  %v408_v47 = vadd.f32 %v407_v45, %v406_v40 }
  0xec   :  { %v325_v49 = vadd.f32 %v324_v42, %v319_v46  ;;  %v309_v50 = vadd.f32 %v408_v47, %v308_v39 }
  0xee   :  { %v320_v52 = vmul.f32 %v318_v38, %v309_v50  ;;  %v329_v53 = vadd.f32 %v380_v48, %v325_v49 }
  0xf0   :  { %v326_v54 = vadd.f32 %v324_v42, %v320_v52  ;;  %v331_v56 = vmax.f32 %v329_v53, 0.0 }
  0xf2   :  { %v330_v55 = vadd.f32 %v381_v51, %v326_v54 }
  0xf4   :  { %v332_v57 = vmax.f32 %v330_v55, 0.0 }
  0xf6   :  { %v385_v58 = vpack.c.bf16 %v332_v57, %v331_v56 }
  0xf8   :  { %386 = vst [vmem:[%s589_s4] sm:$0xff] %v385_v58  }

// kernel: tile.35
= control target key start
LH: loop header
LB: loop body
LE: loop exit
PB: predicated region body
PF: predicated region fallthrough
CT: control target
= control target key end

     0   :  { %vm8_vm0 = vcmask 130048   ;;  %s40_s8 = smov 16   ;;  %s41_s9 = smov 32   ;;  %vm14_vm1 = vcmask 523648   ;;  %vm20_vm2 = vcmask 392448   ;;  %vm26_vm3 = vcmask 261248   ;;  %s58_s0 = inlined_call_operand.vmem [shape: f32[4,16], index: 0, kind: input, shape index: {}]   ;;  %s59_s1 = inlined_call_operand.vmem [shape: f32[1,64], index: 1, kind: output, shape index: {}]  }
   0x1   :  { %v5_v0 = vld [vmem:[%s58_s0] sm:$0xf]  ;;  %s39_s0 = smov 48  }
   0x2   :  { %6 = vst [vmem:[#allocation1] sm:$0xf] %v5_v0 }
   0x9   :  { %v11_v1 = vld [vmem:[#allocation1 + $0x3] sm:$0x1]   ;;  %v23_v2 = vld [vmem:[#allocation1 + $0x1] sm:$0x1]   ;;  %v7_v3 = vld [vmem:[#allocation1] sm:$0x1]  }
   0xa   :  { %12 = vrot.lane.b32.xlu0 %v11_v1, %s39_s0  ;;  %24 = vrot.lane.b32.xlu1 %v23_v2, %s40_s8  ;;  %v17_v4 = vld [vmem:[#allocation1 + $0x2] sm:$0x1]   ;;  %9 = vst.msk [vmem:[#allocation0] sm:$0x1] %vm8_vm0, %v7_v3  }
   0xe   :  { %18 = vrot.lane.b32.xlu0 %v17_v4, %s41_s9 }
  0x7c   :  { %v13_v5 = vpop.permute.xlu0 %12   ;;  %v25_v6 = vpop.permute.xlu1 %24  }
  0x7d   :  { %15 = vst.msk [vmem:[#allocation0] sm:$0x1] %vm14_vm1, %v13_v5  }
  0x80   :  { %v19_v7 = vpop.permute.xlu0 %18  }
  0x81   :  { %21 = vst.msk [vmem:[#allocation0] sm:$0x1] %vm20_vm2, %v19_v7  }
  0x82   :  { %27 = vst.msk [vmem:[#allocation0] sm:$0x1] %vm26_vm3, %v25_v6  }
  0x89   :  { %v32_v8 = vld [vmem:[#allocation0] sm:$0x1] }
  0x8a   :  { %35 = vst [vmem:[%s59_s1] sm:$0x1] %v32_v8 }

// kernel: _lambda_.137
= control target key start
LH: loop header
LB: loop body
LE: loop exit
PB: predicated region body
PF: predicated region fallthrough
CT: control target
= control target key end

     0   :  { %s983_s1 = inlined_call_operand.vmem [shape: bf16[512,256], index: 1, kind: input, shape index: {}]   ;;  %s984_s0 = inlined_call_operand.vmem [shape: bf16[16,512], index: 0, kind: input, shape index: {}]   ;;  %s985_s2 = inlined_call_operand.vmem [shape: f32[2,256], index: 2, kind: input, shape index: {}]   ;;  %s986_s3 = inlined_call_operand.vmem [shape: bf16[16,256], index: 3, kind: output, shape index: {}]  }
   0x1   :  { %v648_v0 = vld [vmem:[%s983_s1 + $0x74] ss:$8 sps:$4 sm:$0xff]   ;;  %v652_v2 = vld [vmem:[%s983_s1 + $0x70] ss:$8 sps:$4 sm:$0xff]   ;;  %v654_v4 = vld [vmem:[%s983_s1 + $0x64] ss:$8 sps:$4 sm:$0xff]  }
   0x2   :  { %v650_v1 = vld [vmem:[%s983_s1 + $0x174] ss:$8 sps:$4 sm:$0xff]   ;;  %422 = vmatprep.subr.bf16.mxu0 %v648_v0  ;;  %v653_v3 = vld [vmem:[%s983_s1 + $0x170] ss:$8 sps:$4 sm:$0xff]   ;;  %v656_v5 = vld [vmem:[%s983_s1 + $0x164] ss:$8 sps:$4 sm:$0xff]  }
   0x3   :  { %465 = vmatprep.subr.bf16.mxu1 %v650_v1  ;;  %423 = vmatpush1.bf16.msra.mxu0 %v652_v2  ;;  %v658_v6 = vld [vmem:[%s983_s1 + $0x60] ss:$8 sps:$4 sm:$0xff]   ;;  %v660_v8 = vld [vmem:[%s983_s1 + $0x54] ss:$8 sps:$4 sm:$0xff]   ;;  %v664_v10 = vld [vmem:[%s983_s1 + $0x50] ss:$8 sps:$4 sm:$0xff]  }
   0x4   :  { %466 = vmatpush1.bf16.msra.mxu1 %v653_v3  ;;  %424 = vmatprep.subr.bf16.mxu0 %v654_v4  ;;  %v659_v7 = vld [vmem:[%s983_s1 + $0x160] ss:$8 sps:$4 sm:$0xff]   ;;  %v662_v9 = vld [vmem:[%s983_s1 + $0x154] ss:$8 sps:$4 sm:$0xff]   ;;  %v665_v11 = vld [vmem:[%s983_s1 + $0x150] ss:$8 sps:$4 sm:$0xff]   ;;  %v510_v4 = vlaneseq }
   0x5   :  { %467 = vmatprep.subr.bf16.mxu1 %v656_v5  ;;  %v666_v12 = vld [vmem:[%s983_s1 + $0x44] ss:$8 sps:$4 sm:$0xff]   ;;  %v670_v14 = vld [vmem:[%s983_s1 + $0x40] ss:$8 sps:$4 sm:$0xff]   ;;  %v672_v16 = vld [vmem:[%s983_s1 + $0x34] ss:$8 sps:$4 sm:$0xff]  }
   0x6   :  { %v668_v13 = vld [vmem:[%s983_s1 + $0x144] ss:$8 sps:$4 sm:$0xff]   ;;  %v671_v15 = vld [vmem:[%s983_s1 + $0x140] ss:$8 sps:$4 sm:$0xff]   ;;  %v674_v17 = vld [vmem:[%s983_s1 + $0x134] ss:$8 sps:$4 sm:$0xff]  }
   0x7   :  { %425 = vmatpush1.bf16.msra.mxu0 %v658_v6  ;;  %v676_v18 = vld [vmem:[%s983_s1 + $0x30] ss:$8 sps:$4 sm:$0xff]   ;;  %v678_v20 = vld [vmem:[%s983_s1 + $0x24] ss:$8 sps:$4 sm:$0xff]   ;;  %v682_v22 = vld [vmem:[%s983_s1 + $0x20] ss:$8 sps:$4 sm:$0xff]  }
   0x8   :  { %468 = vmatpush1.bf16.msra.mxu1 %v659_v7  ;;  %426 = vmatprep.subr.bf16.mxu0 %v660_v8  ;;  %v677_v19 = vld [vmem:[%s983_s1 + $0x130] ss:$8 sps:$4 sm:$0xff]   ;;  %v680_v21 = vld [vmem:[%s983_s1 + $0x124] ss:$8 sps:$4 sm:$0xff]   ;;  %v683_v23 = vld [vmem:[%s983_s1 + $0x120] ss:$8 sps:$4 sm:$0xff]  }
   0x9   :  { %469 = vmatprep.subr.bf16.mxu1 %v662_v9  ;;  %v684_v24 = vld [vmem:[%s983_s1 + $0x14] ss:$8 sps:$4 sm:$0xff]   ;;  %v688_v26 = vld [vmem:[%s983_s1 + $0x10] ss:$8 sps:$4 sm:$0xff]   ;;  %v690_v28 = vld [vmem:[%s983_s1 + $0x4] ss:$8 sps:$4 sm:$0xff]  }
   0xa   :  { %v686_v25 = vld [vmem:[%s983_s1 + $0x114] ss:$8 sps:$4 sm:$0xff]   ;;  %v689_v27 = vld [vmem:[%s983_s1 + $0x110] ss:$8 sps:$4 sm:$0xff]   ;;  %v692_v29 = vld [vmem:[%s983_s1 + $0x104] ss:$8 sps:$4 sm:$0xff]  }
   0xb   :  { %427 = vmatpush1.bf16.msra.mxu0 %v664_v10  ;;  %v694_v30 = vld [vmem:[%s983_s1] ss:$8 sps:$4 sm:$0xff]   ;;  %v696_v32 = vld [vmem:[%s983_s1 + $0xf4] ss:$8 sps:$4 sm:$0xff]   ;;  %v700_v34 = vld [vmem:[%s983_s1 + $0xf0] ss:$8 sps:$4 sm:$0xff]  }
   0xc   :  { %470 = vmatpush1.bf16.msra.mxu1 %v665_v11  ;;  %428 = vmatprep.subr.bf16.mxu0 %v666_v12  ;;  %v695_v31 = vld [vmem:[%s983_s1 + $0x100] ss:$8 sps:$4 sm:$0xff]   ;;  %v698_v33 = vld [vmem:[%s983_s1 + $0x1f4] ss:$8 sps:$4 sm:$0xff]   ;;  %v701_v35 = vld [vmem:[%s983_s1 + $0x1f0] ss:$8 sps:$4 sm:$0xff]  }
   0xd   :  { %471 = vmatprep.subr.bf16.mxu1 %v668_v13  ;;  %v702_v36 = vld [vmem:[%s983_s1 + $0xe4] ss:$8 sps:$4 sm:$0xff]   ;;  %v706_v38 = vld [vmem:[%s983_s1 + $0xe0] ss:$8 sps:$4 sm:$0xff]   ;;  %v708_v40 = vld [vmem:[%s983_s1 + $0xd4] ss:$8 sps:$4 sm:$0xff]  }
   0xe   :  { %v704_v37 = vld [vmem:[%s983_s1 + $0x1e4] ss:$8 sps:$4 sm:$0xff]   ;;  %v707_v39 = vld [vmem:[%s983_s1 + $0x1e0] ss:$8 sps:$4 sm:$0xff]   ;;  %v710_v41 = vld [vmem:[%s983_s1 + $0x1d4] ss:$8 sps:$4 sm:$0xff]  }
   0xf   :  { %429 = vmatpush1.bf16.msra.mxu0 %v670_v14  ;;  %v712_v42 = vld [vmem:[%s983_s1 + $0xd0] ss:$8 sps:$4 sm:$0xff]   ;;  %v714_v44 = vld [vmem:[%s983_s1 + $0xc4] ss:$8 sps:$4 sm:$0xff]   ;;  %v718_v46 = vld [vmem:[%s983_s1 + $0xc0] ss:$8 sps:$4 sm:$0xff]  }
  0x10   :  { %472 = vmatpush1.bf16.msra.mxu1 %v671_v15  ;;  %430 = vmatprep.subr.bf16.mxu0 %v672_v16  ;;  %v713_v43 = vld [vmem:[%s983_s1 + $0x1d0] ss:$8 sps:$4 sm:$0xff]   ;;  %v716_v45 = vld [vmem:[%s983_s1 + $0x1c4] ss:$8 sps:$4 sm:$0xff]   ;;  %v719_v48 = vld [vmem:[%s983_s1 + $0x1c0] ss:$8 sps:$4 sm:$0xff]  }
  0x11   :  { %473 = vmatprep.subr.bf16.mxu1 %v674_v17  ;;  %v746_v47 = vld [vmem:[%s984_s0 + $0x4] ss:$16 sps:$4 sm:$0xff]   ;;  %v749_v51 = vld [vmem:[%s984_s0 + $0xc] ss:$16 sps:$4 sm:$0xff]   ;;  %v724_v52 = vld [vmem:[%s983_s1 + $0xb0] ss:$8 sps:$4 sm:$0xff]  }
  0x12   :  { %v720_v49 = vld [vmem:[%s983_s1 + $0xb4] ss:$8 sps:$4 sm:$0xff]   ;;  %454 = vmatprep.mubr.bf16.mxu0 %v746_v47  ;;  %497 = vmatprep.mubr.bf16.mxu1 %v749_v51  ;;  %v725_v53 = vld [vmem:[%s983_s1 + $0x1b0] ss:$8 sps:$4 sm:$0xff]   ;;  %v726_v54 = vld [vmem:[%s983_s1 + $0xa4] ss:$8 sps:$4 sm:$0xff]  }
  0x13   :  { %431 = vmatpush1.bf16.msra.mxu0 %v676_v18  ;;  %v722_v50 = vld [vmem:[%s983_s1 + $0x1b4] ss:$8 sps:$4 sm:$0xff]   ;;  %v728_v55 = vld [vmem:[%s983_s1 + $0x1a4] ss:$8 sps:$4 sm:$0xff]   ;;  %v730_v56 = vld [vmem:[%s983_s1 + $0xa0] ss:$8 sps:$4 sm:$0xff]  }
  0x14   :  { %474 = vmatpush1.bf16.msra.mxu1 %v677_v19  ;;  %432 = vmatprep.subr.bf16.mxu0 %v678_v20  ;;  %v731_v57 = vld [vmem:[%s983_s1 + $0x1a0] ss:$8 sps:$4 sm:$0xff]   ;;  %v732_v58 = vld [vmem:[%s983_s1 + $0x94] ss:$8 sps:$4 sm:$0xff]   ;;  %v736_v60 = vld [vmem:[%s983_s1 + $0x90] ss:$8 sps:$4 sm:$0xff]  }
  0x15   :  { %475 = vmatprep.subr.bf16.mxu1 %v680_v21  ;;  %v734_v59 = vld [vmem:[%s983_s1 + $0x194] ss:$8 sps:$4 sm:$0xff]   ;;  %v737_v61 = vld [vmem:[%s983_s1 + $0x190] ss:$8 sps:$4 sm:$0xff]   ;;  %v738_v62 = vld [vmem:[%s983_s1 + $0x84] ss:$8 sps:$4 sm:$0xff]  }
  0x16   :  { %v740_v63 = vld [vmem:[%s983_s1 + $0x184] ss:$8 sps:$4 sm:$0xff]   ;;  %v742_v0 = vld [vmem:[%s983_s1 + $0x80] ss:$8 sps:$4 sm:$0xff]   ;;  %v511_v5 = vshrl.u32 %v510_v4, 7 }
  0x17   :  { %433 = vmatpush1.bf16.msra.mxu0 %v682_v22  ;;  %v743_v1 = vld [vmem:[%s983_s1 + $0x180] ss:$8 sps:$4 sm:$0xff]  }
  0x18   :  { %476 = vmatpush1.bf16.msra.mxu1 %v683_v23  ;;  %434 = vmatprep.subr.bf16.mxu0 %v684_v24  ;;  %v744_v2 = vld [vmem:[%s984_s0] ss:$16 sps:$4 sm:$0xff]   ;;  %v747_v3 = vld [vmem:[%s984_s0 + $0x8] ss:$16 sps:$4 sm:$0xff]   ;;  %v512_v6 = vsub.s32 0, %v511_v5  ;;  %v534_v8 = vsub.s32 1, %v511_v5 }
  0x19   :  { %477 = vmatprep.subr.bf16.mxu1 %v686_v25  ;;  %v508_v7 = vld [vmem:[%s985_s2] sm:$0xf]  ;;  %v516_v9 = vsub.s32 2, %v511_v5  ;;  %v538_v11 = vsub.s32 3, %v511_v5 }
  0x1a   :  { %v513_v10 = vrot.slane %v508_v7, %v512_v6  ;;  %v535_v12 = vrot.slane %v508_v7, %v534_v8 }
  0x1b   :  { %435 = vmatpush1.bf16.msra.mxu0 %v688_v26  ;;  %v517_v13 = vrot.slane %v508_v7, %v516_v9  ;;  %v539_v15 = vrot.slane %v508_v7, %v538_v11 }
  0x1c   :  { %478 = vmatpush1.bf16.msra.mxu1 %v689_v27  ;;  %436 = vmatprep.subr.bf16.mxu0 %v690_v28  ;;  %v523_v14 = vrot.slane %v513_v10, %v512_v6  ;;  %v545_v19 = vrot.slane %v535_v12, %v534_v8 }
  0x1d   :  { %479 = vmatprep.subr.bf16.mxu1 %v692_v29  ;;  %v527_v20 = vrot.slane %v517_v13, %v512_v6  ;;  %v549_v25 = vrot.slane %v539_v15, %v534_v8 }
  0x1f   :  { %437 = vmatpush1.bf16.msra.mxu0 %v694_v30 }
  0x20   :  { %480 = vmatpush1.bf16.msra.mxu1 %v695_v31  ;;  %438 = vmatprep.subr.bf16.mxu0 %v696_v32 }
  0x21   :  { %481 = vmatprep.subr.bf16.mxu1 %v698_v33 }
  0x23   :  { %439 = vmatpush2.bf16.msra.mxu0 %v700_v34 }
  0x24   :  { %482 = vmatpush2.bf16.msra.mxu1 %v701_v35  ;;  %440 = vmatprep.subr.bf16.mxu0 %v702_v36 }
  0x25   :  { %483 = vmatprep.subr.bf16.mxu1 %v704_v37 }
  0x27   :  { %441 = vmatpush2.bf16.msra.mxu0 %v706_v38 }
  0x28   :  { %484 = vmatpush2.bf16.msra.mxu1 %v707_v39  ;;  %442 = vmatprep.subr.bf16.mxu0 %v708_v40 }
  0x29   :  { %485 = vmatprep.subr.bf16.mxu1 %v710_v41 }
  0x2b   :  { %443 = vmatpush2.bf16.msra.mxu0 %v712_v42 }
  0x2c   :  { %486 = vmatpush2.bf16.msra.mxu1 %v713_v43  ;;  %444 = vmatprep.subr.bf16.mxu0 %v714_v44 }
  0x2d   :  { %487 = vmatprep.subr.bf16.mxu1 %v716_v45 }
  0x2f   :  { %445 = vmatpush2.bf16.msra.mxu0 %v718_v46 }
  0x30   :  { %488 = vmatpush2.bf16.msra.mxu1 %v719_v48  ;;  %446 = vmatprep.subr.bf16.mxu0 %v720_v49 }
  0x31   :  { %489 = vmatprep.subr.bf16.mxu1 %v722_v50 }
  0x33   :  { %447 = vmatpush2.bf16.msra.mxu0 %v724_v52 }
  0x34   :  { %490 = vmatpush2.bf16.msra.mxu1 %v725_v53  ;;  %448 = vmatprep.subr.bf16.mxu0 %v726_v54 }
  0x35   :  { %491 = vmatprep.subr.bf16.mxu1 %v728_v55 }
  0x37   :  { %449 = vmatpush2.bf16.msra.mxu0 %v730_v56 }
  0x38   :  { %492 = vmatpush2.bf16.msra.mxu1 %v731_v57  ;;  %450 = vmatprep.subr.bf16.mxu0 %v732_v58 }
  0x39   :  { %493 = vmatprep.subr.bf16.mxu1 %v734_v59 }
  0x3b   :  { %451 = vmatpush2.bf16.msra.mxu0 %v736_v60 }
  0x3c   :  { %494 = vmatpush2.bf16.msra.mxu1 %v737_v61  ;;  %452 = vmatprep.subr.bf16.mxu0 %v738_v62 }
  0x3d   :  { %495 = vmatprep.subr.bf16.mxu1 %v740_v63 }
  0x3f   :  { %453 = vmatpush2.bf16.msra.mxu0 %v742_v0 }
  0x40   :  { %496 = vmatpush2.bf16.msra.mxu1 %v743_v1 }
  0x42   :  { %455 = vmatmul.mubr.bf16.vlgmr.msra.gmra.mxu0 %v744_v2 }
  0x43   :  { %498 = vmatmul.mubr.bf16.vlgmr.msra.gmra.mxu1 %v747_v3 }
 0x102   :  { %v456_v16 = vpop.f32.mrf.mxu0 }
 0x103   :  { %v499_v17 = vpop.f32.mrf.mxu1 }
 0x104   :  { %v500_v18 = vadd.f32 %v499_v17, %v456_v16  ;;  %v458_v21 = vpop.f32.mrf.mxu0 }
 0x105   :  { %v501_v22 = vpop.f32.mrf.mxu1 }
 0x106   :  { %v528_v23 = vmul.f32 %v523_v14, %v500_v18  ;;  %v502_v24 = vadd.f32 %v501_v22, %v458_v21  ;;  %v460_v26 = vpop.f32.mrf.mxu0 }
 0x107   :  { %v503_v27 = vpop.f32.mrf.mxu1 }
 0x108   :  { %v550_v28 = vadd.f32 %v545_v19, %v528_v23  ;;  %v529_v29 = vmul.f32 %v527_v20, %v502_v24  ;;  %v504_v30 = vadd.f32 %v503_v27, %v460_v26  ;;  %v462_v31 = vpop.f32.mrf.mxu0 }
 0x109   :  { %v505_v32 = vpop.f32.mrf.mxu1 }
 0x10a   :  { %v551_v33 = vadd.f32 %v549_v25, %v529_v29  ;;  %v530_v34 = vmul.f32 %v523_v14, %v504_v30  ;;  %v506_v35 = vadd.f32 %v505_v32, %v462_v31  ;;  %v554_v36 = vmax.f32 %v550_v28, 0.0 }
 0x10c   :  { %v555_v37 = vmax.f32 %v551_v33, 0.0  ;;  %v552_v38 = vadd.f32 %v545_v19, %v530_v34  ;;  %v531_v39 = vmul.f32 %v527_v20, %v506_v35 }
 0x10e   :  { %v646_v40 = vpack.c.bf16 %v555_v37, %v554_v36  ;;  %v553_v41 = vadd.f32 %v549_v25, %v531_v39  ;;  %v556_v42 = vmax.f32 %v552_v38, 0.0 }
 0x110   :  { %570 = vst [vmem:[%s986_s3] sm:$0xff] %v646_v40  ;;  %v557_v43 = vmax.f32 %v553_v41, 0.0 }
 0x112   :  { %v647_v44 = vpack.c.bf16 %v557_v43, %v556_v42 }
 0x114   :  { %571 = vst [vmem:[%s986_s3 + $0x8] sm:$0xff] %v647_v44 }

// kernel: tile.38
= control target key start
LH: loop header
LB: loop body
LE: loop exit
PB: predicated region body
PF: predicated region fallthrough
CT: control target
= control target key end

     0   :  { %s22_s0 = inlined_call_operand.vmem [shape: f32[4], index: 0, kind: input, shape index: {}]   ;;  %s23_s1 = inlined_call_operand.vmem [shape: f32[4,4], index: 1, kind: output, shape index: {}]  }
   0x1   :  { %v4_v0 = vld [vmem:[%s22_s0] ss:$0 sm:$0xff] }
   0x2   :  { %5 = vst [vmem:[%s23_s1] sm:$0xf] %v4_v0 }

// kernel: tile.39
= control target key start
LH: loop header
LB: loop body
LE: loop exit
PB: predicated region body
PF: predicated region fallthrough
CT: control target
= control target key end

     0   :  { %vm8_vm0 = vcmask 31744   ;;  %s40_s8 = smov 4   ;;  %s41_s9 = smov 8   ;;  %vm14_vm1 = vcmask 130144   ;;  %vm20_vm2 = vcmask 97344   ;;  %vm26_vm3 = vcmask 64544   ;;  %s58_s0 = inlined_call_operand.vmem [shape: f32[4,4], index: 0, kind: input, shape index: {}]   ;;  %s59_s1 = inlined_call_operand.vmem [shape: f32[1,16], index: 1, kind: output, shape index: {}]  }
   0x1   :  { %v5_v0 = vld [vmem:[%s58_s0] sm:$0xf]  ;;  %s39_s0 = smov 12  }
   0x2   :  { %6 = vst [vmem:[#allocation1] sm:$0xf] %v5_v0 }
   0x9   :  { %v11_v1 = vld [vmem:[#allocation1 + $0x3] sm:$0x1]   ;;  %v23_v2 = vld [vmem:[#allocation1 + $0x1] sm:$0x1]   ;;  %v7_v3 = vld [vmem:[#allocation1] sm:$0x1]  }
   0xa   :  { %12 = vrot.lane.b32.xlu0 %v11_v1, %s39_s0  ;;  %24 = vrot.lane.b32.xlu1 %v23_v2, %s40_s8  ;;  %v17_v4 = vld [vmem:[#allocation1 + $0x2] sm:$0x1]   ;;  %9 = vst.msk [vmem:[#allocation0] sm:$0x1] %vm8_vm0, %v7_v3  }
   0xe   :  { %18 = vrot.lane.b32.xlu0 %v17_v4, %s41_s9 }
  0x7c   :  { %v13_v5 = vpop.permute.xlu0 %12   ;;  %v25_v6 = vpop.permute.xlu1 %24  }
  0x7d   :  { %15 = vst.msk [vmem:[#allocation0] sm:$0x1] %vm14_vm1, %v13_v5  }
  0x80   :  { %v19_v7 = vpop.permute.xlu0 %18  }
  0x81   :  { %21 = vst.msk [vmem:[#allocation0] sm:$0x1] %vm20_vm2, %v19_v7  }
  0x82   :  { %27 = vst.msk [vmem:[#allocation0] sm:$0x1] %vm26_vm3, %v25_v6  }
  0x89   :  { %v32_v8 = vld [vmem:[#allocation0] sm:$0x1] }
  0x8a   :  { %35 = vst [vmem:[%s59_s1] sm:$0x1] %v32_v8 }

// kernel: _lambda_.146
= control target key start
LH: loop header
LB: loop body
LE: loop exit
PB: predicated region body
PF: predicated region fallthrough
CT: control target
= control target key end

     0   :  { %v217_v20 = vlaneseq  ;;  %s455_s1 = inlined_call_operand.vmem [shape: bf16[256,128], index: 1, kind: input, shape index: {}]   ;;  %s456_s0 = inlined_call_operand.vmem [shape: bf16[32,256], index: 0, kind: input, shape index: {}]   ;;  %s457_s2 = inlined_call_operand.vmem [shape: f32[2,128], index: 2, kind: input, shape index: {}]   ;;  %s458_s3 = inlined_call_operand.vmem [shape: bf16[32,128], index: 3, kind: output, shape index: {}]  }
   0x1   :  { %v344_v0 = vld [vmem:[%s455_s1 + $0x78] sm:$0xff]   ;;  %v346_v2 = vld [vmem:[%s455_s1 + $0x70] sm:$0xff]   ;;  %v348_v4 = vld [vmem:[%s455_s1 + $0x68] sm:$0xff]  }
   0x2   :  { %v345_v1 = vld [vmem:[%s455_s1 + $0x38] sm:$0xff]   ;;  %300 = vmatprep.subr.bf16.mxu0 %v344_v0  ;;  %328 = vmatprep.subr.bf16.mxu1 %v344_v0  ;;  %v347_v3 = vld [vmem:[%s455_s1 + $0x30] sm:$0xff]   ;;  %v349_v5 = vld [vmem:[%s455_s1 + $0x28] sm:$0xff]   ;;  %v218_v21 = vshrl.u32 %v217_v20, 7 }
   0x3   :  { %301 = vmatpush3.bf16.msra.mxu0 %v345_v1  ;;  %336 = vmatpush3.bf16.msra.mxu1 %v345_v1  ;;  %v350_v6 = vld [vmem:[%s455_s1 + $0x60] sm:$0xff]   ;;  %v352_v8 = vld [vmem:[%s455_s1 + $0x58] sm:$0xff]   ;;  %v354_v10 = vld [vmem:[%s455_s1 + $0x50] sm:$0xff]  }
   0x4   :  { %302 = vmatprep.subr.bf16.mxu0 %v346_v2  ;;  %329 = vmatprep.subr.bf16.mxu1 %v346_v2  ;;  %v351_v7 = vld [vmem:[%s455_s1 + $0x20] sm:$0xff]   ;;  %v353_v9 = vld [vmem:[%s455_s1 + $0x18] sm:$0xff]   ;;  %v355_v13 = vld [vmem:[%s455_s1 + $0x10] sm:$0xff]   ;;  %v219_v22 = vsub.s32 0, %v218_v21  ;;  %v227_v27 = vsub.s32 1, %v218_v21 }
   0x5   :  { %v362_v11 = vld [vmem:[%s456_s0 + $0x4] ss:$8 sps:$4 sm:$0xff]   ;;  %v365_v12 = vld [vmem:[%s456_s0 + $0x14] ss:$8 sps:$4 sm:$0xff]   ;;  %v360_v18 = vld [vmem:[%s456_s0] ss:$8 sps:$4 sm:$0xff]  }
   0x6   :  { %v356_v14 = vld [vmem:[%s455_s1 + $0x48] sm:$0xff]   ;;  %199 = vmatprep.mubr.bf16.mxu0 %v362_v11  ;;  %207 = vmatprep.mubr.bf16.mxu1 %v365_v12  ;;  %v358_v16 = vld [vmem:[%s455_s1 + $0x40] sm:$0xff]   ;;  %v363_v19 = vld [vmem:[%s456_s0 + $0x10] ss:$8 sps:$4 sm:$0xff]  }
   0x7   :  { %303 = vmatpush3.bf16.msra.mxu0 %v347_v3  ;;  %337 = vmatpush3.bf16.msra.mxu1 %v347_v3  ;;  %v357_v15 = vld [vmem:[%s455_s1 + $0x8] sm:$0xff]   ;;  %v359_v17 = vld [vmem:[%s455_s1] sm:$0xff]  }
   0x8   :  { %304 = vmatprep.subr.bf16.mxu0 %v348_v4  ;;  %330 = vmatprep.subr.bf16.mxu1 %v348_v4  ;;  %v216_v23 = vld [vmem:[%s457_s2] sm:$0x3] }
   0x9   :  { %v220_v26 = vrot.slane %v216_v23, %v219_v22  ;;  %v228_v35 = vrot.slane %v216_v23, %v227_v27 }
   0xb   :  { %305 = vmatpush3.bf16.msra.mxu0 %v349_v5  ;;  %338 = vmatpush3.bf16.msra.mxu1 %v349_v5 }
   0xc   :  { %306 = vmatprep.subr.bf16.mxu0 %v350_v6  ;;  %331 = vmatprep.subr.bf16.mxu1 %v350_v6 }
   0xf   :  { %307 = vmatpush3.bf16.msra.mxu0 %v351_v7  ;;  %339 = vmatpush3.bf16.msra.mxu1 %v351_v7 }
  0x10   :  { %308 = vmatprep.subr.bf16.mxu0 %v352_v8  ;;  %332 = vmatprep.subr.bf16.mxu1 %v352_v8 }
  0x13   :  { %309 = vmatpush3.bf16.msra.mxu0 %v353_v9  ;;  %340 = vmatpush3.bf16.msra.mxu1 %v353_v9 }
  0x14   :  { %310 = vmatprep.subr.bf16.mxu0 %v354_v10  ;;  %333 = vmatprep.subr.bf16.mxu1 %v354_v10 }
  0x17   :  { %311 = vmatpush3.bf16.msra.mxu0 %v355_v13  ;;  %341 = vmatpush3.bf16.msra.mxu1 %v355_v13 }
  0x18   :  { %312 = vmatprep.subr.bf16.mxu0 %v356_v14  ;;  %334 = vmatprep.subr.bf16.mxu1 %v356_v14 }
  0x1b   :  { %313 = vmatpush3.bf16.msra.mxu0 %v357_v15  ;;  %342 = vmatpush3.bf16.msra.mxu1 %v357_v15 }
  0x1c   :  { %314 = vmatprep.subr.bf16.mxu0 %v358_v16  ;;  %335 = vmatprep.subr.bf16.mxu1 %v358_v16 }
  0x1f   :  { %315 = vmatpush3.bf16.msra.mxu0 %v359_v17  ;;  %343 = vmatpush3.bf16.msra.mxu1 %v359_v17 }
  0x22   :  { %200 = vmatmul.mubr.bf16.vlgmr.msra.gmra.mxu0 %v360_v18  ;;  %208 = vmatmul.mubr.bf16.vlgmr.msra.gmra.mxu1 %v363_v19 }
  0xe2   :  { %v316_v24 = vpop.f32.mrf.mxu0  ;;  %v322_v25 = vpop.f32.mrf.mxu1 }
  0xe4   :  { %v317_v28 = vpop.f32.mrf.mxu0  ;;  %v323_v29 = vpop.f32.mrf.mxu1 }
  0xe5   :  { %v318_v30 = vadd.f32 %v317_v28, %v316_v24  ;;  %v324_v31 = vadd.f32 %v323_v29, %v322_v25 }
  0xe6   :  { %v319_v32 = vpop.f32.mrf.mxu0  ;;  %v325_v33 = vpop.f32.mrf.mxu1 }
  0xe7   :  { %v221_v34 = vmul.f32 %v318_v30, %v220_v26  ;;  %v223_v36 = vmul.f32 %v324_v31, %v220_v26 }
  0xe8   :  { %v320_v37 = vpop.f32.mrf.mxu0  ;;  %v326_v38 = vpop.f32.mrf.mxu1 }
  0xe9   :  { %v321_v39 = vadd.f32 %v320_v37, %v319_v32  ;;  %v327_v40 = vadd.f32 %v326_v38, %v325_v33  ;;  %v229_v41 = vadd.f32 %v228_v35, %v221_v34  ;;  %v231_v42 = vadd.f32 %v228_v35, %v223_v36 }
  0xeb   :  { %v222_v43 = vmul.f32 %v321_v39, %v220_v26  ;;  %v224_v44 = vmul.f32 %v327_v40, %v220_v26  ;;  %v233_v47 = vmax.f32 %v229_v41, 0.0  ;;  %v235_v48 = vmax.f32 %v231_v42, 0.0 }
  0xed   :  { %v230_v45 = vadd.f32 %v228_v35, %v222_v43  ;;  %v232_v46 = vadd.f32 %v228_v35, %v224_v44 }
  0xef   :  { %v234_v49 = vmax.f32 %v230_v45, 0.0  ;;  %v236_v50 = vmax.f32 %v232_v46, 0.0 }
  0xf1   :  { %v292_v51 = vpack.c.bf16 %v234_v49, %v233_v47  ;;  %v297_v52 = vpack.c.bf16 %v236_v50, %v235_v48 }
  0xf3   :  { %293 = vst [vmem:[%s458_s3] sm:$0xff] %v292_v51   ;;  %299 = vst [vmem:[%s458_s3 + $0x8] sm:$0xff] %v297_v52  }

// kernel: _lambda_.147
= control target key start
LH: loop header
LB: loop body
LE: loop exit
PB: predicated region body
PF: predicated region fallthrough
CT: control target
= control target key end

     0   :  { %vm95_vm0 = vcmask 392192   ;;  %v218_v11 = vlaneseq  ;;  %s612_s1 = inlined_call_operand.vmem [shape: bf16[48,128], index: 1, kind: input, shape index: {}]   ;;  %s613_s0 = inlined_call_operand.vmem [shape: bf16[128,48], index: 0, kind: input, shape index: {}]   ;;  %s614_s2 = inlined_call_operand.vmem [shape: f32[2,128], index: 2, kind: input, shape index: {}]   ;;  %s615_s3 = inlined_call_operand.vmem [shape: bf16[128,128], index: 3, kind: output, shape index: {}]  }
   0x1   :  { %v495_v0 = vld [vmem:[%s612_s1 + $0x10] sm:$0xff]   ;;  %v496_v1 = vld [vmem:[%s612_s1 + $0x8] sm:$0xff]   ;;  %v497_v2 = vld [vmem:[%s612_s1] sm:$0xff]  }
   0x2   :  { %467 = vmatprep.subr.bf16.mxu0 %v495_v0  ;;  %489 = vmatprep.subr.bf16.mxu1 %v495_v0  ;;  %v498_v3 = vld [vmem:[%s613_s0] sm:$0xff]   ;;  %v500_v5 = vld [vmem:[%s613_s0 + $0x8] sm:$0xff]   ;;  %v502_v7 = vld [vmem:[%s613_s0 + $0x10] sm:$0xff]   ;;  %v219_v12 = vshrl.u32 %v218_v11, 7 }
   0x3   :  { %468 = vmatpush3.bf16.msra.mxu0 %v495_v0  ;;  %492 = vmatpush3.bf16.msra.mxu1 %v495_v0  ;;  %v499_v4 = vld [vmem:[%s613_s0 + $0x20] sm:$0xff]   ;;  %v501_v6 = vld [vmem:[%s613_s0 + $0x28] sm:$0xff]   ;;  %v503_v8 = vld [vmem:[%s613_s0 + $0x30] sm:$0xff]  }
   0x4   :  { %469 = vmatprep.subr.bf16.mxu0 %v496_v1  ;;  %490 = vmatprep.subr.bf16.mxu1 %v496_v1  ;;  %v504_v9 = vld [vmem:[%s613_s0 + $0x18] sm:$0xff]   ;;  %v220_v13 = vsub.s32 0, %v219_v12  ;;  %v217_v14 = vld [vmem:[%s614_s2] sm:$0x3]  ;;  %v240_v16 = vsub.s32 1, %v219_v12 }
   0x5   :  { %473 = vmatprep.mubr.msk.bf16.mxu0 %vm95_vm0, %v498_v3  ;;  %481 = vmatprep.mubr.msk.bf16.mxu1 %vm95_vm0, %v499_v4  ;;  %v505_v10 = vld [vmem:[%s613_s0 + $0x38] sm:$0xff]  }
   0x6   :  { %v570_v15 = vrot.slane %v217_v14, %v220_v13  ;;  %v241_v20 = vrot.slane %v217_v14, %v240_v16 }
   0x7   :  { %470 = vmatpush3.bf16.msra.mxu0 %v496_v1  ;;  %493 = vmatpush3.bf16.msra.mxu1 %v496_v1 }
   0x8   :  { %471 = vmatprep.subr.bf16.mxu0 %v497_v2  ;;  %491 = vmatprep.subr.bf16.mxu1 %v497_v2 }
   0xb   :  { %472 = vmatpush3.bf16.msra.mxu0 %v497_v2  ;;  %494 = vmatpush3.bf16.msra.mxu1 %v497_v2 }
   0xe   :  { %474 = vmatmul.mubr.msk.bf16.vlgmr.msra.gmra.mxu0 %vm95_vm0, %v500_v5  ;;  %482 = vmatmul.mubr.msk.bf16.vlgmr.msra.gmra.mxu1 %vm95_vm0, %v501_v6 }
   0xf   :  { %477 = vmatprep.mubr.msk.bf16.mxu0 %vm95_vm0, %v502_v7  ;;  %485 = vmatprep.mubr.msk.bf16.mxu1 %vm95_vm0, %v503_v8 }
  0x16   :  { %478 = vmatmul.mubr.msk.bf16.gmra.mxu0 %vm95_vm0, %v504_v9  ;;  %486 = vmatmul.mubr.msk.bf16.gmra.mxu1 %vm95_vm0, %v505_v10 }
  0xce   :  { %v475_v17 = vpop.f32.mrf.mxu0  ;;  %v483_v18 = vpop.f32.mrf.mxu1 }
  0xcf   :  { %v224_v19 = vmul.f32 %v475_v17, %v570_v15  ;;  %v232_v21 = vmul.f32 %v483_v18, %v570_v15 }
  0xd0   :  { %v154_v22 = vpop.f32.mrf.mxu0  ;;  %v186_v23 = vpop.f32.mrf.mxu1 }
  0xd1   :  { %v222_v24 = vmul.f32 %v570_v15, %v154_v22  ;;  %v230_v25 = vmul.f32 %v570_v15, %v186_v23  ;;  %v244_v28 = vadd.f32 %v241_v20, %v224_v19  ;;  %v252_v29 = vadd.f32 %v241_v20, %v232_v21 }
  0xd2   :  { %v476_v26 = vpop.f32.mrf.mxu0  ;;  %v484_v27 = vpop.f32.mrf.mxu1 }
  0xd3   :  { %v225_v30 = vmul.f32 %v476_v26, %v570_v15  ;;  %v233_v31 = vmul.f32 %v484_v27, %v570_v15  ;;  %v242_v34 = vadd.f32 %v241_v20, %v222_v24  ;;  %v250_v35 = vadd.f32 %v241_v20, %v230_v25 }
  0xd4   :  { %v157_v32 = vpop.f32.mrf.mxu0  ;;  %v189_v33 = vpop.f32.mrf.mxu1  ;;  %v260_v42 = vmax.f32 %v244_v28, 0.0  ;;  %v268_v43 = vmax.f32 %v252_v29, 0.0 }
  0xd5   :  { %v223_v36 = vmul.f32 %v570_v15, %v157_v32  ;;  %v231_v37 = vmul.f32 %v570_v15, %v189_v33  ;;  %v245_v38 = vadd.f32 %v241_v20, %v225_v30  ;;  %v253_v39 = vadd.f32 %v241_v20, %v233_v31 }
  0xd6   :  { %v479_v40 = vpop.f32.mrf.mxu0  ;;  %v487_v41 = vpop.f32.mrf.mxu1  ;;  %v258_v52 = vmax.f32 %v242_v34, 0.0  ;;  %v266_v53 = vmax.f32 %v250_v35, 0.0 }
  0xd7   :  { %v243_v44 = vadd.f32 %v241_v20, %v223_v36  ;;  %v251_v45 = vadd.f32 %v241_v20, %v231_v37  ;;  %v261_v46 = vmax.f32 %v245_v38, 0.0  ;;  %v269_v47 = vmax.f32 %v253_v39, 0.0 }
  0xd8   :  { %v228_v48 = vmul.f32 %v479_v40, %v570_v15  ;;  %v236_v49 = vmul.f32 %v487_v41, %v570_v15  ;;  %v170_v50 = vpop.f32.mrf.mxu0  ;;  %v202_v51 = vpop.f32.mrf.mxu1 }
  0xd9   :  { %v259_v54 = vmax.f32 %v243_v44, 0.0  ;;  %v267_v55 = vmax.f32 %v251_v45, 0.0  ;;  %v417_v56 = vpack.c.bf16 %v261_v46, %v260_v42  ;;  %v437_v57 = vpack.c.bf16 %v269_v47, %v268_v43 }
  0xda   :  { %v226_v58 = vmul.f32 %v570_v15, %v170_v50  ;;  %v234_v59 = vmul.f32 %v570_v15, %v202_v51  ;;  %v480_v60 = vpop.f32.mrf.mxu0  ;;  %v488_v61 = vpop.f32.mrf.mxu1  ;;  %v248_v0 = vadd.f32 %v241_v20, %v228_v48  ;;  %v256_v1 = vadd.f32 %v241_v20, %v236_v49 }
  0xdb   :  { %v412_v62 = vpack.c.bf16 %v259_v54, %v258_v52  ;;  %v432_v63 = vpack.c.bf16 %v267_v55, %v266_v53  ;;  %449 = vst [vmem:[%s615_s3 + $0x8] sm:$0xff] %v417_v56   ;;  %453 = vst [vmem:[%s615_s3 + $0x28] sm:$0xff] %v437_v57   ;;  %v229_v2 = vmul.f32 %v480_v60, %v570_v15 }
  0xdc   :  { %v237_v3 = vmul.f32 %v488_v61, %v570_v15  ;;  %v173_v4 = vpop.f32.mrf.mxu0  ;;  %v205_v5 = vpop.f32.mrf.mxu1  ;;  %v246_v6 = vadd.f32 %v241_v20, %v226_v58  ;;  %v254_v7 = vadd.f32 %v241_v20, %v234_v59  ;;  %v264_v14 = vmax.f32 %v248_v0, 0.0 }
  0xdd   :  { %413 = vst [vmem:[%s615_s3] sm:$0xff] %v412_v62   ;;  %452 = vst [vmem:[%s615_s3 + $0x20] sm:$0xff] %v432_v63   ;;  %v227_v8 = vmul.f32 %v570_v15, %v173_v4  ;;  %v235_v9 = vmul.f32 %v570_v15, %v205_v5  ;;  %v249_v10 = vadd.f32 %v241_v20, %v229_v2  ;;  %v272_v16 = vmax.f32 %v256_v1, 0.0 }
  0xde   :  { %v257_v11 = vadd.f32 %v241_v20, %v237_v3  ;;  %v262_v19 = vmax.f32 %v246_v6, 0.0  ;;  %v270_v21 = vmax.f32 %v254_v7, 0.0 }
  0xdf   :  { %v247_v12 = vadd.f32 %v241_v20, %v227_v8  ;;  %v255_v13 = vadd.f32 %v241_v20, %v235_v9  ;;  %v265_v17 = vmax.f32 %v249_v10, 0.0 }
  0xe0   :  { %v273_v18 = vmax.f32 %v257_v11, 0.0 }
  0xe1   :  { %v263_v22 = vmax.f32 %v247_v12, 0.0  ;;  %v271_v23 = vmax.f32 %v255_v13, 0.0  ;;  %v427_v24 = vpack.c.bf16 %v265_v17, %v264_v14 }
  0xe2   :  { %v447_v25 = vpack.c.bf16 %v273_v18, %v272_v16 }
  0xe3   :  { %v422_v26 = vpack.c.bf16 %v263_v22, %v262_v19  ;;  %v442_v27 = vpack.c.bf16 %v271_v23, %v270_v21  ;;  %451 = vst [vmem:[%s615_s3 + $0x18] sm:$0xff] %v427_v24  }
  0xe4   :  { %455 = vst [vmem:[%s615_s3 + $0x38] sm:$0xff] %v447_v25  }
  0xe5   :  { %450 = vst [vmem:[%s615_s3 + $0x10] sm:$0xff] %v422_v26   ;;  %454 = vst [vmem:[%s615_s3 + $0x30] sm:$0xff] %v442_v27  }

// kernel: _lambda_.150
= control target key start
LH: loop header
LB: loop body
LE: loop exit
PB: predicated region body
PF: predicated region fallthrough
CT: control target
= control target key end

     0   :  { %vm98_vm0 = vcmask 392192   ;;  %v237_v11 = vlaneseq  ;;  %s765_s1 = inlined_call_operand.vmem [shape: bf16[48,128], index: 1, kind: input, shape index: {}]   ;;  %s766_s0 = inlined_call_operand.vmem [shape: bf16[128,48], index: 0, kind: input, shape index: {}]   ;;  %s767_s2 = inlined_call_operand.vmem [shape: f32[2,128], index: 2, kind: input, shape index: {}]   ;;  %s768_s3 = inlined_call_operand.vmem [shape: bf16[128,128], index: 3, kind: input, shape index: {}]   ;;  %s769_s4 = inlined_call_operand.vmem [shape: bf16[128,128], index: 4, kind: output, shape index: {}]  }
   0x1   :  { %v585_v0 = vld [vmem:[%s765_s1 + $0x10] sm:$0xff]   ;;  %v586_v1 = vld [vmem:[%s765_s1 + $0x8] sm:$0xff]   ;;  %v587_v2 = vld [vmem:[%s765_s1] sm:$0xff]  }
   0x2   :  { %557 = vmatprep.subr.bf16.mxu0 %v585_v0  ;;  %579 = vmatprep.subr.bf16.mxu1 %v585_v0  ;;  %v588_v3 = vld [vmem:[%s766_s0] sm:$0xff]   ;;  %v590_v5 = vld [vmem:[%s766_s0 + $0x8] sm:$0xff]   ;;  %v592_v7 = vld [vmem:[%s766_s0 + $0x10] sm:$0xff]   ;;  %v238_v12 = vshrl.u32 %v237_v11, 7 }
   0x3   :  { %558 = vmatpush3.bf16.msra.mxu0 %v585_v0  ;;  %582 = vmatpush3.bf16.msra.mxu1 %v585_v0  ;;  %v589_v4 = vld [vmem:[%s766_s0 + $0x20] sm:$0xff]   ;;  %v591_v6 = vld [vmem:[%s766_s0 + $0x28] sm:$0xff]   ;;  %v593_v8 = vld [vmem:[%s766_s0 + $0x30] sm:$0xff]  }
   0x4   :  { %559 = vmatprep.subr.bf16.mxu0 %v586_v1  ;;  %580 = vmatprep.subr.bf16.mxu1 %v586_v1  ;;  %v594_v9 = vld [vmem:[%s766_s0 + $0x18] sm:$0xff]   ;;  %v239_v13 = vsub.s32 0, %v238_v12  ;;  %v220_v14 = vld [vmem:[%s767_s2] sm:$0x3]  ;;  %v259_v15 = vsub.s32 1, %v238_v12  ;;  %v532_v17 = vld [vmem:[%s768_s3 + $0x8] sm:$0xff]  }
   0x5   :  { %563 = vmatprep.mubr.msk.bf16.mxu0 %vm98_vm0, %v588_v3  ;;  %571 = vmatprep.mubr.msk.bf16.mxu1 %vm98_vm0, %v589_v4  ;;  %v595_v10 = vld [vmem:[%s766_s0 + $0x38] sm:$0xff]   ;;  %v536_v19 = vld [vmem:[%s768_s3 + $0x28] sm:$0xff]   ;;  %v461_v24 = vld [vmem:[%s768_s3] sm:$0xff]   ;;  %v466_v26 = vunpack.c.l.bf16 %v532_v17  ;;  %v467_v39 = vunpack.c.h.bf16 %v532_v17 }
   0x6   :  { %v665_v16 = vrot.slane %v220_v14, %v239_v13  ;;  %v670_v18 = vrot.slane %v220_v14, %v259_v15  ;;  %v535_v25 = vld [vmem:[%s768_s3 + $0x20] sm:$0xff]   ;;  %v482_v27 = vunpack.c.l.bf16 %v536_v19  ;;  %v690_v34 = vld [vmem:[%s768_s3 + $0x18] sm:$0xff]   ;;  %v462_v36 = vunpack.c.l.bf16 %v461_v24  ;;  %v700_v42 = vld [vmem:[%s768_s3 + $0x10] sm:$0xff]  }
   0x7   :  { %560 = vmatpush3.bf16.msra.mxu0 %v586_v1  ;;  %583 = vmatpush3.bf16.msra.mxu1 %v586_v1  ;;  %v695_v35 = vld [vmem:[%s768_s3 + $0x38] sm:$0xff]   ;;  %v478_v37 = vunpack.c.l.bf16 %v535_v25  ;;  %v483_v41 = vunpack.c.h.bf16 %v536_v19  ;;  %v705_v43 = vld [vmem:[%s768_s3 + $0x30] sm:$0xff]   ;;  %v463_v46 = vunpack.c.h.bf16 %v461_v24  ;;  %v479_v47 = vunpack.c.h.bf16 %v535_v25 }
   0x8   :  { %561 = vmatprep.subr.bf16.mxu0 %v587_v2  ;;  %581 = vmatprep.subr.bf16.mxu1 %v587_v2  ;;  %v474_v52 = vunpack.c.l.bf16 %v690_v34  ;;  %v490_v53 = vunpack.c.l.bf16 %v695_v35  ;;  %v470_v56 = vunpack.c.l.bf16 %v700_v42  ;;  %v486_v57 = vunpack.c.l.bf16 %v705_v43 }
   0xb   :  { %562 = vmatpush3.bf16.msra.mxu0 %v587_v2  ;;  %584 = vmatpush3.bf16.msra.mxu1 %v587_v2 }
   0xe   :  { %564 = vmatmul.mubr.msk.bf16.vlgmr.msra.gmra.mxu0 %vm98_vm0, %v590_v5  ;;  %572 = vmatmul.mubr.msk.bf16.vlgmr.msra.gmra.mxu1 %vm98_vm0, %v591_v6 }
   0xf   :  { %567 = vmatprep.mubr.msk.bf16.mxu0 %vm98_vm0, %v592_v7  ;;  %575 = vmatprep.mubr.msk.bf16.mxu1 %vm98_vm0, %v593_v8 }
  0x16   :  { %568 = vmatmul.mubr.msk.bf16.gmra.mxu0 %vm98_vm0, %v594_v9  ;;  %576 = vmatmul.mubr.msk.bf16.gmra.mxu1 %vm98_vm0, %v595_v10 }
  0xce   :  { %v565_v20 = vpop.f32.mrf.mxu0  ;;  %v573_v21 = vpop.f32.mrf.mxu1 }
  0xcf   :  { %v243_v22 = vmul.f32 %v565_v20, %v665_v16  ;;  %v251_v23 = vmul.f32 %v573_v21, %v665_v16 }
  0xd0   :  { %v157_v28 = vpop.f32.mrf.mxu0  ;;  %v189_v29 = vpop.f32.mrf.mxu1 }
  0xd1   :  { %v263_v30 = vadd.f32 %v670_v18, %v243_v22  ;;  %v271_v31 = vadd.f32 %v670_v18, %v251_v23  ;;  %v241_v32 = vmul.f32 %v665_v16, %v157_v28  ;;  %v249_v33 = vmul.f32 %v665_v16, %v189_v29 }
  0xd2   :  { %v566_v38 = vpop.f32.mrf.mxu0  ;;  %v574_v40 = vpop.f32.mrf.mxu1 }
  0xd3   :  { %v261_v44 = vadd.f32 %v670_v18, %v241_v32  ;;  %v269_v45 = vadd.f32 %v670_v18, %v249_v33  ;;  %v244_v48 = vmul.f32 %v566_v38, %v665_v16  ;;  %v252_v49 = vmul.f32 %v574_v40, %v665_v16 }
  0xd4   :  { %v160_v50 = vpop.f32.mrf.mxu0  ;;  %v192_v51 = vpop.f32.mrf.mxu1  ;;  %v295_v54 = vadd.f32 %v466_v26, %v263_v30  ;;  %v303_v55 = vadd.f32 %v482_v27, %v271_v31 }
  0xd5   :  { %v264_v58 = vadd.f32 %v670_v18, %v244_v48  ;;  %v272_v59 = vadd.f32 %v670_v18, %v252_v49  ;;  %v242_v60 = vmul.f32 %v665_v16, %v160_v50  ;;  %v250_v61 = vmul.f32 %v665_v16, %v192_v51 }
  0xd6   :  { %v569_v62 = vpop.f32.mrf.mxu0  ;;  %v577_v63 = vpop.f32.mrf.mxu1  ;;  %v293_v0 = vadd.f32 %v462_v36, %v261_v44  ;;  %v301_v1 = vadd.f32 %v478_v37, %v269_v45  ;;  %v311_v10 = vmax.f32 %v295_v54, 0.0  ;;  %v319_v11 = vmax.f32 %v303_v55, 0.0 }
  0xd7   :  { %v247_v2 = vmul.f32 %v569_v62, %v665_v16  ;;  %v255_v3 = vmul.f32 %v577_v63, %v665_v16  ;;  %v296_v4 = vadd.f32 %v467_v39, %v264_v58  ;;  %v304_v5 = vadd.f32 %v483_v41, %v272_v59 }
  0xd8   :  { %v262_v6 = vadd.f32 %v670_v18, %v242_v60  ;;  %v270_v7 = vadd.f32 %v670_v18, %v250_v61  ;;  %v173_v8 = vpop.f32.mrf.mxu0  ;;  %v205_v9 = vpop.f32.mrf.mxu1  ;;  %v309_v22 = vmax.f32 %v293_v0, 0.0  ;;  %v317_v23 = vmax.f32 %v301_v1, 0.0 }
  0xd9   :  { %v245_v12 = vmul.f32 %v665_v16, %v173_v8  ;;  %v253_v13 = vmul.f32 %v665_v16, %v205_v9  ;;  %v312_v14 = vmax.f32 %v296_v4, 0.0  ;;  %v320_v15 = vmax.f32 %v304_v5, 0.0 }
  0xda   :  { %v294_v17 = vadd.f32 %v463_v46, %v262_v6  ;;  %v302_v19 = vadd.f32 %v479_v47, %v270_v7  ;;  %v570_v20 = vpop.f32.mrf.mxu0  ;;  %v578_v21 = vpop.f32.mrf.mxu1  ;;  %v267_v24 = vadd.f32 %v670_v18, %v247_v2  ;;  %v275_v25 = vadd.f32 %v670_v18, %v255_v3 }
  0xdb   :  { %v500_v26 = vpack.c.bf16 %v312_v14, %v311_v10  ;;  %v520_v27 = vpack.c.bf16 %v320_v15, %v319_v11  ;;  %v265_v32 = vadd.f32 %v670_v18, %v245_v12  ;;  %v273_v33 = vadd.f32 %v670_v18, %v253_v13 }
  0xdc   :  { %v310_v28 = vmax.f32 %v294_v17, 0.0  ;;  %v318_v29 = vmax.f32 %v302_v19, 0.0  ;;  %v176_v30 = vpop.f32.mrf.mxu0  ;;  %v208_v31 = vpop.f32.mrf.mxu1  ;;  %v475_v36 = vunpack.c.h.bf16 %v690_v34  ;;  %v491_v37 = vunpack.c.h.bf16 %v695_v35 }
  0xdd   :  { %539 = vst [vmem:[%s769_s4 + $0x8] sm:$0xff] %v500_v26   ;;  %543 = vst [vmem:[%s769_s4 + $0x28] sm:$0xff] %v520_v27   ;;  %v248_v40 = vmul.f32 %v570_v20, %v665_v16  ;;  %v256_v41 = vmul.f32 %v578_v21, %v665_v16  ;;  %v471_v44 = vunpack.c.h.bf16 %v700_v42  ;;  %v246_v34 = vmul.f32 %v665_v16, %v176_v30 }
  0xde   :  { %v495_v38 = vpack.c.bf16 %v310_v28, %v309_v22  ;;  %v515_v39 = vpack.c.bf16 %v318_v29, %v317_v23  ;;  %v487_v35 = vunpack.c.h.bf16 %v705_v43  ;;  %v254_v45 = vmul.f32 %v665_v16, %v208_v31 }
  0xdf   :  { %v299_v46 = vadd.f32 %v474_v52, %v267_v24  ;;  %v307_v47 = vadd.f32 %v490_v53, %v275_v25  ;;  %v268_v48 = vadd.f32 %v670_v18, %v248_v40  ;;  %v276_v42 = vadd.f32 %v670_v18, %v256_v41 }
  0xe0   :  { %496 = vst [vmem:[%s769_s4] sm:$0xff] %v495_v38   ;;  %542 = vst [vmem:[%s769_s4 + $0x20] sm:$0xff] %v515_v39   ;;  %v297_v49 = vadd.f32 %v470_v56, %v265_v32  ;;  %v305_v50 = vadd.f32 %v486_v57, %v273_v33  ;;  %v266_v43 = vadd.f32 %v670_v18, %v246_v34 }
  0xe1   :  { %v274_v16 = vadd.f32 %v670_v18, %v254_v45  ;;  %v300_v51 = vadd.f32 %v475_v36, %v268_v48  ;;  %v308_v54 = vadd.f32 %v491_v37, %v276_v42  ;;  %v315_v59 = vmax.f32 %v299_v46, 0.0 }
  0xe2   :  { %v298_v55 = vadd.f32 %v471_v44, %v266_v43  ;;  %v323_v60 = vmax.f32 %v307_v47, 0.0  ;;  %v313_v52 = vmax.f32 %v297_v49, 0.0  ;;  %v321_v53 = vmax.f32 %v305_v50, 0.0 }
  0xe3   :  { %v306_v58 = vadd.f32 %v487_v35, %v274_v16  ;;  %v316_v61 = vmax.f32 %v300_v51, 0.0  ;;  %v324_v62 = vmax.f32 %v308_v54, 0.0 }
  0xe4   :  { %v314_v63 = vmax.f32 %v298_v55, 0.0 }
  0xe5   :  { %v322_v0 = vmax.f32 %v306_v58, 0.0  ;;  %v510_v1 = vpack.c.bf16 %v316_v61, %v315_v59  ;;  %v530_v2 = vpack.c.bf16 %v324_v62, %v323_v60 }
  0xe6   :  { %v505_v56 = vpack.c.bf16 %v314_v63, %v313_v52 }
  0xe7   :  { %v525_v57 = vpack.c.bf16 %v322_v0, %v321_v53  ;;  %541 = vst [vmem:[%s769_s4 + $0x18] sm:$0xff] %v510_v1   ;;  %545 = vst [vmem:[%s769_s4 + $0x38] sm:$0xff] %v530_v2  }
  0xe8   :  { %540 = vst [vmem:[%s769_s4 + $0x10] sm:$0xff] %v505_v56  }
  0xe9   :  { %544 = vst [vmem:[%s769_s4 + $0x30] sm:$0xff] %v525_v57  }

// kernel: _lambda_.155
= control target key start
LH: loop header
LB: loop body
LE: loop exit
PB: predicated region body
PF: predicated region fallthrough
CT: control target
= control target key end

     0   :  { %vm79_vm0 = vcmask 130048   ;;  %v202_v9 = vlaneseq  ;;  %s441_s1 = inlined_call_operand.vmem [shape: bf16[16,128], index: 1, kind: input, shape index: {}]   ;;  %s442_s0 = inlined_call_operand.vmem [shape: bf16[128,16], index: 0, kind: input, shape index: {}]   ;;  %s443_s2 = inlined_call_operand.vmem [shape: f32[2,128], index: 2, kind: input, shape index: {}]   ;;  %s444_s3 = inlined_call_operand.vmem [shape: f32[128,128], index: 3, kind: output, shape index: {}]  }
   0x1   :  { %v308_v0 = vld [vmem:[%s441_s1] sm:$0xff]   ;;  %v311_v3 = vld [vmem:[%s442_s0 + $0x8] sm:$0xff]   ;;  %v313_v5 = vld [vmem:[%s442_s0 + $0x10] sm:$0xff]  }
   0x2   :  { %v309_v1 = vld [vmem:[%s442_s0] sm:$0xff]   ;;  %288 = vmatprep.subr.bf16.mxu0 %v308_v0  ;;  %306 = vmatprep.subr.bf16.mxu1 %v308_v0  ;;  %v312_v4 = vld [vmem:[%s442_s0 + $0x28] sm:$0xff]   ;;  %v314_v6 = vld [vmem:[%s442_s0 + $0x30] sm:$0xff]   ;;  %v203_v10 = vshrl.u32 %v202_v9, 7 }
   0x3   :  { %v310_v2 = vld [vmem:[%s442_s0 + $0x20] sm:$0xff]   ;;  %289 = vmatpush3.bf16.msra.mxu0 %v308_v0  ;;  %307 = vmatpush3.bf16.msra.mxu1 %v308_v0  ;;  %v315_v7 = vld [vmem:[%s442_s0 + $0x18] sm:$0xff]  }
   0x4   :  { %290 = vmatprep.mubr.msk.bf16.mxu0 %vm79_vm0, %v309_v1  ;;  %298 = vmatprep.mubr.msk.bf16.mxu1 %vm79_vm0, %v310_v2  ;;  %v316_v8 = vld [vmem:[%s442_s0 + $0x38] sm:$0xff]   ;;  %v204_v11 = vsub.s32 0, %v203_v10  ;;  %v201_v12 = vld [vmem:[%s443_s2] sm:$0x3]  ;;  %v224_v13 = vsub.s32 1, %v203_v10 }
   0x6   :  { %291 = vmatmul.mubr.msk.bf16.vlgmr.msra.gmra.mxu0 %vm79_vm0, %v311_v3  ;;  %299 = vmatmul.mubr.msk.bf16.vlgmr.msra.gmra.mxu1 %vm79_vm0, %v312_v4  ;;  %v205_v14 = vrot.slane %v201_v12, %v204_v11  ;;  %v375_v15 = vrot.slane %v201_v12, %v224_v13 }
   0x7   :  { %294 = vmatprep.mubr.msk.bf16.mxu0 %vm79_vm0, %v313_v5  ;;  %302 = vmatprep.mubr.msk.bf16.mxu1 %vm79_vm0, %v314_v6 }
   0xe   :  { %295 = vmatmul.mubr.msk.bf16.gmra.mxu0 %vm79_vm0, %v315_v7  ;;  %303 = vmatmul.mubr.msk.bf16.gmra.mxu1 %vm79_vm0, %v316_v8 }
  0xc6   :  { %v292_v16 = vpop.f32.mrf.mxu0  ;;  %v300_v17 = vpop.f32.mrf.mxu1 }
  0xc7   :  { %v208_v18 = vmul.f32 %v292_v16, %v205_v14  ;;  %v216_v19 = vmul.f32 %v300_v17, %v205_v14 }
  0xc8   :  { %v138_v20 = vpop.f32.mrf.mxu0  ;;  %v170_v21 = vpop.f32.mrf.mxu1 }
  0xc9   :  { %v228_v22 = vadd.f32 %v375_v15, %v208_v18  ;;  %v236_v23 = vadd.f32 %v375_v15, %v216_v19  ;;  %v206_v24 = vmul.f32 %v205_v14, %v138_v20  ;;  %v214_v25 = vmul.f32 %v205_v14, %v170_v21 }
  0xca   :  { %v293_v26 = vpop.f32.mrf.mxu0  ;;  %v301_v27 = vpop.f32.mrf.mxu1 }
  0xcb   :  { %244 = vst [vmem:[%s444_s3 + $0x10] sm:$0xff] %v228_v22  ;;  %252 = vst [vmem:[%s444_s3 + $0x50] sm:$0xff] %v236_v23  ;;  %v226_v28 = vadd.f32 %v375_v15, %v206_v24  ;;  %v234_v29 = vadd.f32 %v375_v15, %v214_v25  ;;  %v209_v30 = vmul.f32 %v293_v26, %v205_v14 }
  0xcc   :  { %v217_v31 = vmul.f32 %v301_v27, %v205_v14  ;;  %v141_v32 = vpop.f32.mrf.mxu0  ;;  %v173_v33 = vpop.f32.mrf.mxu1 }
  0xcd   :  { %242 = vst [vmem:[%s444_s3] sm:$0xff] %v226_v28  ;;  %250 = vst [vmem:[%s444_s3 + $0x40] sm:$0xff] %v234_v29  ;;  %v229_v34 = vadd.f32 %v375_v15, %v209_v30  ;;  %v207_v36 = vmul.f32 %v205_v14, %v141_v32  ;;  %v215_v37 = vmul.f32 %v205_v14, %v173_v33 }
  0xce   :  { %v237_v35 = vadd.f32 %v375_v15, %v217_v31  ;;  %v296_v38 = vpop.f32.mrf.mxu0  ;;  %v304_v39 = vpop.f32.mrf.mxu1 }
  0xcf   :  { %245 = vst [vmem:[%s444_s3 + $0x18] sm:$0xff] %v229_v34  ;;  %v227_v40 = vadd.f32 %v375_v15, %v207_v36  ;;  %v235_v41 = vadd.f32 %v375_v15, %v215_v37  ;;  %v212_v42 = vmul.f32 %v296_v38, %v205_v14  ;;  %v220_v43 = vmul.f32 %v304_v39, %v205_v14 }
  0xd0   :  { %253 = vst [vmem:[%s444_s3 + $0x58] sm:$0xff] %v237_v35  ;;  %v154_v44 = vpop.f32.mrf.mxu0  ;;  %v186_v45 = vpop.f32.mrf.mxu1 }
  0xd1   :  { %243 = vst [vmem:[%s444_s3 + $0x8] sm:$0xff] %v227_v40  ;;  %251 = vst [vmem:[%s444_s3 + $0x48] sm:$0xff] %v235_v41  ;;  %v232_v46 = vadd.f32 %v375_v15, %v212_v42  ;;  %v240_v47 = vadd.f32 %v375_v15, %v220_v43  ;;  %v210_v48 = vmul.f32 %v205_v14, %v154_v44 }
  0xd2   :  { %v218_v49 = vmul.f32 %v205_v14, %v186_v45  ;;  %v297_v50 = vpop.f32.mrf.mxu0  ;;  %v305_v51 = vpop.f32.mrf.mxu1 }
  0xd3   :  { %248 = vst [vmem:[%s444_s3 + $0x30] sm:$0xff] %v232_v46  ;;  %256 = vst [vmem:[%s444_s3 + $0x70] sm:$0xff] %v240_v47  ;;  %v230_v52 = vadd.f32 %v375_v15, %v210_v48  ;;  %v213_v54 = vmul.f32 %v297_v50, %v205_v14  ;;  %v221_v55 = vmul.f32 %v305_v51, %v205_v14 }
  0xd4   :  { %v238_v53 = vadd.f32 %v375_v15, %v218_v49  ;;  %v157_v56 = vpop.f32.mrf.mxu0  ;;  %v189_v57 = vpop.f32.mrf.mxu1 }
  0xd5   :  { %246 = vst [vmem:[%s444_s3 + $0x20] sm:$0xff] %v230_v52  ;;  %v233_v58 = vadd.f32 %v375_v15, %v213_v54  ;;  %v241_v59 = vadd.f32 %v375_v15, %v221_v55  ;;  %v211_v60 = vmul.f32 %v205_v14, %v157_v56  ;;  %v219_v61 = vmul.f32 %v205_v14, %v189_v57 }
  0xd6   :  { %254 = vst [vmem:[%s444_s3 + $0x60] sm:$0xff] %v238_v53 }
  0xd7   :  { %249 = vst [vmem:[%s444_s3 + $0x38] sm:$0xff] %v233_v58  ;;  %257 = vst [vmem:[%s444_s3 + $0x78] sm:$0xff] %v241_v59  ;;  %v231_v62 = vadd.f32 %v375_v15, %v211_v60  ;;  %v239_v63 = vadd.f32 %v375_v15, %v219_v61 }
  0xd9   :  { %247 = vst [vmem:[%s444_s3 + $0x28] sm:$0xff] %v231_v62  ;;  %255 = vst [vmem:[%s444_s3 + $0x68] sm:$0xff] %v239_v63 }

// kernel: _lambda_.136
= control target key start
LH: loop header
LB: loop body
LE: loop exit
PB: predicated region body
PF: predicated region fallthrough
CT: control target
= control target key end

     0   :  { %v259_v1 = vmov 0   ;;  %v164_v18 = vlaneseq  ;;  %s346_s1 = inlined_call_operand.vmem [shape: bf16[128,256], index: 1, kind: input, shape index: {}]   ;;  %s347_s0 = inlined_call_operand.vmem [shape: bf16[16,128], index: 0, kind: input, shape index: {}]   ;;  %s348_s2 = inlined_call_operand.vmem [shape: f32[2,256], index: 2, kind: input, shape index: {}]   ;;  %s349_s3 = inlined_call_operand.vmem [shape: f32[16,256], index: 3, kind: output, shape index: {}]  }
   0x1   :  { %v234_v0 = vld [vmem:[%s346_s1 + $0x74] ss:$8 sps:$4 sm:$0xff]   ;;  %151 = vmatprep.mubr.bf16.mxu0 %v259_v1  ;;  %v236_v2 = vld [vmem:[%s346_s1 + $0x70] ss:$8 sps:$4 sm:$0xff]   ;;  %v237_v3 = vld [vmem:[%s346_s1 + $0x64] ss:$8 sps:$4 sm:$0xff]  }
   0x2   :  { %119 = vmatprep.subr.bf16.mxu0 %v234_v0  ;;  %v239_v4 = vld [vmem:[%s346_s1 + $0x60] ss:$8 sps:$4 sm:$0xff]   ;;  %v240_v5 = vld [vmem:[%s346_s1 + $0x54] ss:$8 sps:$4 sm:$0xff]   ;;  %v242_v6 = vld [vmem:[%s346_s1 + $0x50] ss:$8 sps:$4 sm:$0xff]  }
   0x3   :  { %120 = vmatpush1.bf16.msra.mxu0 %v236_v2  ;;  %v243_v7 = vld [vmem:[%s346_s1 + $0x44] ss:$8 sps:$4 sm:$0xff]   ;;  %v245_v8 = vld [vmem:[%s346_s1 + $0x40] ss:$8 sps:$4 sm:$0xff]   ;;  %v246_v9 = vld [vmem:[%s346_s1 + $0x34] ss:$8 sps:$4 sm:$0xff]  }
   0x4   :  { %121 = vmatprep.subr.bf16.mxu0 %v237_v3  ;;  %v248_v10 = vld [vmem:[%s346_s1 + $0x30] ss:$8 sps:$4 sm:$0xff]   ;;  %v249_v11 = vld [vmem:[%s346_s1 + $0x24] ss:$8 sps:$4 sm:$0xff]   ;;  %v251_v12 = vld [vmem:[%s346_s1 + $0x20] ss:$8 sps:$4 sm:$0xff]  }
   0x5   :  { %v252_v13 = vld [vmem:[%s346_s1 + $0x14] ss:$8 sps:$4 sm:$0xff]   ;;  %v254_v14 = vld [vmem:[%s346_s1 + $0x10] ss:$8 sps:$4 sm:$0xff]   ;;  %v255_v15 = vld [vmem:[%s346_s1 + $0x4] ss:$8 sps:$4 sm:$0xff]  }
   0x6   :  { %v257_v16 = vld [vmem:[%s346_s1] ss:$8 sps:$4 sm:$0xff]   ;;  %v165_v19 = vshrl.u32 %v164_v18, 7 }
   0x7   :  { %122 = vmatpush1.bf16.msra.mxu0 %v239_v4  ;;  %v258_v17 = vld [vmem:[%s347_s0] sm:$0xff]  }
   0x8   :  { %123 = vmatprep.subr.bf16.mxu0 %v240_v5  ;;  %v166_v20 = vsub.s32 0, %v165_v19  ;;  %v162_v21 = vld [vmem:[%s348_s2] sm:$0xf]  ;;  %v188_v22 = vsub.s32 1, %v165_v19  ;;  %v170_v23 = vsub.s32 2, %v165_v19  ;;  %v192_v25 = vsub.s32 3, %v165_v19 }
   0xa   :  { %v167_v24 = vrot.slane %v162_v21, %v166_v20  ;;  %v189_v26 = vrot.slane %v162_v21, %v188_v22  ;;  %v171_v27 = vrot.slane %v162_v21, %v170_v23  ;;  %v193_v29 = vrot.slane %v162_v21, %v192_v25 }
   0xb   :  { %124 = vmatpush1.bf16.msra.mxu0 %v242_v6 }
   0xc   :  { %125 = vmatprep.subr.bf16.mxu0 %v243_v7  ;;  %v177_v28 = vrot.slane %v167_v24, %v166_v20  ;;  %v199_v30 = vrot.slane %v189_v26, %v188_v22  ;;  %v181_v31 = vrot.slane %v171_v27, %v166_v20  ;;  %v203_v34 = vrot.slane %v193_v29, %v188_v22 }
   0xf   :  { %126 = vmatpush1.bf16.msra.mxu0 %v245_v8 }
  0x10   :  { %127 = vmatprep.subr.bf16.mxu0 %v246_v9 }
  0x13   :  { %128 = vmatpush1.bf16.msra.mxu0 %v248_v10 }
  0x14   :  { %129 = vmatprep.subr.bf16.mxu0 %v249_v11 }
  0x17   :  { %130 = vmatpush1.bf16.msra.mxu0 %v251_v12 }
  0x18   :  { %131 = vmatprep.subr.bf16.mxu0 %v252_v13 }
  0x1b   :  { %132 = vmatpush1.bf16.msra.mxu0 %v254_v14 }
  0x1c   :  { %133 = vmatprep.subr.bf16.mxu0 %v255_v15 }
  0x1f   :  { %134 = vmatpush1.bf16.msra.mxu0 %v257_v16 }
  0x22   :  { %152 = vmatmul.mubr.bf16.vlgmr.msra.gmra.mxu0 %v258_v17 }
  0xe2   :  { %v153_v32 = vpop.f32.mrf.mxu0 }
  0xe3   :  { %v182_v33 = vmul.f32 %v177_v28, %v153_v32 }
  0xe4   :  { %v155_v35 = vpop.f32.mrf.mxu0 }
  0xe5   :  { %v204_v36 = vadd.f32 %v199_v30, %v182_v33  ;;  %v183_v37 = vmul.f32 %v181_v31, %v155_v35 }
  0xe6   :  { %v157_v38 = vpop.f32.mrf.mxu0 }
  0xe7   :  { %208 = vst [vmem:[%s349_s3] sm:$0xff] %v204_v36  ;;  %v205_v39 = vadd.f32 %v203_v34, %v183_v37  ;;  %v184_v40 = vmul.f32 %v177_v28, %v157_v38 }
  0xe8   :  { %v159_v41 = vpop.f32.mrf.mxu0 }
  0xe9   :  { %209 = vst [vmem:[%s349_s3 + $0x8] sm:$0xff] %v205_v39  ;;  %v206_v42 = vadd.f32 %v199_v30, %v184_v40  ;;  %v185_v43 = vmul.f32 %v181_v31, %v159_v41 }
  0xeb   :  { %210 = vst [vmem:[%s349_s3 + $0x10] sm:$0xff] %v206_v42  ;;  %v207_v44 = vadd.f32 %v203_v34, %v185_v43 }
  0xed   :  { %211 = vst [vmem:[%s349_s3 + $0x18] sm:$0xff] %v207_v44 }

</bundles_post_ra>
